<compile_context>
chip_gen: v7x
topology: tpu7x:2x2x1
jax: 0.10.0
libtpu: 0.0.40
codegen_flags: <defaults>
</compile_context>

<pallas_src>
import functools

import jax
import jax.numpy as jnp
import numpy as np
from jax import lax
from jax.experimental import pallas as pl
from jax.experimental.pallas import tpu as pltpu

_LANE = 128
_SUBLANE = 8


def _round_up(x, m):
    return (x + m - 1) // m * m


def _tensorcores_per_chip():
    """Best-effort TensorCore count per chip (v7x: 2).  Defaults to 1."""
    try:
        info = pltpu.get_tpu_info()
        for attr in ("num_cores", "num_tensorcores", "cores_per_chip"):
            v = getattr(info, attr, None)
            if v:
                return int(v)
    except Exception:
        pass
    return 1


def _vmem_capacity_bytes():
    """Physical VMEM bytes (v5e/v6e 128 MiB, v7x 64 MiB).  Conservative default."""
    try:
        cap = int(pltpu.get_tpu_info().vmem_capacity_bytes)
        if cap > 0:
            return cap
    except Exception:
        pass
    return 64 * 1024 * 1024


def _invariant_spec(block_shape, index_map):
    """Grid-invariant operand (constant index map): request a single VMEM
    buffer instead of the default double-buffering — weights dominate VMEM at
    realistic hidden sizes."""
    try:
        return pl.BlockSpec(block_shape, index_map,
                            pipeline_mode=pl.Buffered(1))
    except Exception:  # older API without pipeline_mode: fall back silently
        return pl.BlockSpec(block_shape, index_map)


def _vmem_footprint_bytes(Tc, Bb, INp, Hp):
    """Estimate of the kernel's VMEM working set."""
    FH = 4 * Hp
    x_blk = 2 * Tc * Bb * INp * 2            # bf16 input block, double-buffered
    out_blk = 2 * Tc * Bb * Hp * 2           # bf16 output block, double-buffered
    weights = (INp * FH + Hp * FH) * 2 + FH * 4  # bf16 weights (x1) + f32 bias
    state = 2 * 2 * Bb * Hp * 4              # f32 h/c output blocks
    gx = Tc * Bb * FH * 4                    # f32 gate pre-activation scratch
    return x_blk + out_blk + weights + state + gx


# ----------------------------------------------------------------------------
# Pallas kernel: one LSTM layer, grid = (batch_blocks, time_chunks).
#   batch axis  -> "parallel"  (independent; megacore-splittable on v7x)
#   time axis   -> "arbitrary" (sequential; h/c carried in the constant-index
#                               h_out/c_out VMEM-resident output blocks)
# ----------------------------------------------------------------------------
def _lstm_layer_kernel(x_ref, wih_ref, whh_ref, b_ref,
                       out_ref, h_ref, c_ref,
                       gx_scr, *, seq_len, time_chunk, needs_mask, unroll):
    c_idx = pl.program_id(1)

    @pl.when(c_idx == 0)
    def _():
        h_ref[...] = jnp.zeros_like(h_ref)
        c_ref[...] = jnp.zeros_like(c_ref)

    Tc, B, INp = x_ref.shape          # time_chunk, batch_block, padded in-dim
    Hp = h_ref.shape[-1]              # padded hidden (multiple of 128)

    # ---- Hoisted input projection: one big bf16 MXU call per chunk ----
    # (Tc, B, INp) -> (Tc*B, INp) is a pure sublane-major collapse (B % 8 == 0),
    # so the reshape is a layout no-op, not a VMEM copy.
    # TODO(synk): if a bundle dump ever shows a materialized copy, switch to a
    # 3-D dot_general with a (Tc, B, 4Hp) scratch indexed as gx_scr[t].
    x_flat = x_ref[...].reshape(Tc * B, INp)                       # bf16
    gx_scr[...] = (jnp.dot(x_flat, wih_ref[...],
                           preferred_element_type=jnp.float32)
                   + b_ref[...])                                   # f32

    whh = whh_ref[...]               # resident (Hp, 4Hp) bf16 recurrent weights

    def step(t, carry):
        h, c = carry                 # f32 carries (keep VPU/EUP math in f32)
        row = pl.multiple_of(t * B, _SUBLANE)
        gates = (gx_scr[pl.ds(row, B), :]
                 + jnp.dot(h.astype(whh.dtype), whh,
                           preferred_element_type=jnp.float32))
        # Lane-aligned gate slices (Hp is a multiple of 128).
        i_g = jax.nn.sigmoid(gates[:, 0 * Hp:1 * Hp])
        f_g = jax.nn.sigmoid(gates[:, 1 * Hp:2 * Hp])
        g_g = jnp.tanh(gates[:, 2 * Hp:3 * Hp])
        o_g = jax.nn.sigmoid(gates[:, 3 * Hp:4 * Hp])
        c_new = f_g * c + i_g * g_g
        h_new = o_g * jnp.tanh(c_new)
        out_ref[t] = h_new.astype(out_ref.dtype)
        if needs_mask:
            # Padded tail of the (zero-padded) sequence: freeze the state so
            # the extra steps are no-ops.  The out_ref rows written there are
            # sliced off by the wrapper.
            valid = (c_idx * time_chunk + t) < seq_len
            h_new = jnp.where(valid, h_new, h)
            c_new = jnp.where(valid, c_new, c)
        return h_new, c_new

    # Static trip count -> unrollable; state stays in vregs across the loop.
    h_f, c_f = lax.fori_loop(0, time_chunk, step,
                             (h_ref[...], c_ref[...]), unroll=unroll)
    h_ref[...] = h_f
    c_ref[...] = c_f


def lstm_layer(x_seq, w_ih_t, w_hh_t, bias, *, time_chunk=32,
               batch_block=None):
    """One LSTM layer over a sequence (padded, lane-aligned operands).

    x_seq:  (S, Bp, INp) bf16  Bp % 8 == 0, INp % 128 == 0
    w_ih_t: (INp, 4*Hp)  bf16  (transposed, per-gate zero-padded)
    w_hh_t: (Hp, 4*Hp)   bf16
    bias:   (1, 4*Hp)    f32   (b_ih + b_hh, per-gate zero-padded)
    returns out_seq (S, Bp, Hp) bf16, h_final (Bp, Hp) f32, c_final (Bp, Hp) f32
    """
    if x_seq.dtype != jnp.bfloat16:
        x_seq = x_seq.astype(jnp.bfloat16)
    S, Bp, INp = x_seq.shape
    Hp = w_hh_t.shape[0]
    FH = 4 * Hp

    # --- Batch split: only when the chip has >=2 TensorCores (v7x) AND each
    # half still feeds the MXU with a reasonable M.  On single-TC v5e/v6e a
    # split would just double the serial chunk count. ---
    if batch_block is None:
        batch_block = Bp
        if Bp % 16 == 0 and (Bp // 2) >= 128 and _tensorcores_per_chip() >= 2:
            batch_block = Bp // 2
    Bb = batch_block
    assert Bp % Bb == 0 and Bb % _SUBLANE == 0
    n_b = Bp // Bb

    # --- Generation-aware time chunk: shrink Tc until the footprint fits the
    # chip's VMEM (v7x has only 64 MiB; v5e/v6e have 128 MiB). ---
    cap = _vmem_capacity_bytes()
    budget = max(cap - (8 << 20), 16 << 20)
    Tc = max(1, min(S, time_chunk))
    while Tc > 8 and _vmem_footprint_bytes(Tc, Bb, INp, Hp) > budget:
        Tc //= 2

    n_chunks = -(-S // Tc)
    Sp = n_chunks * Tc
    if Sp != S:
        x_seq = jnp.pad(x_seq, ((0, Sp - S), (0, 0), (0, 0)))
    needs_mask = (Sp != S)
    unroll = Tc if Tc <= 8 else 4

    footprint = _vmem_footprint_bytes(Tc, Bb, INp, Hp)
    vmem_limit = int(min(budget,
                         max(1.5 * footprint + (4 << 20), 32 << 20)))

    kernel = functools.partial(_lstm_layer_kernel, seq_len=S, time_chunk=Tc,
                               needs_mask=needs_mask, unroll=unroll)

    grid_spec = pltpu.PrefetchScalarGridSpec(
        num_scalar_prefetch=0,
        grid=(n_b, n_chunks),
        in_specs=[
            pl.BlockSpec((Tc, Bb, INp), lambda b, c: (c, b, 0)),
            _invariant_spec((INp, FH), lambda b, c: (0, 0)),   # single-buffered
            _invariant_spec((Hp, FH), lambda b, c: (0, 0)),    # single-buffered
            _invariant_spec((1, FH), lambda b, c: (0, 0)),     # single-buffered
        ],
        out_specs=[
            pl.BlockSpec((Tc, Bb, Hp), lambda b, c: (c, b, 0)),
            pl.BlockSpec((Bb, Hp), lambda b, c: (b, 0)),   # state accumulators
            pl.BlockSpec((Bb, Hp), lambda b, c: (b, 0)),
        ],
        scratch_shapes=[
            pltpu.VMEM((Tc * Bb, FH), jnp.float32),  # hoisted gate pre-acts
        ],
    )

    out_shapes = (
        jax.ShapeDtypeStruct((Sp, Bp, Hp), jnp.bfloat16),  # inter-layer acts
        jax.ShapeDtypeStruct((Bp, Hp), jnp.float32),       # final hidden
        jax.ShapeDtypeStruct((Bp, Hp), jnp.float32),       # final cell
    )

    out_seq, h_f, c_f = pl.pallas_call(
        kernel,
        out_shape=out_shapes,
        grid_spec=grid_spec,
        compiler_params=pltpu.CompilerParams(
            dimension_semantics=("parallel", "arbitrary"),
            vmem_limit_bytes=vmem_limit),
    )(x_seq, w_ih_t, w_hh_t, bias)

    if Sp != S:
        out_seq = out_seq[:S]
    return out_seq, h_f, c_f


# ----------------------------------------------------------------------------
# Parameters: raw (PyTorch-layout) init + padded/transposed kernel weights.
# ----------------------------------------------------------------------------
def init_encoder_params(key, input_size, embedding_size, hidden_size,
                        num_layers):
    """Raw params, PyTorch shapes (uniform +/- 1/sqrt(H) for the LSTM)."""
    keys = jax.random.split(key, 1 + 4 * num_layers)
    params = {"embedding": jax.random.normal(
        keys[0], (input_size, embedding_size), dtype=jnp.float32)}
    bound = 1.0 / np.sqrt(hidden_size)
    layers = []
    for l in range(num_layers):
        in_dim = embedding_size if l == 0 else hidden_size
        k0, k1, k2, k3 = keys[1 + 4 * l: 1 + 4 * (l + 1)]
        layers.append({
            "w_ih": jax.random.uniform(k0, (4 * hidden_size, in_dim),
                                       minval=-bound, maxval=bound,
                                       dtype=jnp.float32),
            "w_hh": jax.random.uniform(k1, (4 * hidden_size, hidden_size),
                                       minval=-bound, maxval=bound,
                                       dtype=jnp.float32),
            "b_ih": jax.random.uniform(k2, (4 * hidden_size,),
                                       minval=-bound, maxval=bound,
                                       dtype=jnp.float32),
            "b_hh": jax.random.uniform(k3, (4 * hidden_size,),
                                       minval=-bound, maxval=bound,
                                       dtype=jnp.float32),
        })
    params["layers"] = layers
    return params


def _pad_gates_cols(w_t, H, Hp):
    """(IN, 4H) -> (IN, 4Hp): zero-pad each i|f|g|o gate block to Hp lanes."""
    IN = w_t.shape[0]
    w = w_t.reshape(IN, 4, H)
    w = jnp.pad(w, ((0, 0), (0, 0), (0, Hp - H)))
    return w.reshape(IN, 4 * Hp)


def prepare_kernel_params(params):
    """Transpose + zero-pad weights to lane/sublane-aligned kernel layout.

    Zero-padding is exactly semantics-preserving (padded hidden units see
    all-zero weights/bias so their h/c stay 0; zero-padded input rows add
    nothing to real gates).  Weights / embedding are stored in bfloat16 for
    bf16 MXU feeds and half the weight DMA / VMEM; the bias stays f32 (it is
    added after the f32-accumulating matmul)."""
    E = params["embedding"].shape[1]
    H = params["layers"][0]["w_hh"].shape[1]
    Ep = _round_up(E, _LANE)
    Hp = _round_up(H, _LANE)

    kparams = {"embedding": jnp.pad(params["embedding"],
                                    ((0, 0), (0, Ep - E))).astype(jnp.bfloat16)}
    layers = []
    for l, lp in enumerate(params["layers"]):
        in_dim = E if l == 0 else H
        in_p = Ep if l == 0 else Hp
        w_ih_t = _pad_gates_cols(lp["w_ih"].T, H, Hp)        # (in_dim, 4Hp)
        w_ih_t = jnp.pad(w_ih_t, ((0, in_p - in_dim), (0, 0)))
        w_hh_t = _pad_gates_cols(lp["w_hh"].T, H, Hp)        # (H, 4Hp)
        w_hh_t = jnp.pad(w_hh_t, ((0, Hp - H), (0, 0)))
        bias = _pad_gates_cols((lp["b_ih"] + lp["b_hh"]).reshape(1, -1), H, Hp)
        layers.append({"w_ih_t": w_ih_t.astype(jnp.bfloat16),
                       "w_hh_t": w_hh_t.astype(jnp.bfloat16),
                       "bias": bias.astype(jnp.float32)})
    kparams["layers"] = layers
    return kparams


# ----------------------------------------------------------------------------
# Encoder forward (kernel path) and pure-JAX reference.
# ----------------------------------------------------------------------------
@functools.partial(jax.jit, static_argnames=("hidden_size",))
def encoder_forward(kparams, x, *, hidden_size):
    """x: int32 (seq_len, batch). Returns (hidden, cell),
    each (num_layers, batch, hidden)."""
    S, B = x.shape
    Bp = _round_up(B, _SUBLANE)
    if Bp != B:
        x = jnp.pad(x, ((0, 0), (0, Bp - B)))    # pad batch with token 0

    # Embedding lookup (gather) in bf16 — halves the (S,B,Ep) HBM round trip.
    # TODO(synk): the gather could move in-kernel via scalar-prefetched token
    # ids + pl.Element-indexed BlockSpec to avoid materializing (S,B,E) in HBM.
    emb = jnp.take(kparams["embedding"], x, axis=0)   # (S, Bp, Ep) bf16

    # Dropout: inference (model.eval()) semantics -> identity.
    # TODO(synk): training-mode nn.Dropout(p) / inter-layer LSTM dropout
    # is omitted.

    # TODO(synk): layers run as separate pallas_calls (inter-layer activation
    # round-trips HBM in bf16); full layer fusion would need a wavefront
    # schedule.
    h_list, c_list = [], []
    layer_in = emb
    for lp in kparams["layers"]:
        out_seq, h_f, c_f = lstm_layer(layer_in, lp["w_ih_t"],
                                       lp["w_hh_t"], lp["bias"])
        h_list.append(h_f)
        c_list.append(c_f)
        layer_in = out_seq

    hidden = jnp.stack(h_list, axis=0)[:, :B, :hidden_size]
    cell = jnp.stack(c_list, axis=0)[:, :B, :hidden_size]
    return hidden, cell


def encoder_reference(params, x):
    """Pure-JAX reference (lax.scan LSTM, f32) on unpadded parameters."""
    emb = jnp.take(params["embedding"].astype(jnp.float32), x, axis=0)
    h_list, c_list = [], []
    layer_in = emb
    for lp in params["layers"]:
        H = lp["w_hh"].shape[1]
        B = layer_in.shape[1]
        w_ih_t = lp["w_ih"].T
        w_hh_t = lp["w_hh"].T
        b = (lp["b_ih"] + lp["b_hh"]).reshape(1, -1)

        def step(carry, x_t, w_ih_t=w_ih_t, w_hh_t=w_hh_t, b=b, H=H):
            h, c = carry
            gates = x_t @ w_ih_t + h @ w_hh_t + b
            i = jax.nn.sigmoid(gates[:, 0 * H:1 * H])
            f = jax.nn.sigmoid(gates[:, 1 * H:2 * H])
            g = jnp.tanh(gates[:, 2 * H:3 * H])
            o = jax.nn.sigmoid(gates[:, 3 * H:4 * H])
            c_new = f * c + i * g
            h_new = o * jnp.tanh(c_new)
            return (h_new, c_new), h_new

        init = (jnp.zeros((B, H), jnp.float32), jnp.zeros((B, H), jnp.float32))
        (h_f, c_f), outs = lax.scan(step, init, layer_in)
        h_list.append(h_f)
        c_list.append(c_f)
        layer_in = outs
    return jnp.stack(h_list, 0), jnp.stack(c_list, 0)


def _bf16_round_params(params):
    """Reference params with weights/embedding rounded through bf16 (matches
    the kernel's weight storage; activations stay f32)."""
    q = {"embedding":
         params["embedding"].astype(jnp.bfloat16).astype(jnp.float32)}
    q["layers"] = [{
        "w_ih": lp["w_ih"].astype(jnp.bfloat16).astype(jnp.float32),
        "w_hh": lp["w_hh"].astype(jnp.bfloat16).astype(jnp.float32),
        "b_ih": lp["b_ih"],
        "b_hh": lp["b_hh"],
    } for lp in params["layers"]]
    return q


if __name__ == "__main__":
    # Small shapes consistent with the module.
    input_size = 50        # vocab
    embedding_size = 32
    hidden_size = 32
    num_layers = 2
    seq_len = 8
    batch = 8

    key = jax.random.PRNGKey(0)
    pkey, xkey = jax.random.split(key)
    params = init_encoder_params(pkey, input_size, embedding_size,
                                 hidden_size, num_layers)
    kparams = prepare_kernel_params(params)
    x = jax.random.randint(xkey, (seq_len, batch), 0, input_size,
                           dtype=jnp.int32)

    hidden, cell = encoder_forward(kparams, x, hidden_size=hidden_size)
    hidden = jax.block_until_ready(hidden)
    cell = jax.block_until_ready(cell)

    assert hidden.shape == (num_layers, batch, hidden_size)
    assert cell.shape == (num_layers, batch, hidden_size)

    # Primary check: same bf16-rounded weights as the kernel, f32 activations.
    h_ref_q, c_ref_q = encoder_reference(_bf16_round_params(params), x)
    np.testing.assert_allclose(np.asarray(hidden), np.asarray(h_ref_q),
                               rtol=5e-2, atol=2e-2)
    np.testing.assert_allclose(np.asarray(cell), np.asarray(c_ref_q),
                               rtol=5e-2, atol=2e-2)

    # Sanity check against the full-f32 reference (looser: bf16 MXU feeds and
    # bf16 inter-layer activations in the kernel path).
    h_ref, c_ref = encoder_reference(params, x)
    np.testing.assert_allclose(np.asarray(hidden), np.asarray(h_ref),
                               rtol=1e-1, atol=6e-2)
    np.testing.assert_allclose(np.asarray(cell), np.asarray(c_ref),
                               rtol=1e-1, atol=6e-2)

    print("KERNEL_OK")
</pallas_src>

<mosaic_0001>
module attributes {stable_mosaic.version = 11 : i64} {
  func.func @_lstm_layer_kernel(%arg0: i32, %arg1: i32, %arg2: memref<8x8x128xbf16, #tpu.memory_space<vmem>>, %arg3: memref<128x512xbf16, #tpu.memory_space<vmem>>, %arg4: memref<128x512xbf16, #tpu.memory_space<vmem>>, %arg5: memref<1x512xf32, #tpu.memory_space<vmem>>, %arg6: memref<8x8x128xbf16, #tpu.memory_space<vmem>>, %arg7: memref<8x128xf32, #tpu.memory_space<vmem>>, %arg8: memref<8x128xf32, #tpu.memory_space<vmem>>, %arg9: memref<64x512xf32, #tpu.memory_space<vmem>>) attributes {dimension_semantics = [#tpu.dimension_semantics<parallel>, #tpu.dimension_semantics<arbitrary>], iteration_bounds = array<i64: 1, 1>, scalar_prefetch = 0 : i64, scratch_operands = 1 : i64, tpu.core_type = #tpu.core_type<tc>, window_params = [{transform_indices = @transform_0, window_bounds = array<i64: 8, 8, 128>}, {pipeline_mode = #tpu.pipeline_mode<synchronous>, transform_indices = @transform_1, window_bounds = array<i64: 128, 512>}, {pipeline_mode = #tpu.pipeline_mode<synchronous>, transform_indices = @transform_2, window_bounds = array<i64: 128, 512>}, {pipeline_mode = #tpu.pipeline_mode<synchronous>, transform_indices = @transform_3, window_bounds = array<i64: 1, 512>}, {transform_indices = @transform_4, window_bounds = array<i64: 8, 8, 128>}, {transform_indices = @transform_5, window_bounds = array<i64: 8, 128>}, {transform_indices = @transform_6, window_bounds = array<i64: 8, 128>}]} {
    %c0_i32 = arith.constant 0 : i32
    %0 = arith.cmpi eq, %arg1, %c0_i32 : i32
    %1 = arith.extui %0 : i1 to i32
    %c0_i32_0 = arith.constant 0 : i32
    %2 = arith.cmpi ne, %1, %c0_i32_0 : i32
    scf.if %2 {
      %cst_84 = arith.constant 0.000000e+00 : f32
      %312 = vector.broadcast %cst_84 : f32 to vector<8x128xf32>
      %c0_85 = arith.constant 0 : index
      %c0_86 = arith.constant 0 : index
      %313 = vector.load %arg7[%c0_85, %c0_86] : memref<8x128xf32, #tpu.memory_space<vmem>>, vector<8x128xf32>
      tpu.vector_store %arg7[%c0_85, %c0_86], %312 {strides = array<i32>} : memref<8x128xf32, #tpu.memory_space<vmem>>, vector<8x128xf32>,
      %cst_87 = arith.constant 0.000000e+00 : f32
      %314 = vector.broadcast %cst_87 : f32 to vector<8x128xf32>
      %c0_88 = arith.constant 0 : index
      %c0_89 = arith.constant 0 : index
      %315 = vector.load %arg8[%c0_88, %c0_89] : memref<8x128xf32, #tpu.memory_space<vmem>>, vector<8x128xf32>
      tpu.vector_store %arg8[%c0_88, %c0_89], %314 {strides = array<i32>} : memref<8x128xf32, #tpu.memory_space<vmem>>, vector<8x128xf32>,
    } else {
    }
    %c0 = arith.constant 0 : index
    %c0_1 = arith.constant 0 : index
    %c0_2 = arith.constant 0 : index
    %3 = vector.load %arg2[%c0, %c0_1, %c0_2] : memref<8x8x128xbf16, #tpu.memory_space<vmem>>, vector<8x8x128xbf16>
    %4 = vector.shape_cast %3 : vector<8x8x128xbf16> to vector<64x128xbf16>
    %c0_3 = arith.constant 0 : index
    %c0_4 = arith.constant 0 : index
    %5 = vector.load %arg3[%c0_3, %c0_4] : memref<128x512xbf16, #tpu.memory_space<vmem>>, vector<128x512xbf16>
    %cst = arith.constant dense<0.000000e+00> : vector<64x512xf32>
    %6 = tpu.matmul %4, %5, %cst {dimension_numbers = #tpu.dot_dimension_numbers<[1], [0], [0], [1], [0, 0, 1, 1], [], []>} : vector<64x128xbf16>, vector<128x512xbf16>, vector<64x512xf32> -> vector<64x512xf32>
    %c0_5 = arith.constant 0 : index
    %c0_6 = arith.constant 0 : index
    %7 = vector.load %arg5[%c0_5, %c0_6] : memref<1x512xf32, #tpu.memory_space<vmem>>, vector<1x512xf32>
    %8 = vector.broadcast %7 : vector<1x512xf32> to vector<64x512xf32>
    %9 = arith.addf %6, %8 : vector<64x512xf32>
    %c0_7 = arith.constant 0 : index
    %c0_8 = arith.constant 0 : index
    %10 = vector.load %arg9[%c0_7, %c0_8] : memref<64x512xf32, #tpu.memory_space<vmem>>, vector<64x512xf32>
    tpu.vector_store %arg9[%c0_7, %c0_8], %9 {strides = array<i32>} : memref<64x512xf32, #tpu.memory_space<vmem>>, vector<64x512xf32>,
    %c0_9 = arith.constant 0 : index
    %c0_10 = arith.constant 0 : index
    %11 = vector.load %arg4[%c0_9, %c0_10] : memref<128x512xbf16, #tpu.memory_space<vmem>>, vector<128x512xbf16>
    %c0_11 = arith.constant 0 : index
    %c0_12 = arith.constant 0 : index
    %12 = vector.load %arg7[%c0_11, %c0_12] : memref<8x128xf32, #tpu.memory_space<vmem>>, vector<8x128xf32>
    %c0_13 = arith.constant 0 : index
    %c0_14 = arith.constant 0 : index
    %13 = vector.load %arg8[%c0_13, %c0_14] : memref<8x128xf32, #tpu.memory_space<vmem>>, vector<8x128xf32>
    %c0_i32_15 = arith.constant 0 : i32
    %c8_i32 = arith.constant 8 : i32
    %14 = arith.muli %c0_i32_15, %c8_i32 : i32
    %15 = tpu.assume_multiple %14, 8 : i32
    %16 = arith.index_cast %15 : i32 to index
    %c0_16 = arith.constant 0 : index
    %17 = vector.load %arg9[%16, %c0_16] : memref<64x512xf32, #tpu.memory_space<vmem>>, vector<8x512xf32>
    %18 = arith.truncf %12 : vector<8x128xf32> to vector<8x128xbf16>
    %cst_17 = arith.constant dense<0.000000e+00> : vector<8x512xf32>
    %19 = tpu.matmul %18, %11, %cst_17 {dimension_numbers = #tpu.dot_dimension_numbers<[1], [0], [0], [1], [0, 0, 1, 1], [], []>} : vector<8x128xbf16>, vector<128x512xbf16>, vector<8x512xf32> -> vector<8x512xf32>
    %20 = arith.addf %17, %19 : vector<8x512xf32>
    %21 = vector.extract_strided_slice %20 {offsets = [0, 0], sizes = [8, 128], strides = [1, 1]} : vector<8x512xf32> to vector<8x128xf32>
    %22 = arith.negf %21 : vector<8x128xf32>
    %23 = math.exp %22 : vector<8x128xf32>
    %cst_18 = arith.constant 1.000000e+00 : f32
    %24 = vector.broadcast %cst_18 : f32 to vector<8x128xf32>
    %25 = arith.addf %24, %23 : vector<8x128xf32>
    %26 = arith.divf %24, %25 : vector<8x128xf32>
    %27 = vector.extract_strided_slice %20 {offsets = [0, 128], sizes = [8, 128], strides = [1, 1]} : vector<8x512xf32> to vector<8x128xf32>
    %28 = arith.negf %27 : vector<8x128xf32>
    %29 = math.exp %28 : vector<8x128xf32>
    %cst_19 = arith.constant 1.000000e+00 : f32
    %30 = vector.broadcast %cst_19 : f32 to vector<8x128xf32>
    %31 = arith.addf %30, %29 : vector<8x128xf32>
    %32 = arith.divf %30, %31 : vector<8x128xf32>
    %33 = vector.extract_strided_slice %20 {offsets = [0, 256], sizes = [8, 128], strides = [1, 1]} : vector<8x512xf32> to vector<8x128xf32>
    %34 = math.tanh %33 : vector<8x128xf32>
    %35 = vector.extract_strided_slice %20 {offsets = [0, 384], sizes = [8, 128], strides = [1, 1]} : vector<8x512xf32> to vector<8x128xf32>
    %36 = arith.negf %35 : vector<8x128xf32>
    %37 = math.exp %36 : vector<8x128xf32>
    %cst_20 = arith.constant 1.000000e+00 : f32
    %38 = vector.broadcast %cst_20 : f32 to vector<8x128xf32>
    %39 = arith.addf %38, %37 : vector<8x128xf32>
    %40 = arith.divf %38, %39 : vector<8x128xf32>
    %41 = arith.mulf %32, %13 : vector<8x128xf32>
    %42 = arith.mulf %26, %34 : vector<8x128xf32>
    %43 = arith.addf %41, %42 : vector<8x128xf32>
    %44 = math.tanh %43 : vector<8x128xf32>
    %45 = arith.mulf %40, %44 : vector<8x128xf32>
    %46 = arith.truncf %45 : vector<8x128xf32> to vector<8x128xbf16>
    %47 = arith.index_cast %c0_i32_15 : i32 to index
    %c0_21 = arith.constant 0 : index
    %c0_22 = arith.constant 0 : index
    %48 = vector.load %arg6[%47, %c0_21, %c0_22] : memref<8x8x128xbf16, #tpu.memory_space<vmem>>, vector<1x8x128xbf16>
    %49 = vector.shape_cast %48 : vector<1x8x128xbf16> to vector<8x128xbf16>
    %50 = vector.shape_cast %46 : vector<8x128xbf16> to vector<1x8x128xbf16>
    tpu.vector_store %arg6[%47, %c0_21, %c0_22], %50 {strides = array<i32>} : memref<8x8x128xbf16, #tpu.memory_space<vmem>>, vector<1x8x128xbf16>,
    %c1_i32 = arith.constant 1 : i32
    %c8_i32_23 = arith.constant 8 : i32
    %51 = arith.muli %c1_i32, %c8_i32_23 : i32
    %52 = tpu.assume_multiple %51, 8 : i32
    %53 = arith.index_cast %52 : i32 to index
    %c0_24 = arith.constant 0 : index
    %54 = vector.load %arg9[%53, %c0_24] : memref<64x512xf32, #tpu.memory_space<vmem>>, vector<8x512xf32>
    %55 = arith.truncf %45 : vector<8x128xf32> to vector<8x128xbf16>
    %cst_25 = arith.constant dense<0.000000e+00> : vector<8x512xf32>
    %56 = tpu.matmul %55, %11, %cst_25 {dimension_numbers = #tpu.dot_dimension_numbers<[1], [0], [0], [1], [0, 0, 1, 1], [], []>} : vector<8x128xbf16>, vector<128x512xbf16>, vector<8x512xf32> -> vector<8x512xf32>
    %57 = arith.addf %54, %56 : vector<8x512xf32>
    %58 = vector.extract_strided_slice %57 {offsets = [0, 0], sizes = [8, 128], strides = [1, 1]} : vector<8x512xf32> to vector<8x128xf32>
    %59 = arith.negf %58 : vector<8x128xf32>
    %60 = math.exp %59 : vector<8x128xf32>
    %cst_26 = arith.constant 1.000000e+00 : f32
    %61 = vector.broadcast %cst_26 : f32 to vector<8x128xf32>
    %62 = arith.addf %61, %60 : vector<8x128xf32>
    %63 = arith.divf %61, %62 : vector<8x128xf32>
    %64 = vector.extract_strided_slice %57 {offsets = [0, 128], sizes = [8, 128], strides = [1, 1]} : vector<8x512xf32> to vector<8x128xf32>
    %65 = arith.negf %64 : vector<8x128xf32>
    %66 = math.exp %65 : vector<8x128xf32>
    %cst_27 = arith.constant 1.000000e+00 : f32
    %67 = vector.broadcast %cst_27 : f32 to vector<8x128xf32>
    %68 = arith.addf %67, %66 : vector<8x128xf32>
    %69 = arith.divf %67, %68 : vector<8x128xf32>
    %70 = vector.extract_strided_slice %57 {offsets = [0, 256], sizes = [8, 128], strides = [1, 1]} : vector<8x512xf32> to vector<8x128xf32>
    %71 = math.tanh %70 : vector<8x128xf32>
    %72 = vector.extract_strided_slice %57 {offsets = [0, 384], sizes = [8, 128], strides = [1, 1]} : vector<8x512xf32> to vector<8x128xf32>
    %73 = arith.negf %72 : vector<8x128xf32>
    %74 = math.exp %73 : vector<8x128xf32>
    %cst_28 = arith.constant 1.000000e+00 : f32
    %75 = vector.broadcast %cst_28 : f32 to vector<8x128xf32>
    %76 = arith.addf %75, %74 : vector<8x128xf32>
    %77 = arith.divf %75, %76 : vector<8x128xf32>
    %78 = arith.mulf %69, %43 : vector<8x128xf32>
    %79 = arith.mulf %63, %71 : vector<8x128xf32>
    %80 = arith.addf %78, %79 : vector<8x128xf32>
    %81 = math.tanh %80 : vector<8x128xf32>
    %82 = arith.mulf %77, %81 : vector<8x128xf32>
    %83 = arith.truncf %82 : vector<8x128xf32> to vector<8x128xbf16>
    %84 = arith.index_cast %c1_i32 : i32 to index
    %c0_29 = arith.constant 0 : index
    %c0_30 = arith.constant 0 : index
    %85 = vector.load %arg6[%84, %c0_29, %c0_30] : memref<8x8x128xbf16, #tpu.memory_space<vmem>>, vector<1x8x128xbf16>
    %86 = vector.shape_cast %85 : vector<1x8x128xbf16> to vector<8x128xbf16>
    %87 = vector.shape_cast %83 : vector<8x128xbf16> to vector<1x8x128xbf16>
    tpu.vector_store %arg6[%84, %c0_29, %c0_30], %87 {strides = array<i32>} : memref<8x8x128xbf16, #tpu.memory_space<vmem>>, vector<1x8x128xbf16>,
    %c2_i32 = arith.constant 2 : i32
    %c8_i32_31 = arith.constant 8 : i32
    %88 = arith.muli %c2_i32, %c8_i32_31 : i32
    %89 = tpu.assume_multiple %88, 8 : i32
    %90 = arith.index_cast %89 : i32 to index
    %c0_32 = arith.constant 0 : index
    %91 = vector.load %arg9[%90, %c0_32] : memref<64x512xf32, #tpu.memory_space<vmem>>, vector<8x512xf32>
    %92 = arith.truncf %82 : vector<8x128xf32> to vector<8x128xbf16>
    %cst_33 = arith.constant dense<0.000000e+00> : vector<8x512xf32>
    %93 = tpu.matmul %92, %11, %cst_33 {dimension_numbers = #tpu.dot_dimension_numbers<[1], [0], [0], [1], [0, 0, 1, 1], [], []>} : vector<8x128xbf16>, vector<128x512xbf16>, vector<8x512xf32> -> vector<8x512xf32>
    %94 = arith.addf %91, %93 : vector<8x512xf32>
    %95 = vector.extract_strided_slice %94 {offsets = [0, 0], sizes = [8, 128], strides = [1, 1]} : vector<8x512xf32> to vector<8x128xf32>
    %96 = arith.negf %95 : vector<8x128xf32>
    %97 = math.exp %96 : vector<8x128xf32>
    %cst_34 = arith.constant 1.000000e+00 : f32
    %98 = vector.broadcast %cst_34 : f32 to vector<8x128xf32>
    %99 = arith.addf %98, %97 : vector<8x128xf32>
    %100 = arith.divf %98, %99 : vector<8x128xf32>
    %101 = vector.extract_strided_slice %94 {offsets = [0, 128], sizes = [8, 128], strides = [1, 1]} : vector<8x512xf32> to vector<8x128xf32>
    %102 = arith.negf %101 : vector<8x128xf32>
    %103 = math.exp %102 : vector<8x128xf32>
    %cst_35 = arith.constant 1.000000e+00 : f32
    %104 = vector.broadcast %cst_35 : f32 to vector<8x128xf32>
    %105 = arith.addf %104, %103 : vector<8x128xf32>
    %106 = arith.divf %104, %105 : vector<8x128xf32>
    %107 = vector.extract_strided_slice %94 {offsets = [0, 256], sizes = [8, 128], strides = [1, 1]} : vector<8x512xf32> to vector<8x128xf32>
    %108 = math.tanh %107 : vector<8x128xf32>
    %109 = vector.extract_strided_slice %94 {offsets = [0, 384], sizes = [8, 128], strides = [1, 1]} : vector<8x512xf32> to vector<8x128xf32>
    %110 = arith.negf %109 : vector<8x128xf32>
    %111 = math.exp %110 : vector<8x128xf32>
    %cst_36 = arith.constant 1.000000e+00 : f32
    %112 = vector.broadcast %cst_36 : f32 to vector<8x128xf32>
    %113 = arith.addf %112, %111 : vector<8x128xf32>
    %114 = arith.divf %112, %113 : vector<8x128xf32>
    %115 = arith.mulf %106, %80 : vector<8x128xf32>
    %116 = arith.mulf %100, %108 : vector<8x128xf32>
    %117 = arith.addf %115, %116 : vector<8x128xf32>
    %118 = math.tanh %117 : vector<8x128xf32>
    %119 = arith.mulf %114, %118 : vector<8x128xf32>
    %120 = arith.truncf %119 : vector<8x128xf32> to vector<8x128xbf16>
    %121 = arith.index_cast %c2_i32 : i32 to index
    %c0_37 = arith.constant 0 : index
    %c0_38 = arith.constant 0 : index
    %122 = vector.load %arg6[%121, %c0_37, %c0_38] : memref<8x8x128xbf16, #tpu.memory_space<vmem>>, vector<1x8x128xbf16>
    %123 = vector.shape_cast %122 : vector<1x8x128xbf16> to vector<8x128xbf16>
    %124 = vector.shape_cast %120 : vector<8x128xbf16> to vector<1x8x128xbf16>
    tpu.vector_store %arg6[%121, %c0_37, %c0_38], %124 {strides = array<i32>} : memref<8x8x128xbf16, #tpu.memory_space<vmem>>, vector<1x8x128xbf16>,
    %c3_i32 = arith.constant 3 : i32
    %c8_i32_39 = arith.constant 8 : i32
    %125 = arith.muli %c3_i32, %c8_i32_39 : i32
    %126 = tpu.assume_multiple %125, 8 : i32
    %127 = arith.index_cast %126 : i32 to index
    %c0_40 = arith.constant 0 : index
    %128 = vector.load %arg9[%127, %c0_40] : memref<64x512xf32, #tpu.memory_space<vmem>>, vector<8x512xf32>
    %129 = arith.truncf %119 : vector<8x128xf32> to vector<8x128xbf16>
    %cst_41 = arith.constant dense<0.000000e+00> : vector<8x512xf32>
    %130 = tpu.matmul %129, %11, %cst_41 {dimension_numbers = #tpu.dot_dimension_numbers<[1], [0], [0], [1], [0, 0, 1, 1], [], []>} : vector<8x128xbf16>, vector<128x512xbf16>, vector<8x512xf32> -> vector<8x512xf32>
    %131 = arith.addf %128, %130 : vector<8x512xf32>
    %132 = vector.extract_strided_slice %131 {offsets = [0, 0], sizes = [8, 128], strides = [1, 1]} : vector<8x512xf32> to vector<8x128xf32>
    %133 = arith.negf %132 : vector<8x128xf32>
    %134 = math.exp %133 : vector<8x128xf32>
    %cst_42 = arith.constant 1.000000e+00 : f32
    %135 = vector.broadcast %cst_42 : f32 to vector<8x128xf32>
    %136 = arith.addf %135, %134 : vector<8x128xf32>
    %137 = arith.divf %135, %136 : vector<8x128xf32>
    %138 = vector.extract_strided_slice %131 {offsets = [0, 128], sizes = [8, 128], strides = [1, 1]} : vector<8x512xf32> to vector<8x128xf32>
    %139 = arith.negf %138 : vector<8x128xf32>
    %140 = math.exp %139 : vector<8x128xf32>
    %cst_43 = arith.constant 1.000000e+00 : f32
    %141 = vector.broadcast %cst_43 : f32 to vector<8x128xf32>
    %142 = arith.addf %141, %140 : vector<8x128xf32>
    %143 = arith.divf %141, %142 : vector<8x128xf32>
    %144 = vector.extract_strided_slice %131 {offsets = [0, 256], sizes = [8, 128], strides = [1, 1]} : vector<8x512xf32> to vector<8x128xf32>
    %145 = math.tanh %144 : vector<8x128xf32>
    %146 = vector.extract_strided_slice %131 {offsets = [0, 384], sizes = [8, 128], strides = [1, 1]} : vector<8x512xf32> to vector<8x128xf32>
    %147 = arith.negf %146 : vector<8x128xf32>
    %148 = math.exp %147 : vector<8x128xf32>
    %cst_44 = arith.constant 1.000000e+00 : f32
    %149 = vector.broadcast %cst_44 : f32 to vector<8x128xf32>
    %150 = arith.addf %149, %148 : vector<8x128xf32>
    %151 = arith.divf %149, %150 : vector<8x128xf32>
    %152 = arith.mulf %143, %117 : vector<8x128xf32>
    %153 = arith.mulf %137, %145 : vector<8x128xf32>
    %154 = arith.addf %152, %153 : vector<8x128xf32>
    %155 = math.tanh %154 : vector<8x128xf32>
    %156 = arith.mulf %151, %155 : vector<8x128xf32>
    %157 = arith.truncf %156 : vector<8x128xf32> to vector<8x128xbf16>
    %158 = arith.index_cast %c3_i32 : i32 to index
    %c0_45 = arith.constant 0 : index
    %c0_46 = arith.constant 0 : index
    %159 = vector.load %arg6[%158, %c0_45, %c0_46] : memref<8x8x128xbf16, #tpu.memory_space<vmem>>, vector<1x8x128xbf16>
    %160 = vector.shape_cast %159 : vector<1x8x128xbf16> to vector<8x128xbf16>
    %161 = vector.shape_cast %157 : vector<8x128xbf16> to vector<1x8x128xbf16>
    tpu.vector_store %arg6[%158, %c0_45, %c0_46], %161 {strides = array<i32>} : memref<8x8x128xbf16, #tpu.memory_space<vmem>>, vector<1x8x128xbf16>,
    %c4_i32 = arith.constant 4 : i32
    %c8_i32_47 = arith.constant 8 : i32
    %162 = arith.muli %c4_i32, %c8_i32_47 : i32
    %163 = tpu.assume_multiple %162, 8 : i32
    %164 = arith.index_cast %163 : i32 to index
    %c0_48 = arith.constant 0 : index
    %165 = vector.load %arg9[%164, %c0_48] : memref<64x512xf32, #tpu.memory_space<vmem>>, vector<8x512xf32>
    %166 = arith.truncf %156 : vector<8x128xf32> to vector<8x128xbf16>
    %cst_49 = arith.constant dense<0.000000e+00> : vector<8x512xf32>
    %167 = tpu.matmul %166, %11, %cst_49 {dimension_numbers = #tpu.dot_dimension_numbers<[1], [0], [0], [1], [0, 0, 1, 1], [], []>} : vector<8x128xbf16>, vector<128x512xbf16>, vector<8x512xf32> -> vector<8x512xf32>
    %168 = arith.addf %165, %167 : vector<8x512xf32>
    %169 = vector.extract_strided_slice %168 {offsets = [0, 0], sizes = [8, 128], strides = [1, 1]} : vector<8x512xf32> to vector<8x128xf32>
    %170 = arith.negf %169 : vector<8x128xf32>
    %171 = math.exp %170 : vector<8x128xf32>
    %cst_50 = arith.constant 1.000000e+00 : f32
    %172 = vector.broadcast %cst_50 : f32 to vector<8x128xf32>
    %173 = arith.addf %172, %171 : vector<8x128xf32>
    %174 = arith.divf %172, %173 : vector<8x128xf32>
    %175 = vector.extract_strided_slice %168 {offsets = [0, 128], sizes = [8, 128], strides = [1, 1]} : vector<8x512xf32> to vector<8x128xf32>
    %176 = arith.negf %175 : vector<8x128xf32>
    %177 = math.exp %176 : vector<8x128xf32>
    %cst_51 = arith.constant 1.000000e+00 : f32
    %178 = vector.broadcast %cst_51 : f32 to vector<8x128xf32>
    %179 = arith.addf %178, %177 : vector<8x128xf32>
    %180 = arith.divf %178, %179 : vector<8x128xf32>
    %181 = vector.extract_strided_slice %168 {offsets = [0, 256], sizes = [8, 128], strides = [1, 1]} : vector<8x512xf32> to vector<8x128xf32>
    %182 = math.tanh %181 : vector<8x128xf32>
    %183 = vector.extract_strided_slice %168 {offsets = [0, 384], sizes = [8, 128], strides = [1, 1]} : vector<8x512xf32> to vector<8x128xf32>
    %184 = arith.negf %183 : vector<8x128xf32>
    %185 = math.exp %184 : vector<8x128xf32>
    %cst_52 = arith.constant 1.000000e+00 : f32
    %186 = vector.broadcast %cst_52 : f32 to vector<8x128xf32>
    %187 = arith.addf %186, %185 : vector<8x128xf32>
    %188 = arith.divf %186, %187 : vector<8x128xf32>
    %189 = arith.mulf %180, %154 : vector<8x128xf32>
    %190 = arith.mulf %174, %182 : vector<8x128xf32>
    %191 = arith.addf %189, %190 : vector<8x128xf32>
    %192 = math.tanh %191 : vector<8x128xf32>
    %193 = arith.mulf %188, %192 : vector<8x128xf32>
    %194 = arith.truncf %193 : vector<8x128xf32> to vector<8x128xbf16>
    %195 = arith.index_cast %c4_i32 : i32 to index
    %c0_53 = arith.constant 0 : index
    %c0_54 = arith.constant 0 : index
    %196 = vector.load %arg6[%195, %c0_53, %c0_54] : memref<8x8x128xbf16, #tpu.memory_space<vmem>>, vector<1x8x128xbf16>
    %197 = vector.shape_cast %196 : vector<1x8x128xbf16> to vector<8x128xbf16>
    %198 = vector.shape_cast %194 : vector<8x128xbf16> to vector<1x8x128xbf16>
    tpu.vector_store %arg6[%195, %c0_53, %c0_54], %198 {strides = array<i32>} : memref<8x8x128xbf16, #tpu.memory_space<vmem>>, vector<1x8x128xbf16>,
    %c5_i32 = arith.constant 5 : i32
    %c8_i32_55 = arith.constant 8 : i32
    %199 = arith.muli %c5_i32, %c8_i32_55 : i32
    %200 = tpu.assume_multiple %199, 8 : i32
    %201 = arith.index_cast %200 : i32 to index
    %c0_56 = arith.constant 0 : index
    %202 = vector.load %arg9[%201, %c0_56] : memref<64x512xf32, #tpu.memory_space<vmem>>, vector<8x512xf32>
    %203 = arith.truncf %193 : vector<8x128xf32> to vector<8x128xbf16>
    %cst_57 = arith.constant dense<0.000000e+00> : vector<8x512xf32>
    %204 = tpu.matmul %203, %11, %cst_57 {dimension_numbers = #tpu.dot_dimension_numbers<[1], [0], [0], [1], [0, 0, 1, 1], [], []>} : vector<8x128xbf16>, vector<128x512xbf16>, vector<8x512xf32> -> vector<8x512xf32>
    %205 = arith.addf %202, %204 : vector<8x512xf32>
    %206 = vector.extract_strided_slice %205 {offsets = [0, 0], sizes = [8, 128], strides = [1, 1]} : vector<8x512xf32> to vector<8x128xf32>
    %207 = arith.negf %206 : vector<8x128xf32>
    %208 = math.exp %207 : vector<8x128xf32>
    %cst_58 = arith.constant 1.000000e+00 : f32
    %209 = vector.broadcast %cst_58 : f32 to vector<8x128xf32>
    %210 = arith.addf %209, %208 : vector<8x128xf32>
    %211 = arith.divf %209, %210 : vector<8x128xf32>
    %212 = vector.extract_strided_slice %205 {offsets = [0, 128], sizes = [8, 128], strides = [1, 1]} : vector<8x512xf32> to vector<8x128xf32>
    %213 = arith.negf %212 : vector<8x128xf32>
    %214 = math.exp %213 : vector<8x128xf32>
    %cst_59 = arith.constant 1.000000e+00 : f32
    %215 = vector.broadcast %cst_59 : f32 to vector<8x128xf32>
    %216 = arith.addf %215, %214 : vector<8x128xf32>
    %217 = arith.divf %215, %216 : vector<8x128xf32>
    %218 = vector.extract_strided_slice %205 {offsets = [0, 256], sizes = [8, 128], strides = [1, 1]} : vector<8x512xf32> to vector<8x128xf32>
    %219 = math.tanh %218 : vector<8x128xf32>
    %220 = vector.extract_strided_slice %205 {offsets = [0, 384], sizes = [8, 128], strides = [1, 1]} : vector<8x512xf32> to vector<8x128xf32>
    %221 = arith.negf %220 : vector<8x128xf32>
    %222 = math.exp %221 : vector<8x128xf32>
    %cst_60 = arith.constant 1.000000e+00 : f32
    %223 = vector.broadcast %cst_60 : f32 to vector<8x128xf32>
    %224 = arith.addf %223, %222 : vector<8x128xf32>
    %225 = arith.divf %223, %224 : vector<8x128xf32>
    %226 = arith.mulf %217, %191 : vector<8x128xf32>
    %227 = arith.mulf %211, %219 : vector<8x128xf32>
    %228 = arith.addf %226, %227 : vector<8x128xf32>
    %229 = math.tanh %228 : vector<8x128xf32>
    %230 = arith.mulf %225, %229 : vector<8x128xf32>
    %231 = arith.truncf %230 : vector<8x128xf32> to vector<8x128xbf16>
    %232 = arith.index_cast %c5_i32 : i32 to index
    %c0_61 = arith.constant 0 : index
    %c0_62 = arith.constant 0 : index
    %233 = vector.load %arg6[%232, %c0_61, %c0_62] : memref<8x8x128xbf16, #tpu.memory_space<vmem>>, vector<1x8x128xbf16>
    %234 = vector.shape_cast %233 : vector<1x8x128xbf16> to vector<8x128xbf16>
    %235 = vector.shape_cast %231 : vector<8x128xbf16> to vector<1x8x128xbf16>
    tpu.vector_store %arg6[%232, %c0_61, %c0_62], %235 {strides = array<i32>} : memref<8x8x128xbf16, #tpu.memory_space<vmem>>, vector<1x8x128xbf16>,
    %c6_i32 = arith.constant 6 : i32
    %c8_i32_63 = arith.constant 8 : i32
    %236 = arith.muli %c6_i32, %c8_i32_63 : i32
    %237 = tpu.assume_multiple %236, 8 : i32
    %238 = arith.index_cast %237 : i32 to index
    %c0_64 = arith.constant 0 : index
    %239 = vector.load %arg9[%238, %c0_64] : memref<64x512xf32, #tpu.memory_space<vmem>>, vector<8x512xf32>
    %240 = arith.truncf %230 : vector<8x128xf32> to vector<8x128xbf16>
    %cst_65 = arith.constant dense<0.000000e+00> : vector<8x512xf32>
    %241 = tpu.matmul %240, %11, %cst_65 {dimension_numbers = #tpu.dot_dimension_numbers<[1], [0], [0], [1], [0, 0, 1, 1], [], []>} : vector<8x128xbf16>, vector<128x512xbf16>, vector<8x512xf32> -> vector<8x512xf32>
    %242 = arith.addf %239, %241 : vector<8x512xf32>
    %243 = vector.extract_strided_slice %242 {offsets = [0, 0], sizes = [8, 128], strides = [1, 1]} : vector<8x512xf32> to vector<8x128xf32>
    %244 = arith.negf %243 : vector<8x128xf32>
    %245 = math.exp %244 : vector<8x128xf32>
    %cst_66 = arith.constant 1.000000e+00 : f32
    %246 = vector.broadcast %cst_66 : f32 to vector<8x128xf32>
    %247 = arith.addf %246, %245 : vector<8x128xf32>
    %248 = arith.divf %246, %247 : vector<8x128xf32>
    %249 = vector.extract_strided_slice %242 {offsets = [0, 128], sizes = [8, 128], strides = [1, 1]} : vector<8x512xf32> to vector<8x128xf32>
    %250 = arith.negf %249 : vector<8x128xf32>
    %251 = math.exp %250 : vector<8x128xf32>
    %cst_67 = arith.constant 1.000000e+00 : f32
    %252 = vector.broadcast %cst_67 : f32 to vector<8x128xf32>
    %253 = arith.addf %252, %251 : vector<8x128xf32>
    %254 = arith.divf %252, %253 : vector<8x128xf32>
    %255 = vector.extract_strided_slice %242 {offsets = [0, 256], sizes = [8, 128], strides = [1, 1]} : vector<8x512xf32> to vector<8x128xf32>
    %256 = math.tanh %255 : vector<8x128xf32>
    %257 = vector.extract_strided_slice %242 {offsets = [0, 384], sizes = [8, 128], strides = [1, 1]} : vector<8x512xf32> to vector<8x128xf32>
    %258 = arith.negf %257 : vector<8x128xf32>
    %259 = math.exp %258 : vector<8x128xf32>
    %cst_68 = arith.constant 1.000000e+00 : f32
    %260 = vector.broadcast %cst_68 : f32 to vector<8x128xf32>
    %261 = arith.addf %260, %259 : vector<8x128xf32>
    %262 = arith.divf %260, %261 : vector<8x128xf32>
    %263 = arith.mulf %254, %228 : vector<8x128xf32>
    %264 = arith.mulf %248, %256 : vector<8x128xf32>
    %265 = arith.addf %263, %264 : vector<8x128xf32>
    %266 = math.tanh %265 : vector<8x128xf32>
    %267 = arith.mulf %262, %266 : vector<8x128xf32>
    %268 = arith.truncf %267 : vector<8x128xf32> to vector<8x128xbf16>
    %269 = arith.index_cast %c6_i32 : i32 to index
    %c0_69 = arith.constant 0 : index
    %c0_70 = arith.constant 0 : index
    %270 = vector.load %arg6[%269, %c0_69, %c0_70] : memref<8x8x128xbf16, #tpu.memory_space<vmem>>, vector<1x8x128xbf16>
    %271 = vector.shape_cast %270 : vector<1x8x128xbf16> to vector<8x128xbf16>
    %272 = vector.shape_cast %268 : vector<8x128xbf16> to vector<1x8x128xbf16>
    tpu.vector_store %arg6[%269, %c0_69, %c0_70], %272 {strides = array<i32>} : memref<8x8x128xbf16, #tpu.memory_space<vmem>>, vector<1x8x128xbf16>,
    %c7_i32 = arith.constant 7 : i32
    %c8_i32_71 = arith.constant 8 : i32
    %273 = arith.muli %c7_i32, %c8_i32_71 : i32
    %274 = tpu.assume_multiple %273, 8 : i32
    %275 = arith.index_cast %274 : i32 to index
    %c0_72 = arith.constant 0 : index
    %276 = vector.load %arg9[%275, %c0_72] : memref<64x512xf32, #tpu.memory_space<vmem>>, vector<8x512xf32>
    %277 = arith.truncf %267 : vector<8x128xf32> to vector<8x128xbf16>
    %cst_73 = arith.constant dense<0.000000e+00> : vector<8x512xf32>
    %278 = tpu.matmul %277, %11, %cst_73 {dimension_numbers = #tpu.dot_dimension_numbers<[1], [0], [0], [1], [0, 0, 1, 1], [], []>} : vector<8x128xbf16>, vector<128x512xbf16>, vector<8x512xf32> -> vector<8x512xf32>
    %279 = arith.addf %276, %278 : vector<8x512xf32>
    %280 = vector.extract_strided_slice %279 {offsets = [0, 0], sizes = [8, 128], strides = [1, 1]} : vector<8x512xf32> to vector<8x128xf32>
    %281 = arith.negf %280 : vector<8x128xf32>
    %282 = math.exp %281 : vector<8x128xf32>
    %cst_74 = arith.constant 1.000000e+00 : f32
    %283 = vector.broadcast %cst_74 : f32 to vector<8x128xf32>
    %284 = arith.addf %283, %282 : vector<8x128xf32>
    %285 = arith.divf %283, %284 : vector<8x128xf32>
    %286 = vector.extract_strided_slice %279 {offsets = [0, 128], sizes = [8, 128], strides = [1, 1]} : vector<8x512xf32> to vector<8x128xf32>
    %287 = arith.negf %286 : vector<8x128xf32>
    %288 = math.exp %287 : vector<8x128xf32>
    %cst_75 = arith.constant 1.000000e+00 : f32
    %289 = vector.broadcast %cst_75 : f32 to vector<8x128xf32>
    %290 = arith.addf %289, %288 : vector<8x128xf32>
    %291 = arith.divf %289, %290 : vector<8x128xf32>
    %292 = vector.extract_strided_slice %279 {offsets = [0, 256], sizes = [8, 128], strides = [1, 1]} : vector<8x512xf32> to vector<8x128xf32>
    %293 = math.tanh %292 : vector<8x128xf32>
    %294 = vector.extract_strided_slice %279 {offsets = [0, 384], sizes = [8, 128], strides = [1, 1]} : vector<8x512xf32> to vector<8x128xf32>
    %295 = arith.negf %294 : vector<8x128xf32>
    %296 = math.exp %295 : vector<8x128xf32>
    %cst_76 = arith.constant 1.000000e+00 : f32
    %297 = vector.broadcast %cst_76 : f32 to vector<8x128xf32>
    %298 = arith.addf %297, %296 : vector<8x128xf32>
    %299 = arith.divf %297, %298 : vector<8x128xf32>
    %300 = arith.mulf %291, %265 : vector<8x128xf32>
    %301 = arith.mulf %285, %293 : vector<8x128xf32>
    %302 = arith.addf %300, %301 : vector<8x128xf32>
    %303 = math.tanh %302 : vector<8x128xf32>
    %304 = arith.mulf %299, %303 : vector<8x128xf32>
    %305 = arith.truncf %304 : vector<8x128xf32> to vector<8x128xbf16>
    %306 = arith.index_cast %c7_i32 : i32 to index
    %c0_77 = arith.constant 0 : index
    %c0_78 = arith.constant 0 : index
    %307 = vector.load %arg6[%306, %c0_77, %c0_78] : memref<8x8x128xbf16, #tpu.memory_space<vmem>>, vector<1x8x128xbf16>
    %308 = vector.shape_cast %307 : vector<1x8x128xbf16> to vector<8x128xbf16>
    %309 = vector.shape_cast %305 : vector<8x128xbf16> to vector<1x8x128xbf16>
    tpu.vector_store %arg6[%306, %c0_77, %c0_78], %309 {strides = array<i32>} : memref<8x8x128xbf16, #tpu.memory_space<vmem>>, vector<1x8x128xbf16>,
    %c8_i32_79 = arith.constant 8 : i32
    %c0_80 = arith.constant 0 : index
    %c0_81 = arith.constant 0 : index
    %310 = vector.load %arg7[%c0_80, %c0_81] : memref<8x128xf32, #tpu.memory_space<vmem>>, vector<8x128xf32>
    tpu.vector_store %arg7[%c0_80, %c0_81], %304 {strides = array<i32>} : memref<8x128xf32, #tpu.memory_space<vmem>>, vector<8x128xf32>,
    %c0_82 = arith.constant 0 : index
    %c0_83 = arith.constant 0 : index
    %311 = vector.load %arg8[%c0_82, %c0_83] : memref<8x128xf32, #tpu.memory_space<vmem>>, vector<8x128xf32>
    tpu.vector_store %arg8[%c0_82, %c0_83], %302 {strides = array<i32>} : memref<8x128xf32, #tpu.memory_space<vmem>>, vector<8x128xf32>,
    return
  }
  func.func @transform_0(%arg0: i32, %arg1: i32) -> (i32, i32, i32) {
    %c0_i32 = arith.constant 0 : i32
    %c0_i32_0 = arith.constant 0 : i32
    return %arg1, %arg0, %c0_i32 : i32, i32, i32
  }
  func.func @transform_1(%arg0: i32, %arg1: i32) -> (i32, i32) {
    %c0_i32 = arith.constant 0 : i32
    %c0_i32_0 = arith.constant 0 : i32
    %c0_i32_1 = arith.constant 0 : i32
    return %c0_i32, %c0_i32_0 : i32, i32
  }
  func.func @transform_2(%arg0: i32, %arg1: i32) -> (i32, i32) {
    %c0_i32 = arith.constant 0 : i32
    %c0_i32_0 = arith.constant 0 : i32
    %c0_i32_1 = arith.constant 0 : i32
    return %c0_i32, %c0_i32_0 : i32, i32
  }
  func.func @transform_3(%arg0: i32, %arg1: i32) -> (i32, i32) {
    %c0_i32 = arith.constant 0 : i32
    %c0_i32_0 = arith.constant 0 : i32
    %c0_i32_1 = arith.constant 0 : i32
    return %c0_i32, %c0_i32_0 : i32, i32
  }
  func.func @transform_4(%arg0: i32, %arg1: i32) -> (i32, i32, i32) {
    %c0_i32 = arith.constant 0 : i32
    %c0_i32_0 = arith.constant 0 : i32
    return %arg1, %arg0, %c0_i32 : i32, i32, i32
  }
  func.func @transform_5(%arg0: i32, %arg1: i32) -> (i32, i32) {
    %c0_i32 = arith.constant 0 : i32
    %c0_i32_0 = arith.constant 0 : i32
    return %arg0, %c0_i32 : i32, i32
  }
  func.func @transform_6(%arg0: i32, %arg1: i32) -> (i32, i32) {
    %c0_i32 = arith.constant 0 : i32
    %c0_i32_0 = arith.constant 0 : i32
    return %arg0, %c0_i32 : i32, i32
  }
}

module attributes {stable_mosaic.version = 11 : i64} {
  func.func @_lstm_layer_kernel(%arg0: i32, %arg1: i32, %arg2: memref<8x8x128xbf16, #tpu.memory_space<vmem>>, %arg3: memref<128x512xbf16, #tpu.memory_space<vmem>>, %arg4: memref<128x512xbf16, #tpu.memory_space<vmem>>, %arg5: memref<1x512xf32, #tpu.memory_space<vmem>>, %arg6: memref<8x8x128xbf16, #tpu.memory_space<vmem>>, %arg7: memref<8x128xf32, #tpu.memory_space<vmem>>, %arg8: memref<8x128xf32, #tpu.memory_space<vmem>>, %arg9: memref<64x512xf32, #tpu.memory_space<vmem>>) attributes {dimension_semantics = [#tpu.dimension_semantics<parallel>, #tpu.dimension_semantics<arbitrary>], iteration_bounds = array<i64: 1, 1>, scalar_prefetch = 0 : i64, scratch_operands = 1 : i64, tpu.core_type = #tpu.core_type<tc>, window_params = [{transform_indices = @transform_0, window_bounds = array<i64: 8, 8, 128>}, {pipeline_mode = #tpu.pipeline_mode<synchronous>, transform_indices = @transform_1, window_bounds = array<i64: 128, 512>}, {pipeline_mode = #tpu.pipeline_mode<synchronous>, transform_indices = @transform_2, window_bounds = array<i64: 128, 512>}, {pipeline_mode = #tpu.pipeline_mode<synchronous>, transform_indices = @transform_3, window_bounds = array<i64: 1, 512>}, {transform_indices = @transform_4, window_bounds = array<i64: 8, 8, 128>}, {transform_indices = @transform_5, window_bounds = array<i64: 8, 128>}, {transform_indices = @transform_6, window_bounds = array<i64: 8, 128>}]} {
    %c0_i32 = arith.constant 0 : i32
    %0 = arith.cmpi eq, %arg1, %c0_i32 : i32
    %1 = arith.extui %0 : i1 to i32
    %c0_i32_0 = arith.constant 0 : i32
    %2 = arith.cmpi ne, %1, %c0_i32_0 : i32
    scf.if %2 {
      %cst_84 = arith.constant 0.000000e+00 : f32
      %312 = vector.broadcast %cst_84 : f32 to vector<8x128xf32>
      %c0_85 = arith.constant 0 : index
      %c0_86 = arith.constant 0 : index
      %313 = vector.load %arg7[%c0_85, %c0_86] : memref<8x128xf32, #tpu.memory_space<vmem>>, vector<8x128xf32>
      tpu.vector_store %arg7[%c0_85, %c0_86], %312 {strides = array<i32>} : memref<8x128xf32, #tpu.memory_space<vmem>>, vector<8x128xf32>,
      %cst_87 = arith.constant 0.000000e+00 : f32
      %314 = vector.broadcast %cst_87 : f32 to vector<8x128xf32>
      %c0_88 = arith.constant 0 : index
      %c0_89 = arith.constant 0 : index
      %315 = vector.load %arg8[%c0_88, %c0_89] : memref<8x128xf32, #tpu.memory_space<vmem>>, vector<8x128xf32>
      tpu.vector_store %arg8[%c0_88, %c0_89], %314 {strides = array<i32>} : memref<8x128xf32, #tpu.memory_space<vmem>>, vector<8x128xf32>,
    } else {
    }
    %c0 = arith.constant 0 : index
    %c0_1 = arith.constant 0 : index
    %c0_2 = arith.constant 0 : index
    %3 = vector.load %arg2[%c0, %c0_1, %c0_2] : memref<8x8x128xbf16, #tpu.memory_space<vmem>>, vector<8x8x128xbf16>
    %4 = vector.shape_cast %3 : vector<8x8x128xbf16> to vector<64x128xbf16>
    %c0_3 = arith.constant 0 : index
    %c0_4 = arith.constant 0 : index
    %5 = vector.load %arg3[%c0_3, %c0_4] : memref<128x512xbf16, #tpu.memory_space<vmem>>, vector<128x512xbf16>
    %cst = arith.constant dense<0.000000e+00> : vector<64x512xf32>
    %6 = tpu.matmul %4, %5, %cst {dimension_numbers = #tpu.dot_dimension_numbers<[1], [0], [0], [1], [0, 0, 1, 1], [], []>} : vector<64x128xbf16>, vector<128x512xbf16>, vector<64x512xf32> -> vector<64x512xf32>
    %c0_5 = arith.constant 0 : index
    %c0_6 = arith.constant 0 : index
    %7 = vector.load %arg5[%c0_5, %c0_6] : memref<1x512xf32, #tpu.memory_space<vmem>>, vector<1x512xf32>
    %8 = vector.broadcast %7 : vector<1x512xf32> to vector<64x512xf32>
    %9 = arith.addf %6, %8 : vector<64x512xf32>
    %c0_7 = arith.constant 0 : index
    %c0_8 = arith.constant 0 : index
    %10 = vector.load %arg9[%c0_7, %c0_8] : memref<64x512xf32, #tpu.memory_space<vmem>>, vector<64x512xf32>
    tpu.vector_store %arg9[%c0_7, %c0_8], %9 {strides = array<i32>} : memref<64x512xf32, #tpu.memory_space<vmem>>, vector<64x512xf32>,
    %c0_9 = arith.constant 0 : index
    %c0_10 = arith.constant 0 : index
    %11 = vector.load %arg4[%c0_9, %c0_10] : memref<128x512xbf16, #tpu.memory_space<vmem>>, vector<128x512xbf16>
    %c0_11 = arith.constant 0 : index
    %c0_12 = arith.constant 0 : index
    %12 = vector.load %arg7[%c0_11, %c0_12] : memref<8x128xf32, #tpu.memory_space<vmem>>, vector<8x128xf32>
    %c0_13 = arith.constant 0 : index
    %c0_14 = arith.constant 0 : index
    %13 = vector.load %arg8[%c0_13, %c0_14] : memref<8x128xf32, #tpu.memory_space<vmem>>, vector<8x128xf32>
    %c0_i32_15 = arith.constant 0 : i32
    %c8_i32 = arith.constant 8 : i32
    %14 = arith.muli %c0_i32_15, %c8_i32 : i32
    %15 = tpu.assume_multiple %14, 8 : i32
    %16 = arith.index_cast %15 : i32 to index
    %c0_16 = arith.constant 0 : index
    %17 = vector.load %arg9[%16, %c0_16] : memref<64x512xf32, #tpu.memory_space<vmem>>, vector<8x512xf32>
    %18 = arith.truncf %12 : vector<8x128xf32> to vector<8x128xbf16>
    %cst_17 = arith.constant dense<0.000000e+00> : vector<8x512xf32>
    %19 = tpu.matmul %18, %11, %cst_17 {dimension_numbers = #tpu.dot_dimension_numbers<[1], [0], [0], [1], [0, 0, 1, 1], [], []>} : vector<8x128xbf16>, vector<128x512xbf16>, vector<8x512xf32> -> vector<8x512xf32>
    %20 = arith.addf %17, %19 : vector<8x512xf32>
    %21 = vector.extract_strided_slice %20 {offsets = [0, 0], sizes = [8, 128], strides = [1, 1]} : vector<8x512xf32> to vector<8x128xf32>
    %22 = arith.negf %21 : vector<8x128xf32>
    %23 = math.exp %22 : vector<8x128xf32>
    %cst_18 = arith.constant 1.000000e+00 : f32
    %24 = vector.broadcast %cst_18 : f32 to vector<8x128xf32>
    %25 = arith.addf %24, %23 : vector<8x128xf32>
    %26 = arith.divf %24, %25 : vector<8x128xf32>
    %27 = vector.extract_strided_slice %20 {offsets = [0, 128], sizes = [8, 128], strides = [1, 1]} : vector<8x512xf32> to vector<8x128xf32>
    %28 = arith.negf %27 : vector<8x128xf32>
    %29 = math.exp %28 : vector<8x128xf32>
    %cst_19 = arith.constant 1.000000e+00 : f32
    %30 = vector.broadcast %cst_19 : f32 to vector<8x128xf32>
    %31 = arith.addf %30, %29 : vector<8x128xf32>
    %32 = arith.divf %30, %31 : vector<8x128xf32>
    %33 = vector.extract_strided_slice %20 {offsets = [0, 256], sizes = [8, 128], strides = [1, 1]} : vector<8x512xf32> to vector<8x128xf32>
    %34 = math.tanh %33 : vector<8x128xf32>
    %35 = vector.extract_strided_slice %20 {offsets = [0, 384], sizes = [8, 128], strides = [1, 1]} : vector<8x512xf32> to vector<8x128xf32>
    %36 = arith.negf %35 : vector<8x128xf32>
    %37 = math.exp %36 : vector<8x128xf32>
    %cst_20 = arith.constant 1.000000e+00 : f32
    %38 = vector.broadcast %cst_20 : f32 to vector<8x128xf32>
    %39 = arith.addf %38, %37 : vector<8x128xf32>
    %40 = arith.divf %38, %39 : vector<8x128xf32>
    %41 = arith.mulf %32, %13 : vector<8x128xf32>
    %42 = arith.mulf %26, %34 : vector<8x128xf32>
    %43 = arith.addf %41, %42 : vector<8x128xf32>
    %44 = math.tanh %43 : vector<8x128xf32>
    %45 = arith.mulf %40, %44 : vector<8x128xf32>
    %46 = arith.truncf %45 : vector<8x128xf32> to vector<8x128xbf16>
    %47 = arith.index_cast %c0_i32_15 : i32 to index
    %c0_21 = arith.constant 0 : index
    %c0_22 = arith.constant 0 : index
    %48 = vector.load %arg6[%47, %c0_21, %c0_22] : memref<8x8x128xbf16, #tpu.memory_space<vmem>>, vector<1x8x128xbf16>
    %49 = vector.shape_cast %48 : vector<1x8x128xbf16> to vector<8x128xbf16>
    %50 = vector.shape_cast %46 : vector<8x128xbf16> to vector<1x8x128xbf16>
    tpu.vector_store %arg6[%47, %c0_21, %c0_22], %50 {strides = array<i32>} : memref<8x8x128xbf16, #tpu.memory_space<vmem>>, vector<1x8x128xbf16>,
    %c1_i32 = arith.constant 1 : i32
    %c8_i32_23 = arith.constant 8 : i32
    %51 = arith.muli %c1_i32, %c8_i32_23 : i32
    %52 = tpu.assume_multiple %51, 8 : i32
    %53 = arith.index_cast %52 : i32 to index
    %c0_24 = arith.constant 0 : index
    %54 = vector.load %arg9[%53, %c0_24] : memref<64x512xf32, #tpu.memory_space<vmem>>, vector<8x512xf32>
    %55 = arith.truncf %45 : vector<8x128xf32> to vector<8x128xbf16>
    %cst_25 = arith.constant dense<0.000000e+00> : vector<8x512xf32>
    %56 = tpu.matmul %55, %11, %cst_25 {dimension_numbers = #tpu.dot_dimension_numbers<[1], [0], [0], [1], [0, 0, 1, 1], [], []>} : vector<8x128xbf16>, vector<128x512xbf16>, vector<8x512xf32> -> vector<8x512xf32>
    %57 = arith.addf %54, %56 : vector<8x512xf32>
    %58 = vector.extract_strided_slice %57 {offsets = [0, 0], sizes = [8, 128], strides = [1, 1]} : vector<8x512xf32> to vector<8x128xf32>
    %59 = arith.negf %58 : vector<8x128xf32>
    %60 = math.exp %59 : vector<8x128xf32>
    %cst_26 = arith.constant 1.000000e+00 : f32
    %61 = vector.broadcast %cst_26 : f32 to vector<8x128xf32>
    %62 = arith.addf %61, %60 : vector<8x128xf32>
    %63 = arith.divf %61, %62 : vector<8x128xf32>
    %64 = vector.extract_strided_slice %57 {offsets = [0, 128], sizes = [8, 128], strides = [1, 1]} : vector<8x512xf32> to vector<8x128xf32>
    %65 = arith.negf %64 : vector<8x128xf32>
    %66 = math.exp %65 : vector<8x128xf32>
    %cst_27 = arith.constant 1.000000e+00 : f32
    %67 = vector.broadcast %cst_27 : f32 to vector<8x128xf32>
    %68 = arith.addf %67, %66 : vector<8x128xf32>
    %69 = arith.divf %67, %68 : vector<8x128xf32>
    %70 = vector.extract_strided_slice %57 {offsets = [0, 256], sizes = [8, 128], strides = [1, 1]} : vector<8x512xf32> to vector<8x128xf32>
    %71 = math.tanh %70 : vector<8x128xf32>
    %72 = vector.extract_strided_slice %57 {offsets = [0, 384], sizes = [8, 128], strides = [1, 1]} : vector<8x512xf32> to vector<8x128xf32>
    %73 = arith.negf %72 : vector<8x128xf32>
    %74 = math.exp %73 : vector<8x128xf32>
    %cst_28 = arith.constant 1.000000e+00 : f32
    %75 = vector.broadcast %cst_28 : f32 to vector<8x128xf32>
    %76 = arith.addf %75, %74 : vector<8x128xf32>
    %77 = arith.divf %75, %76 : vector<8x128xf32>
    %78 = arith.mulf %69, %43 : vector<8x128xf32>
    %79 = arith.mulf %63, %71 : vector<8x128xf32>
    %80 = arith.addf %78, %79 : vector<8x128xf32>
    %81 = math.tanh %80 : vector<8x128xf32>
    %82 = arith.mulf %77, %81 : vector<8x128xf32>
    %83 = arith.truncf %82 : vector<8x128xf32> to vector<8x128xbf16>
    %84 = arith.index_cast %c1_i32 : i32 to index
    %c0_29 = arith.constant 0 : index
    %c0_30 = arith.constant 0 : index
    %85 = vector.load %arg6[%84, %c0_29, %c0_30] : memref<8x8x128xbf16, #tpu.memory_space<vmem>>, vector<1x8x128xbf16>
    %86 = vector.shape_cast %85 : vector<1x8x128xbf16> to vector<8x128xbf16>
    %87 = vector.shape_cast %83 : vector<8x128xbf16> to vector<1x8x128xbf16>
    tpu.vector_store %arg6[%84, %c0_29, %c0_30], %87 {strides = array<i32>} : memref<8x8x128xbf16, #tpu.memory_space<vmem>>, vector<1x8x128xbf16>,
    %c2_i32 = arith.constant 2 : i32
    %c8_i32_31 = arith.constant 8 : i32
    %88 = arith.muli %c2_i32, %c8_i32_31 : i32
    %89 = tpu.assume_multiple %88, 8 : i32
    %90 = arith.index_cast %89 : i32 to index
    %c0_32 = arith.constant 0 : index
    %91 = vector.load %arg9[%90, %c0_32] : memref<64x512xf32, #tpu.memory_space<vmem>>, vector<8x512xf32>
    %92 = arith.truncf %82 : vector<8x128xf32> to vector<8x128xbf16>
    %cst_33 = arith.constant dense<0.000000e+00> : vector<8x512xf32>
    %93 = tpu.matmul %92, %11, %cst_33 {dimension_numbers = #tpu.dot_dimension_numbers<[1], [0], [0], [1], [0, 0, 1, 1], [], []>} : vector<8x128xbf16>, vector<128x512xbf16>, vector<8x512xf32> -> vector<8x512xf32>
    %94 = arith.addf %91, %93 : vector<8x512xf32>
    %95 = vector.extract_strided_slice %94 {offsets = [0, 0], sizes = [8, 128], strides = [1, 1]} : vector<8x512xf32> to vector<8x128xf32>
    %96 = arith.negf %95 : vector<8x128xf32>
    %97 = math.exp %96 : vector<8x128xf32>
    %cst_34 = arith.constant 1.000000e+00 : f32
    %98 = vector.broadcast %cst_34 : f32 to vector<8x128xf32>
    %99 = arith.addf %98, %97 : vector<8x128xf32>
    %100 = arith.divf %98, %99 : vector<8x128xf32>
    %101 = vector.extract_strided_slice %94 {offsets = [0, 128], sizes = [8, 128], strides = [1, 1]} : vector<8x512xf32> to vector<8x128xf32>
    %102 = arith.negf %101 : vector<8x128xf32>
    %103 = math.exp %102 : vector<8x128xf32>
    %cst_35 = arith.constant 1.000000e+00 : f32
    %104 = vector.broadcast %cst_35 : f32 to vector<8x128xf32>
    %105 = arith.addf %104, %103 : vector<8x128xf32>
    %106 = arith.divf %104, %105 : vector<8x128xf32>
    %107 = vector.extract_strided_slice %94 {offsets = [0, 256], sizes = [8, 128], strides = [1, 1]} : vector<8x512xf32> to vector<8x128xf32>
    %108 = math.tanh %107 : vector<8x128xf32>
    %109 = vector.extract_strided_slice %94 {offsets = [0, 384], sizes = [8, 128], strides = [1, 1]} : vector<8x512xf32> to vector<8x128xf32>
    %110 = arith.negf %109 : vector<8x128xf32>
    %111 = math.exp %110 : vector<8x128xf32>
    %cst_36 = arith.constant 1.000000e+00 : f32
    %112 = vector.broadcast %cst_36 : f32 to vector<8x128xf32>
    %113 = arith.addf %112, %111 : vector<8x128xf32>
    %114 = arith.divf %112, %113 : vector<8x128xf32>
    %115 = arith.mulf %106, %80 : vector<8x128xf32>
    %116 = arith.mulf %100, %108 : vector<8x128xf32>
    %117 = arith.addf %115, %116 : vector<8x128xf32>
    %118 = math.tanh %117 : vector<8x128xf32>
    %119 = arith.mulf %114, %118 : vector<8x128xf32>
    %120 = arith.truncf %119 : vector<8x128xf32> to vector<8x128xbf16>
    %121 = arith.index_cast %c2_i32 : i32 to index
    %c0_37 = arith.constant 0 : index
    %c0_38 = arith.constant 0 : index
    %122 = vector.load %arg6[%121, %c0_37, %c0_38] : memref<8x8x128xbf16, #tpu.memory_space<vmem>>, vector<1x8x128xbf16>
    %123 = vector.shape_cast %122 : vector<1x8x128xbf16> to vector<8x128xbf16>
    %124 = vector.shape_cast %120 : vector<8x128xbf16> to vector<1x8x128xbf16>
    tpu.vector_store %arg6[%121, %c0_37, %c0_38], %124 {strides = array<i32>} : memref<8x8x128xbf16, #tpu.memory_space<vmem>>, vector<1x8x128xbf16>,
    %c3_i32 = arith.constant 3 : i32
    %c8_i32_39 = arith.constant 8 : i32
    %125 = arith.muli %c3_i32, %c8_i32_39 : i32
    %126 = tpu.assume_multiple %125, 8 : i32
    %127 = arith.index_cast %126 : i32 to index
    %c0_40 = arith.constant 0 : index
    %128 = vector.load %arg9[%127, %c0_40] : memref<64x512xf32, #tpu.memory_space<vmem>>, vector<8x512xf32>
    %129 = arith.truncf %119 : vector<8x128xf32> to vector<8x128xbf16>
    %cst_41 = arith.constant dense<0.000000e+00> : vector<8x512xf32>
    %130 = tpu.matmul %129, %11, %cst_41 {dimension_numbers = #tpu.dot_dimension_numbers<[1], [0], [0], [1], [0, 0, 1, 1], [], []>} : vector<8x128xbf16>, vector<128x512xbf16>, vector<8x512xf32> -> vector<8x512xf32>
    %131 = arith.addf %128, %130 : vector<8x512xf32>
    %132 = vector.extract_strided_slice %131 {offsets = [0, 0], sizes = [8, 128], strides = [1, 1]} : vector<8x512xf32> to vector<8x128xf32>
    %133 = arith.negf %132 : vector<8x128xf32>
    %134 = math.exp %133 : vector<8x128xf32>
    %cst_42 = arith.constant 1.000000e+00 : f32
    %135 = vector.broadcast %cst_42 : f32 to vector<8x128xf32>
    %136 = arith.addf %135, %134 : vector<8x128xf32>
    %137 = arith.divf %135, %136 : vector<8x128xf32>
    %138 = vector.extract_strided_slice %131 {offsets = [0, 128], sizes = [8, 128], strides = [1, 1]} : vector<8x512xf32> to vector<8x128xf32>
    %139 = arith.negf %138 : vector<8x128xf32>
    %140 = math.exp %139 : vector<8x128xf32>
    %cst_43 = arith.constant 1.000000e+00 : f32
    %141 = vector.broadcast %cst_43 : f32 to vector<8x128xf32>
    %142 = arith.addf %141, %140 : vector<8x128xf32>
    %143 = arith.divf %141, %142 : vector<8x128xf32>
    %144 = vector.extract_strided_slice %131 {offsets = [0, 256], sizes = [8, 128], strides = [1, 1]} : vector<8x512xf32> to vector<8x128xf32>
    %145 = math.tanh %144 : vector<8x128xf32>
    %146 = vector.extract_strided_slice %131 {offsets = [0, 384], sizes = [8, 128], strides = [1, 1]} : vector<8x512xf32> to vector<8x128xf32>
    %147 = arith.negf %146 : vector<8x128xf32>
    %148 = math.exp %147 : vector<8x128xf32>
    %cst_44 = arith.constant 1.000000e+00 : f32
    %149 = vector.broadcast %cst_44 : f32 to vector<8x128xf32>
    %150 = arith.addf %149, %148 : vector<8x128xf32>
    %151 = arith.divf %149, %150 : vector<8x128xf32>
    %152 = arith.mulf %143, %117 : vector<8x128xf32>
    %153 = arith.mulf %137, %145 : vector<8x128xf32>
    %154 = arith.addf %152, %153 : vector<8x128xf32>
    %155 = math.tanh %154 : vector<8x128xf32>
    %156 = arith.mulf %151, %155 : vector<8x128xf32>
    %157 = arith.truncf %156 : vector<8x128xf32> to vector<8x128xbf16>
    %158 = arith.index_cast %c3_i32 : i32 to index
    %c0_45 = arith.constant 0 : index
    %c0_46 = arith.constant 0 : index
    %159 = vector.load %arg6[%158, %c0_45, %c0_46] : memref<8x8x128xbf16, #tpu.memory_space<vmem>>, vector<1x8x128xbf16>
    %160 = vector.shape_cast %159 : vector<1x8x128xbf16> to vector<8x128xbf16>
    %161 = vector.shape_cast %157 : vector<8x128xbf16> to vector<1x8x128xbf16>
    tpu.vector_store %arg6[%158, %c0_45, %c0_46], %161 {strides = array<i32>} : memref<8x8x128xbf16, #tpu.memory_space<vmem>>, vector<1x8x128xbf16>,
    %c4_i32 = arith.constant 4 : i32
    %c8_i32_47 = arith.constant 8 : i32
    %162 = arith.muli %c4_i32, %c8_i32_47 : i32
    %163 = tpu.assume_multiple %162, 8 : i32
    %164 = arith.index_cast %163 : i32 to index
    %c0_48 = arith.constant 0 : index
    %165 = vector.load %arg9[%164, %c0_48] : memref<64x512xf32, #tpu.memory_space<vmem>>, vector<8x512xf32>
    %166 = arith.truncf %156 : vector<8x128xf32> to vector<8x128xbf16>
    %cst_49 = arith.constant dense<0.000000e+00> : vector<8x512xf32>
    %167 = tpu.matmul %166, %11, %cst_49 {dimension_numbers = #tpu.dot_dimension_numbers<[1], [0], [0], [1], [0, 0, 1, 1], [], []>} : vector<8x128xbf16>, vector<128x512xbf16>, vector<8x512xf32> -> vector<8x512xf32>
    %168 = arith.addf %165, %167 : vector<8x512xf32>
    %169 = vector.extract_strided_slice %168 {offsets = [0, 0], sizes = [8, 128], strides = [1, 1]} : vector<8x512xf32> to vector<8x128xf32>
    %170 = arith.negf %169 : vector<8x128xf32>
    %171 = math.exp %170 : vector<8x128xf32>
    %cst_50 = arith.constant 1.000000e+00 : f32
    %172 = vector.broadcast %cst_50 : f32 to vector<8x128xf32>
    %173 = arith.addf %172, %171 : vector<8x128xf32>
    %174 = arith.divf %172, %173 : vector<8x128xf32>
    %175 = vector.extract_strided_slice %168 {offsets = [0, 128], sizes = [8, 128], strides = [1, 1]} : vector<8x512xf32> to vector<8x128xf32>
    %176 = arith.negf %175 : vector<8x128xf32>
    %177 = math.exp %176 : vector<8x128xf32>
    %cst_51 = arith.constant 1.000000e+00 : f32
    %178 = vector.broadcast %cst_51 : f32 to vector<8x128xf32>
    %179 = arith.addf %178, %177 : vector<8x128xf32>
    %180 = arith.divf %178, %179 : vector<8x128xf32>
    %181 = vector.extract_strided_slice %168 {offsets = [0, 256], sizes = [8, 128], strides = [1, 1]} : vector<8x512xf32> to vector<8x128xf32>
    %182 = math.tanh %181 : vector<8x128xf32>
    %183 = vector.extract_strided_slice %168 {offsets = [0, 384], sizes = [8, 128], strides = [1, 1]} : vector<8x512xf32> to vector<8x128xf32>
    %184 = arith.negf %183 : vector<8x128xf32>
    %185 = math.exp %184 : vector<8x128xf32>
    %cst_52 = arith.constant 1.000000e+00 : f32
    %186 = vector.broadcast %cst_52 : f32 to vector<8x128xf32>
    %187 = arith.addf %186, %185 : vector<8x128xf32>
    %188 = arith.divf %186, %187 : vector<8x128xf32>
    %189 = arith.mulf %180, %154 : vector<8x128xf32>
    %190 = arith.mulf %174, %182 : vector<8x128xf32>
    %191 = arith.addf %189, %190 : vector<8x128xf32>
    %192 = math.tanh %191 : vector<8x128xf32>
    %193 = arith.mulf %188, %192 : vector<8x128xf32>
    %194 = arith.truncf %193 : vector<8x128xf32> to vector<8x128xbf16>
    %195 = arith.index_cast %c4_i32 : i32 to index
    %c0_53 = arith.constant 0 : index
    %c0_54 = arith.constant 0 : index
    %196 = vector.load %arg6[%195, %c0_53, %c0_54] : memref<8x8x128xbf16, #tpu.memory_space<vmem>>, vector<1x8x128xbf16>
    %197 = vector.shape_cast %196 : vector<1x8x128xbf16> to vector<8x128xbf16>
    %198 = vector.shape_cast %194 : vector<8x128xbf16> to vector<1x8x128xbf16>
    tpu.vector_store %arg6[%195, %c0_53, %c0_54], %198 {strides = array<i32>} : memref<8x8x128xbf16, #tpu.memory_space<vmem>>, vector<1x8x128xbf16>,
    %c5_i32 = arith.constant 5 : i32
    %c8_i32_55 = arith.constant 8 : i32
    %199 = arith.muli %c5_i32, %c8_i32_55 : i32
    %200 = tpu.assume_multiple %199, 8 : i32
    %201 = arith.index_cast %200 : i32 to index
    %c0_56 = arith.constant 0 : index
    %202 = vector.load %arg9[%201, %c0_56] : memref<64x512xf32, #tpu.memory_space<vmem>>, vector<8x512xf32>
    %203 = arith.truncf %193 : vector<8x128xf32> to vector<8x128xbf16>
    %cst_57 = arith.constant dense<0.000000e+00> : vector<8x512xf32>
    %204 = tpu.matmul %203, %11, %cst_57 {dimension_numbers = #tpu.dot_dimension_numbers<[1], [0], [0], [1], [0, 0, 1, 1], [], []>} : vector<8x128xbf16>, vector<128x512xbf16>, vector<8x512xf32> -> vector<8x512xf32>
    %205 = arith.addf %202, %204 : vector<8x512xf32>
    %206 = vector.extract_strided_slice %205 {offsets = [0, 0], sizes = [8, 128], strides = [1, 1]} : vector<8x512xf32> to vector<8x128xf32>
    %207 = arith.negf %206 : vector<8x128xf32>
    %208 = math.exp %207 : vector<8x128xf32>
    %cst_58 = arith.constant 1.000000e+00 : f32
    %209 = vector.broadcast %cst_58 : f32 to vector<8x128xf32>
    %210 = arith.addf %209, %208 : vector<8x128xf32>
    %211 = arith.divf %209, %210 : vector<8x128xf32>
    %212 = vector.extract_strided_slice %205 {offsets = [0, 128], sizes = [8, 128], strides = [1, 1]} : vector<8x512xf32> to vector<8x128xf32>
    %213 = arith.negf %212 : vector<8x128xf32>
    %214 = math.exp %213 : vector<8x128xf32>
    %cst_59 = arith.constant 1.000000e+00 : f32
    %215 = vector.broadcast %cst_59 : f32 to vector<8x128xf32>
    %216 = arith.addf %215, %214 : vector<8x128xf32>
    %217 = arith.divf %215, %216 : vector<8x128xf32>
    %218 = vector.extract_strided_slice %205 {offsets = [0, 256], sizes = [8, 128], strides = [1, 1]} : vector<8x512xf32> to vector<8x128xf32>
    %219 = math.tanh %218 : vector<8x128xf32>
    %220 = vector.extract_strided_slice %205 {offsets = [0, 384], sizes = [8, 128], strides = [1, 1]} : vector<8x512xf32> to vector<8x128xf32>
    %221 = arith.negf %220 : vector<8x128xf32>
    %222 = math.exp %221 : vector<8x128xf32>
    %cst_60 = arith.constant 1.000000e+00 : f32
    %223 = vector.broadcast %cst_60 : f32 to vector<8x128xf32>
    %224 = arith.addf %223, %222 : vector<8x128xf32>
    %225 = arith.divf %223, %224 : vector<8x128xf32>
    %226 = arith.mulf %217, %191 : vector<8x128xf32>
    %227 = arith.mulf %211, %219 : vector<8x128xf32>
    %228 = arith.addf %226, %227 : vector<8x128xf32>
    %229 = math.tanh %228 : vector<8x128xf32>
    %230 = arith.mulf %225, %229 : vector<8x128xf32>
    %231 = arith.truncf %230 : vector<8x128xf32> to vector<8x128xbf16>
    %232 = arith.index_cast %c5_i32 : i32 to index
    %c0_61 = arith.constant 0 : index
    %c0_62 = arith.constant 0 : index
    %233 = vector.load %arg6[%232, %c0_61, %c0_62] : memref<8x8x128xbf16, #tpu.memory_space<vmem>>, vector<1x8x128xbf16>
    %234 = vector.shape_cast %233 : vector<1x8x128xbf16> to vector<8x128xbf16>
    %235 = vector.shape_cast %231 : vector<8x128xbf16> to vector<1x8x128xbf16>
    tpu.vector_store %arg6[%232, %c0_61, %c0_62], %235 {strides = array<i32>} : memref<8x8x128xbf16, #tpu.memory_space<vmem>>, vector<1x8x128xbf16>,
    %c6_i32 = arith.constant 6 : i32
    %c8_i32_63 = arith.constant 8 : i32
    %236 = arith.muli %c6_i32, %c8_i32_63 : i32
    %237 = tpu.assume_multiple %236, 8 : i32
    %238 = arith.index_cast %237 : i32 to index
    %c0_64 = arith.constant 0 : index
    %239 = vector.load %arg9[%238, %c0_64] : memref<64x512xf32, #tpu.memory_space<vmem>>, vector<8x512xf32>
    %240 = arith.truncf %230 : vector<8x128xf32> to vector<8x128xbf16>
    %cst_65 = arith.constant dense<0.000000e+00> : vector<8x512xf32>
    %241 = tpu.matmul %240, %11, %cst_65 {dimension_numbers = #tpu.dot_dimension_numbers<[1], [0], [0], [1], [0, 0, 1, 1], [], []>} : vector<8x128xbf16>, vector<128x512xbf16>, vector<8x512xf32> -> vector<8x512xf32>
    %242 = arith.addf %239, %241 : vector<8x512xf32>
    %243 = vector.extract_strided_slice %242 {offsets = [0, 0], sizes = [8, 128], strides = [1, 1]} : vector<8x512xf32> to vector<8x128xf32>
    %244 = arith.negf %243 : vector<8x128xf32>
    %245 = math.exp %244 : vector<8x128xf32>
    %cst_66 = arith.constant 1.000000e+00 : f32
    %246 = vector.broadcast %cst_66 : f32 to vector<8x128xf32>
    %247 = arith.addf %246, %245 : vector<8x128xf32>
    %248 = arith.divf %246, %247 : vector<8x128xf32>
    %249 = vector.extract_strided_slice %242 {offsets = [0, 128], sizes = [8, 128], strides = [1, 1]} : vector<8x512xf32> to vector<8x128xf32>
    %250 = arith.negf %249 : vector<8x128xf32>
    %251 = math.exp %250 : vector<8x128xf32>
    %cst_67 = arith.constant 1.000000e+00 : f32
    %252 = vector.broadcast %cst_67 : f32 to vector<8x128xf32>
    %253 = arith.addf %252, %251 : vector<8x128xf32>
    %254 = arith.divf %252, %253 : vector<8x128xf32>
    %255 = vector.extract_strided_slice %242 {offsets = [0, 256], sizes = [8, 128], strides = [1, 1]} : vector<8x512xf32> to vector<8x128xf32>
    %256 = math.tanh %255 : vector<8x128xf32>
    %257 = vector.extract_strided_slice %242 {offsets = [0, 384], sizes = [8, 128], strides = [1, 1]} : vector<8x512xf32> to vector<8x128xf32>
    %258 = arith.negf %257 : vector<8x128xf32>
    %259 = math.exp %258 : vector<8x128xf32>
    %cst_68 = arith.constant 1.000000e+00 : f32
    %260 = vector.broadcast %cst_68 : f32 to vector<8x128xf32>
    %261 = arith.addf %260, %259 : vector<8x128xf32>
    %262 = arith.divf %260, %261 : vector<8x128xf32>
    %263 = arith.mulf %254, %228 : vector<8x128xf32>
    %264 = arith.mulf %248, %256 : vector<8x128xf32>
    %265 = arith.addf %263, %264 : vector<8x128xf32>
    %266 = math.tanh %265 : vector<8x128xf32>
    %267 = arith.mulf %262, %266 : vector<8x128xf32>
    %268 = arith.truncf %267 : vector<8x128xf32> to vector<8x128xbf16>
    %269 = arith.index_cast %c6_i32 : i32 to index
    %c0_69 = arith.constant 0 : index
    %c0_70 = arith.constant 0 : index
    %270 = vector.load %arg6[%269, %c0_69, %c0_70] : memref<8x8x128xbf16, #tpu.memory_space<vmem>>, vector<1x8x128xbf16>
    %271 = vector.shape_cast %270 : vector<1x8x128xbf16> to vector<8x128xbf16>
    %272 = vector.shape_cast %268 : vector<8x128xbf16> to vector<1x8x128xbf16>
    tpu.vector_store %arg6[%269, %c0_69, %c0_70], %272 {strides = array<i32>} : memref<8x8x128xbf16, #tpu.memory_space<vmem>>, vector<1x8x128xbf16>,
    %c7_i32 = arith.constant 7 : i32
    %c8_i32_71 = arith.constant 8 : i32
    %273 = arith.muli %c7_i32, %c8_i32_71 : i32
    %274 = tpu.assume_multiple %273, 8 : i32
    %275 = arith.index_cast %274 : i32 to index
    %c0_72 = arith.constant 0 : index
    %276 = vector.load %arg9[%275, %c0_72] : memref<64x512xf32, #tpu.memory_space<vmem>>, vector<8x512xf32>
    %277 = arith.truncf %267 : vector<8x128xf32> to vector<8x128xbf16>
    %cst_73 = arith.constant dense<0.000000e+00> : vector<8x512xf32>
    %278 = tpu.matmul %277, %11, %cst_73 {dimension_numbers = #tpu.dot_dimension_numbers<[1], [0], [0], [1], [0, 0, 1, 1], [], []>} : vector<8x128xbf16>, vector<128x512xbf16>, vector<8x512xf32> -> vector<8x512xf32>
    %279 = arith.addf %276, %278 : vector<8x512xf32>
    %280 = vector.extract_strided_slice %279 {offsets = [0, 0], sizes = [8, 128], strides = [1, 1]} : vector<8x512xf32> to vector<8x128xf32>
    %281 = arith.negf %280 : vector<8x128xf32>
    %282 = math.exp %281 : vector<8x128xf32>
    %cst_74 = arith.constant 1.000000e+00 : f32
    %283 = vector.broadcast %cst_74 : f32 to vector<8x128xf32>
    %284 = arith.addf %283, %282 : vector<8x128xf32>
    %285 = arith.divf %283, %284 : vector<8x128xf32>
    %286 = vector.extract_strided_slice %279 {offsets = [0, 128], sizes = [8, 128], strides = [1, 1]} : vector<8x512xf32> to vector<8x128xf32>
    %287 = arith.negf %286 : vector<8x128xf32>
    %288 = math.exp %287 : vector<8x128xf32>
    %cst_75 = arith.constant 1.000000e+00 : f32
    %289 = vector.broadcast %cst_75 : f32 to vector<8x128xf32>
    %290 = arith.addf %289, %288 : vector<8x128xf32>
    %291 = arith.divf %289, %290 : vector<8x128xf32>
    %292 = vector.extract_strided_slice %279 {offsets = [0, 256], sizes = [8, 128], strides = [1, 1]} : vector<8x512xf32> to vector<8x128xf32>
    %293 = math.tanh %292 : vector<8x128xf32>
    %294 = vector.extract_strided_slice %279 {offsets = [0, 384], sizes = [8, 128], strides = [1, 1]} : vector<8x512xf32> to vector<8x128xf32>
    %295 = arith.negf %294 : vector<8x128xf32>
    %296 = math.exp %295 : vector<8x128xf32>
    %cst_76 = arith.constant 1.000000e+00 : f32
    %297 = vector.broadcast %cst_76 : f32 to vector<8x128xf32>
    %298 = arith.addf %297, %296 : vector<8x128xf32>
    %299 = arith.divf %297, %298 : vector<8x128xf32>
    %300 = arith.mulf %291, %265 : vector<8x128xf32>
    %301 = arith.mulf %285, %293 : vector<8x128xf32>
    %302 = arith.addf %300, %301 : vector<8x128xf32>
    %303 = math.tanh %302 : vector<8x128xf32>
    %304 = arith.mulf %299, %303 : vector<8x128xf32>
    %305 = arith.truncf %304 : vector<8x128xf32> to vector<8x128xbf16>
    %306 = arith.index_cast %c7_i32 : i32 to index
    %c0_77 = arith.constant 0 : index
    %c0_78 = arith.constant 0 : index
    %307 = vector.load %arg6[%306, %c0_77, %c0_78] : memref<8x8x128xbf16, #tpu.memory_space<vmem>>, vector<1x8x128xbf16>
    %308 = vector.shape_cast %307 : vector<1x8x128xbf16> to vector<8x128xbf16>
    %309 = vector.shape_cast %305 : vector<8x128xbf16> to vector<1x8x128xbf16>
    tpu.vector_store %arg6[%306, %c0_77, %c0_78], %309 {strides = array<i32>} : memref<8x8x128xbf16, #tpu.memory_space<vmem>>, vector<1x8x128xbf16>,
    %c8_i32_79 = arith.constant 8 : i32
    %c0_80 = arith.constant 0 : index
    %c0_81 = arith.constant 0 : index
    %310 = vector.load %arg7[%c0_80, %c0_81] : memref<8x128xf32, #tpu.memory_space<vmem>>, vector<8x128xf32>
    tpu.vector_store %arg7[%c0_80, %c0_81], %304 {strides = array<i32>} : memref<8x128xf32, #tpu.memory_space<vmem>>, vector<8x128xf32>,
    %c0_82 = arith.constant 0 : index
    %c0_83 = arith.constant 0 : index
    %311 = vector.load %arg8[%c0_82, %c0_83] : memref<8x128xf32, #tpu.memory_space<vmem>>, vector<8x128xf32>
    tpu.vector_store %arg8[%c0_82, %c0_83], %302 {strides = array<i32>} : memref<8x128xf32, #tpu.memory_space<vmem>>, vector<8x128xf32>,
    return
  }
  func.func @transform_0(%arg0: i32, %arg1: i32) -> (i32, i32, i32) {
    %c0_i32 = arith.constant 0 : i32
    %c0_i32_0 = arith.constant 0 : i32
    return %arg1, %arg0, %c0_i32 : i32, i32, i32
  }
  func.func @transform_1(%arg0: i32, %arg1: i32) -> (i32, i32) {
    %c0_i32 = arith.constant 0 : i32
    %c0_i32_0 = arith.constant 0 : i32
    %c0_i32_1 = arith.constant 0 : i32
    return %c0_i32, %c0_i32_0 : i32, i32
  }
  func.func @transform_2(%arg0: i32, %arg1: i32) -> (i32, i32) {
    %c0_i32 = arith.constant 0 : i32
    %c0_i32_0 = arith.constant 0 : i32
    %c0_i32_1 = arith.constant 0 : i32
    return %c0_i32, %c0_i32_0 : i32, i32
  }
  func.func @transform_3(%arg0: i32, %arg1: i32) -> (i32, i32) {
    %c0_i32 = arith.constant 0 : i32
    %c0_i32_0 = arith.constant 0 : i32
    %c0_i32_1 = arith.constant 0 : i32
    return %c0_i32, %c0_i32_0 : i32, i32
  }
  func.func @transform_4(%arg0: i32, %arg1: i32) -> (i32, i32, i32) {
    %c0_i32 = arith.constant 0 : i32
    %c0_i32_0 = arith.constant 0 : i32
    return %arg1, %arg0, %c0_i32 : i32, i32, i32
  }
  func.func @transform_5(%arg0: i32, %arg1: i32) -> (i32, i32) {
    %c0_i32 = arith.constant 0 : i32
    %c0_i32_0 = arith.constant 0 : i32
    return %arg0, %c0_i32 : i32, i32
  }
  func.func @transform_6(%arg0: i32, %arg1: i32) -> (i32, i32) {
    %c0_i32 = arith.constant 0 : i32
    %c0_i32_0 = arith.constant 0 : i32
    return %arg0, %c0_i32 : i32, i32
  }
}

</mosaic_0001>

<bundles_post_ra>
// kernel: encoder_forward.3
= control target key start
LH: loop header
LB: loop body
LE: loop exit
PB: predicated region body
PF: predicated region fallthrough
CT: control target
= control target key end

     0   :  { %v2906_v2 = vmov 0   ;;  %s2899_s0 = inlined_call_operand.vmem [shape: bf16[8,8,128], index: 0, kind: input, shape index: {}]   ;;  %s2900_s1 = inlined_call_operand.vmem [shape: bf16[128,512], index: 1, kind: input, shape index: {}]   ;;  %s2901_s2 = inlined_call_operand.vmem [shape: bf16[128,512], index: 2, kind: input, shape index: {}]   ;;  %s2902_s3 = inlined_call_operand.vmem [shape: f32[1,512], index: 3, kind: input, shape index: {}]   ;;  %s2903_s4 = inlined_call_operand.hbm [shape: bf16[8,8,128], index: 4, kind: output, shape index: {0}]   ;;  %s2904_s5 = inlined_call_operand.vmem [shape: f32[8,128], index: 5, kind: output, shape index: {1}]   ;;  %s2905_s6 = inlined_call_operand.vmem [shape: f32[8,128], index: 6, kind: output, shape index: {2}]  }
   0x1   :  { %v1736_v0 = vld [vmem:[%s2900_s1 + $0x4] ss:$16 sps:$4 sm:$0xff]   ;;  %v1738_v1 = vld [vmem:[%s2900_s1 + $0xc] ss:$16 sps:$4 sm:$0xff]   ;;  %306 = vmatprep.mubr.bf16.mxu0 %v2906_v2  ;;  %379 = vmatprep.mubr.bf16.mxu1 %v2906_v2  ;;  %v1740_v3 = vld [vmem:[%s2900_s1] ss:$16 sps:$4 sm:$0xff]  }
   0x2   :  { %274 = vmatprep.subr.bf16.mxu0 %v1736_v0  ;;  %v1741_v4 = vld [vmem:[%s2900_s1 + $0x8] ss:$16 sps:$4 sm:$0xff]   ;;  %347 = vmatprep.subr.bf16.mxu1 %v1738_v1  ;;  %v1742_v5 = vld [vmem:[%s2900_s1 + $0x24] ss:$16 sps:$4 sm:$0xff]   ;;  %v1744_v6 = vld [vmem:[%s2900_s1 + $0x2c] ss:$16 sps:$4 sm:$0xff]  }
   0x3   :  { %275 = vmatpush1.bf16.msra.mxu0 %v1740_v3  ;;  %348 = vmatpush1.bf16.msra.mxu1 %v1741_v4  ;;  %v1746_v7 = vld [vmem:[%s2900_s1 + $0x20] ss:$16 sps:$4 sm:$0xff]   ;;  %v1747_v8 = vld [vmem:[%s2900_s1 + $0x28] ss:$16 sps:$4 sm:$0xff]   ;;  %v1748_v9 = vld [vmem:[%s2900_s1 + $0x44] ss:$16 sps:$4 sm:$0xff]  }
   0x4   :  { %276 = vmatprep.subr.bf16.mxu0 %v1742_v5  ;;  %349 = vmatprep.subr.bf16.mxu1 %v1744_v6  ;;  %v1750_v10 = vld [vmem:[%s2900_s1 + $0x4c] ss:$16 sps:$4 sm:$0xff]   ;;  %v1752_v11 = vld [vmem:[%s2900_s1 + $0x40] ss:$16 sps:$4 sm:$0xff]   ;;  %v1753_v12 = vld [vmem:[%s2900_s1 + $0x48] ss:$16 sps:$4 sm:$0xff]  }
   0x5   :  { %v1754_v13 = vld [vmem:[%s2900_s1 + $0x64] ss:$16 sps:$4 sm:$0xff]   ;;  %v1756_v14 = vld [vmem:[%s2900_s1 + $0x6c] ss:$16 sps:$4 sm:$0xff]   ;;  %v1758_v15 = vld [vmem:[%s2900_s1 + $0x60] ss:$16 sps:$4 sm:$0xff]  }
   0x6   :  { %v1759_v16 = vld [vmem:[%s2900_s1 + $0x68] ss:$16 sps:$4 sm:$0xff]   ;;  %v1760_v17 = vld [vmem:[%s2900_s1 + $0x84] ss:$16 sps:$4 sm:$0xff]   ;;  %v1762_v18 = vld [vmem:[%s2900_s1 + $0x8c] ss:$16 sps:$4 sm:$0xff]  }
   0x7   :  { %277 = vmatpush1.bf16.msra.mxu0 %v1746_v7  ;;  %350 = vmatpush1.bf16.msra.mxu1 %v1747_v8  ;;  %v1764_v19 = vld [vmem:[%s2900_s1 + $0x80] ss:$16 sps:$4 sm:$0xff]   ;;  %v1765_v20 = vld [vmem:[%s2900_s1 + $0x88] ss:$16 sps:$4 sm:$0xff]   ;;  %v1766_v21 = vld [vmem:[%s2900_s1 + $0xa4] ss:$16 sps:$4 sm:$0xff]  }
   0x8   :  { %278 = vmatprep.subr.bf16.mxu0 %v1748_v9  ;;  %351 = vmatprep.subr.bf16.mxu1 %v1750_v10  ;;  %v1768_v22 = vld [vmem:[%s2900_s1 + $0xac] ss:$16 sps:$4 sm:$0xff]   ;;  %v1770_v23 = vld [vmem:[%s2900_s1 + $0xa0] ss:$16 sps:$4 sm:$0xff]   ;;  %v1771_v24 = vld [vmem:[%s2900_s1 + $0xa8] ss:$16 sps:$4 sm:$0xff]  }
   0x9   :  { %v1772_v25 = vld [vmem:[%s2900_s1 + $0xc4] ss:$16 sps:$4 sm:$0xff]   ;;  %v1774_v26 = vld [vmem:[%s2900_s1 + $0xcc] ss:$16 sps:$4 sm:$0xff]   ;;  %v1776_v27 = vld [vmem:[%s2900_s1 + $0xc0] ss:$16 sps:$4 sm:$0xff]  }
   0xa   :  { %v1777_v28 = vld [vmem:[%s2900_s1 + $0xc8] ss:$16 sps:$4 sm:$0xff]   ;;  %v1778_v29 = vld [vmem:[%s2900_s1 + $0xe4] ss:$16 sps:$4 sm:$0xff]   ;;  %v1780_v30 = vld [vmem:[%s2900_s1 + $0xec] ss:$16 sps:$4 sm:$0xff]  }
   0xb   :  { %279 = vmatpush1.bf16.msra.mxu0 %v1752_v11  ;;  %352 = vmatpush1.bf16.msra.mxu1 %v1753_v12  ;;  %v1782_v31 = vld [vmem:[%s2900_s1 + $0xe0] ss:$16 sps:$4 sm:$0xff]   ;;  %v1783_v32 = vld [vmem:[%s2900_s1 + $0xe8] ss:$16 sps:$4 sm:$0xff]   ;;  %v2161_v33 = vld [vmem:[%s2901_s2 + $0x4] ss:$16 sps:$4 sm:$0xff]  }
   0xc   :  { %280 = vmatprep.subr.bf16.mxu0 %v1754_v13  ;;  %353 = vmatprep.subr.bf16.mxu1 %v1756_v14  ;;  %v2166_v34 = vld [vmem:[%s2901_s2 + $0xc] ss:$16 sps:$4 sm:$0xff]   ;;  %v1784_v35 = vld [vmem:[%s2899_s0] sm:$0xff]   ;;  %v2179_v37 = vld [vmem:[%s2901_s2 + $0x8] ss:$16 sps:$4 sm:$0xff]  }
   0xd   :  { %v2174_v36 = vld [vmem:[%s2901_s2] ss:$16 sps:$4 sm:$0xff]   ;;  %v2186_v38 = vld [vmem:[%s2901_s2 + $0x24] ss:$16 sps:$4 sm:$0xff]   ;;  %v2191_v39 = vld [vmem:[%s2901_s2 + $0x2c] ss:$16 sps:$4 sm:$0xff]  }
   0xe   :  { %v2196_v40 = vld [vmem:[%s2901_s2 + $0x20] ss:$16 sps:$4 sm:$0xff]   ;;  %v2203_v41 = vld [vmem:[%s2901_s2 + $0x28] ss:$16 sps:$4 sm:$0xff]   ;;  %v2210_v42 = vld [vmem:[%s2901_s2 + $0x44] ss:$16 sps:$4 sm:$0xff]  }
   0xf   :  { %281 = vmatpush1.bf16.msra.mxu0 %v1758_v15  ;;  %354 = vmatpush1.bf16.msra.mxu1 %v1759_v16  ;;  %v2215_v43 = vld [vmem:[%s2901_s2 + $0x4c] ss:$16 sps:$4 sm:$0xff]   ;;  %v2225_v45 = vld [vmem:[%s2901_s2 + $0x40] ss:$16 sps:$4 sm:$0xff]   ;;  %v2230_v46 = vld [vmem:[%s2901_s2 + $0x48] ss:$16 sps:$4 sm:$0xff]  }
  0x10   :  { %282 = vmatprep.subr.bf16.mxu0 %v1760_v17  ;;  %355 = vmatprep.subr.bf16.mxu1 %v1762_v18  ;;  %v1797_v44 = vld [vmem:[%s2899_s0 + $0x8] sm:$0xff]   ;;  %v2237_v47 = vld [vmem:[%s2901_s2 + $0x64] ss:$16 sps:$4 sm:$0xff]   ;;  %v2249_v49 = vld [vmem:[%s2901_s2 + $0x60] ss:$16 sps:$4 sm:$0xff]  }
  0x11   :  { %v2244_v48 = vld [vmem:[%s2901_s2 + $0x6c] ss:$16 sps:$4 sm:$0xff]   ;;  %v2254_v50 = vld [vmem:[%s2901_s2 + $0x68] ss:$16 sps:$4 sm:$0xff]   ;;  %v2261_v51 = vld [vmem:[%s2901_s2 + $0x84] ss:$16 sps:$4 sm:$0xff]  }
  0x12   :  { %v2268_v52 = vld [vmem:[%s2901_s2 + $0x8c] ss:$16 sps:$4 sm:$0xff]   ;;  %v1810_v53 = vld [vmem:[%s2899_s0 + $0x10] sm:$0xff]  }
  0x13   :  { %283 = vmatpush1.bf16.msra.mxu0 %v1764_v19  ;;  %356 = vmatpush1.bf16.msra.mxu1 %v1765_v20 }
  0x14   :  { %284 = vmatprep.subr.bf16.mxu0 %v1766_v21  ;;  %357 = vmatprep.subr.bf16.mxu1 %v1768_v22 }
  0x17   :  { %285 = vmatpush1.bf16.msra.mxu0 %v1770_v23  ;;  %358 = vmatpush1.bf16.msra.mxu1 %v1771_v24 }
  0x18   :  { %286 = vmatprep.subr.bf16.mxu0 %v1772_v25  ;;  %359 = vmatprep.subr.bf16.mxu1 %v1774_v26 }
  0x1b   :  { %287 = vmatpush1.bf16.msra.mxu0 %v1776_v27  ;;  %360 = vmatpush1.bf16.msra.mxu1 %v1777_v28 }
  0x1c   :  { %288 = vmatprep.subr.bf16.mxu0 %v1778_v29  ;;  %361 = vmatprep.subr.bf16.mxu1 %v1780_v30 }
  0x1f   :  { %289 = vmatpush1.bf16.msra.mxu0 %v1782_v31  ;;  %362 = vmatpush1.bf16.msra.mxu1 %v1783_v32 }
  0x20   :  { %654 = vmatprep.subr.bf16.mxu0 %v2161_v33  ;;  %695 = vmatprep.subr.bf16.mxu1 %v2166_v34 }
  0x22   :  { %307 = vmatmul.mubr.bf16.vlgmr.msra.gmra.mrb[0].mxu0 %v1784_v35  ;;  %380 = vmatmul.mubr.bf16.vlgmr.msra.gmra.mrb[0].mxu1 %v1784_v35 }
  0x23   :  { %655 = vmatpush1.bf16.msra.mxu0 %v2174_v36  ;;  %696 = vmatpush1.bf16.msra.mxu1 %v2179_v37 }
  0x24   :  { %656 = vmatprep.subr.bf16.mxu0 %v2186_v38  ;;  %697 = vmatprep.subr.bf16.mxu1 %v2191_v39 }
  0x25   :  { %316 = vmatprep.mubr.bf16.mxu0 %v2906_v2  ;;  %389 = vmatprep.mubr.bf16.mxu1 %v2906_v2 }
  0x27   :  { %657 = vmatpush1.bf16.msra.mxu0 %v2196_v40  ;;  %698 = vmatpush1.bf16.msra.mxu1 %v2203_v41 }
  0x28   :  { %658 = vmatprep.subr.bf16.mxu0 %v2210_v42  ;;  %699 = vmatprep.subr.bf16.mxu1 %v2215_v43 }
  0x2a   :  { %317 = vmatmul.mubr.bf16.gmra.mrb[4].mxu0 %v1797_v44  ;;  %390 = vmatmul.mubr.bf16.gmra.mrb[4].mxu1 %v1797_v44 }
  0x2b   :  { %659 = vmatpush1.bf16.msra.mxu0 %v2225_v45  ;;  %700 = vmatpush1.bf16.msra.mxu1 %v2230_v46 }
  0x2c   :  { %660 = vmatprep.subr.bf16.mxu0 %v2237_v47  ;;  %701 = vmatprep.subr.bf16.mxu1 %v2244_v48 }
  0x2d   :  { %326 = vmatprep.mubr.bf16.mxu0 %v2906_v2  ;;  %399 = vmatprep.mubr.bf16.mxu1 %v2906_v2 }
  0x2e   :  { %12 = vsyncpa [#allocation4], 0  ;;  %v2280_v54 = vld [vmem:[%s2901_s2 + $0x80] ss:$16 sps:$4 sm:$0xff]   ;;  %v2285_v55 = vld [vmem:[%s2901_s2 + $0x88] ss:$16 sps:$4 sm:$0xff]   ;;  %v70_v7 = vlaneseq }
  0x2f   :  { %661 = vmatpush1.bf16.msra.mxu0 %v2249_v49  ;;  %702 = vmatpush1.bf16.msra.mxu1 %v2254_v50  ;;  %v2292_v56 = vld [vmem:[%s2901_s2 + $0xa4] ss:$16 sps:$4 sm:$0xff]   ;;  %v2297_v57 = vld [vmem:[%s2901_s2 + $0xac] ss:$16 sps:$4 sm:$0xff]   ;;  %v2304_v58 = vld [vmem:[%s2901_s2 + $0xa0] ss:$16 sps:$4 sm:$0xff]  }
  0x30   :  { %662 = vmatprep.subr.bf16.mxu0 %v2261_v51  ;;  %703 = vmatprep.subr.bf16.mxu1 %v2268_v52  ;;  %v2309_v59 = vld [vmem:[%s2901_s2 + $0xa8] ss:$16 sps:$4 sm:$0xff]   ;;  %v2316_v60 = vld [vmem:[%s2901_s2 + $0xc4] ss:$16 sps:$4 sm:$0xff]   ;;  %v2321_v61 = vld [vmem:[%s2901_s2 + $0xcc] ss:$16 sps:$4 sm:$0xff]  }
  0x31   :  { %v1823_v62 = vld [vmem:[%s2899_s0 + $0x18] sm:$0xff]   ;;  %v2333_v63 = vld [vmem:[%s2901_s2 + $0xc0] ss:$16 sps:$4 sm:$0xff]   ;;  %v2345_v1 = vld [vmem:[%s2901_s2 + $0xe4] ss:$16 sps:$4 sm:$0xff]   ;;  %v2021_v6 = vmov 0.0|0.0  }
  0x32   :  { %327 = vmatmul.mubr.bf16.gmra.mrb[8].mxu0 %v1810_v53  ;;  %400 = vmatmul.mubr.bf16.gmra.mrb[8].mxu1 %v1810_v53  ;;  %v2338_v0 = vld [vmem:[%s2901_s2 + $0xc8] ss:$16 sps:$4 sm:$0xff]   ;;  %v2350_v3 = vld [vmem:[%s2901_s2 + $0xec] ss:$16 sps:$4 sm:$0xff]   ;;  %v2357_v4 = vld [vmem:[%s2901_s2 + $0xe0] ss:$16 sps:$4 sm:$0xff]  }
  0x33   :  { %663 = vmatpush1.bf16.msra.mxu0 %v2280_v54  ;;  %704 = vmatpush1.bf16.msra.mxu1 %v2285_v55  ;;  %v2362_v5 = vld [vmem:[%s2901_s2 + $0xe8] ss:$16 sps:$4 sm:$0xff]   ;;  %v71_v8 = vshrl.u32 %v70_v7, 7  ;;  %v68_v12 = vld [vmem:[%s2902_s3] sm:$0xf]  ;;  %s2022_s20 = smov [#allocation3]  }
  0x34   :  { %664 = vmatprep.subr.bf16.mxu0 %v2292_v56  ;;  %705 = vmatprep.subr.bf16.mxu1 %v2297_v57  ;;  %s1613_s21 = sshll.u32 %s2022_s20, 4  ;;  %s1614_s21 = int_to_ptr.vmem [resolvable:$true] %s1613_s21 }
  0x35   :  { %336 = vmatprep.mubr.bf16.mxu0 %v2906_v2  ;;  %409 = vmatprep.mubr.bf16.mxu1 %v2906_v2  ;;  %v80_v9 = vsub.s32 2, %v71_v8  ;;  %v84_v10 = vsub.s32 3, %v71_v8  ;;  %v72_v11 = vsub.s32 0, %v71_v8  ;;  %v76_v13 = vsub.s32 1, %v71_v8  ;;  %s1996_s24 = scalar_lea.vmem %s1614_s21, 512  ;;  %p2001_p1 = scmp.lt.s32.totalorder %s1614_s21, %s1614_s21 }
  0x36   :  { %p1997_p0 = scmp.ne.s32.totalorder %s1614_s21, %s1996_s24  ;;  %p2002_p2 = scmp.lt.s32.totalorder %s1996_s24, %s1996_s24 }
  0x37   :  { %665 = vmatpush1.bf16.msra.mxu0 %v2304_v58  ;;  %706 = vmatpush1.bf16.msra.mxu1 %v2309_v59  ;;  %v2409_v14 = vrot.slane %v68_v12, %v80_v9  ;;  %v2415_v17 = vrot.slane %v68_v12, %v84_v10  ;;  %v73_v18 = vrot.slane %v68_v12, %v72_v11 }
  0x38   :  { %666 = vmatprep.subr.bf16.mxu0 %v2316_v60  ;;  %707 = vmatprep.subr.bf16.mxu1 %v2321_v61  ;;  %v77_v21 = vrot.slane %v68_v12, %v76_v13  ;;  %p2003_p3 = por %p2002_p2, %p2001_p1 }
  0x3a   :  { %337 = vmatmul.mubr.bf16.gmra.mrb[12].mxu0 %v1823_v62  ;;  %410 = vmatmul.mubr.bf16.gmra.mrb[12].mxu1 %v1823_v62  ;;  %p2004_p4 = pnand %p2003_p3, %p1997_p0 }
  0x3b   :  { %667 = vmatpush1.bf16.msra.mxu0 %v2333_v63  ;;  %708 = vmatpush1.bf16.msra.mxu1 %v2338_v0 }
  0x3c   :  { %668 = vmatprep.subr.bf16.mxu0 %v2345_v1  ;;  %709 = vmatprep.subr.bf16.mxu1 %v2350_v3 }
  0x3d   :  { %686 = vmatprep.mubr.bf16.mxu0 %v2906_v2  ;;  %727 = vmatprep.mubr.bf16.mxu1 %v2906_v2 }
  0x3f   :  { %669 = vmatpush1.bf16.msra.mxu0 %v2357_v4  ;;  %710 = vmatpush1.bf16.msra.mxu1 %v2362_v5 }
  0x40   :  { %773 = vmatprep.subr.bf16.mxu0 %v2161_v33  ;;  %814 = vmatprep.subr.bf16.mxu1 %v2166_v34 }
  0x42   :  { %687 = vmatmul.mubr.bf16.vlgmr.msra.gmra.mrb[16].mxu0 %v2021_v6  ;;  %728 = vmatmul.mubr.bf16.vlgmr.msra.gmra.mrb[16].mxu1 %v2021_v6 }
  0x43   :  { %774 = vmatpush1.bf16.msra.mxu0 %v2174_v36  ;;  %815 = vmatpush1.bf16.msra.mxu1 %v2179_v37 }
  0x44   :  { %775 = vmatprep.subr.bf16.mxu0 %v2186_v38  ;;  %816 = vmatprep.subr.bf16.mxu1 %v2191_v39 }
  0x45   :  { %805 = vmatprep.mubr.bf16.mxu0 %v2906_v2  ;;  %846 = vmatprep.mubr.bf16.mxu1 %v2906_v2 }
  0x47   :  { %776 = vmatpush1.bf16.msra.mxu0 %v2196_v40  ;;  %817 = vmatpush1.bf16.msra.mxu1 %v2203_v41 }
  0x48   :  { %777 = vmatprep.subr.bf16.mxu0 %v2210_v42  ;;  %818 = vmatprep.subr.bf16.mxu1 %v2215_v43 }
  0x4b   :  { %778 = vmatpush1.bf16.msra.mxu0 %v2225_v45  ;;  %819 = vmatpush1.bf16.msra.mxu1 %v2230_v46 }
  0x4c   :  { %779 = vmatprep.subr.bf16.mxu0 %v2237_v47  ;;  %820 = vmatprep.subr.bf16.mxu1 %v2244_v48 }
  0x4f   :  { %780 = vmatpush1.bf16.msra.mxu0 %v2249_v49  ;;  %821 = vmatpush1.bf16.msra.mxu1 %v2254_v50 }
  0x50   :  { %781 = vmatprep.subr.bf16.mxu0 %v2261_v51  ;;  %822 = vmatprep.subr.bf16.mxu1 %v2268_v52 }
  0x53   :  { %782 = vmatpush1.bf16.msra.mxu0 %v2280_v54  ;;  %823 = vmatpush1.bf16.msra.mxu1 %v2285_v55 }
  0x54   :  { %783 = vmatprep.subr.bf16.mxu0 %v2292_v56  ;;  %824 = vmatprep.subr.bf16.mxu1 %v2297_v57 }
  0x57   :  { %784 = vmatpush1.bf16.msra.mxu0 %v2304_v58  ;;  %825 = vmatpush1.bf16.msra.mxu1 %v2309_v59 }
  0x58   :  { %785 = vmatprep.subr.bf16.mxu0 %v2316_v60  ;;  %826 = vmatprep.subr.bf16.mxu1 %v2321_v61 }
  0x5b   :  { %786 = vmatpush1.bf16.msra.mxu0 %v2333_v63  ;;  %827 = vmatpush1.bf16.msra.mxu1 %v2338_v0 }
  0x5c   :  { %787 = vmatprep.subr.bf16.mxu0 %v2345_v1  ;;  %828 = vmatprep.subr.bf16.mxu1 %v2350_v3 }
  0x5f   :  { %788 = vmatpush1.bf16.msra.mxu0 %v2357_v4  ;;  %829 = vmatpush1.bf16.msra.mxu1 %v2362_v5 }
  0x60   :  { %893 = vmatprep.subr.bf16.mxu0 %v2161_v33  ;;  %934 = vmatprep.subr.bf16.mxu1 %v2166_v34 }
  0xf5   :  { %v2411_v15 = vpop.f32.mrb[0].mxu0  ;;  %v2413_v16 = vpop.f32.mrb[0].mxu1 }
  0xf6   :  { %v310_v19 = vpop.f32.mrb[1].mxu0  ;;  %v383_v20 = vpop.f32.mrb[1].mxu1 }
  0xf7   :  { %v312_v22 = vpop.f32.mrb[2].mxu0  ;;  %v385_v23 = vpop.f32.mrb[2].mxu1 }
  0xf8   :  { %v2417_v24 = vadd.f32 %v312_v22, %v73_v18  ;;  %v314_v25 = vpop.f32.mrb[3].mxu0  ;;  %v2420_v26 = vadd.f32 %v385_v23, %v2409_v14  ;;  %v387_v27 = vpop.f32.mrb[3].mxu1 }
  0xf9   :  { %v2422_v28 = vadd.f32 %v314_v25, %v77_v21  ;;  %v2425_v29 = vadd.f32 %v387_v27, %v2415_v17 }
  0xfd   :  { %v318_v30 = vpop.f32.mrb[4].mxu0  ;;  %v391_v31 = vpop.f32.mrb[4].mxu1 }
  0xfe   :  { %v2427_v32 = vadd.f32 %v318_v30, %v73_v18  ;;  %v320_v35 = vpop.f32.mrb[5].mxu0  ;;  %v2430_v44 = vadd.f32 %v391_v31, %v2409_v14  ;;  %v393_v53 = vpop.f32.mrb[5].mxu1 }
  0xff   :  { %v2432_v62 = vadd.f32 %v320_v35, %v77_v21  ;;  %v322_v6 = vpop.f32.mrb[6].mxu0  ;;  %v2435_v7 = vadd.f32 %v393_v53, %v2415_v17  ;;  %v395_v8 = vpop.f32.mrb[6].mxu1 }
 0x100   :  { %v2437_v9 = vadd.f32 %v322_v6, %v73_v18  ;;  %v324_v10 = vpop.f32.mrb[7].mxu0  ;;  %v2440_v11 = vadd.f32 %v395_v8, %v2409_v14  ;;  %v397_v12 = vpop.f32.mrb[7].mxu1 }
 0x101   :  { %2908 = vst [vmem:[#allocation6_spill] sm:$0xff] %v2435_v7  ;;  %v2442_v13 = vadd.f32 %v324_v10, %v77_v21  ;;  %v2445_v22 = vadd.f32 %v397_v12, %v2415_v17 }
 0x102   :  { %2909 = vst [vmem:[#allocation7_spill] sm:$0xff] %v2437_v9  ;;  %2910 = vst [vmem:[#allocation8_spill] sm:$0xff] %v2440_v11 }
 0x103   :  { %2911 = vst [vmem:[#allocation9_spill] sm:$0xff] %v2442_v13  ;;  %2912 = vst [vmem:[#allocation10_spill] sm:$0xff] %v2445_v22 }
 0x105   :  { %v328_v23 = vpop.f32.mrb[8].mxu0  ;;  %v401_v25 = vpop.f32.mrb[8].mxu1 }
 0x106   :  { %v2447_v27 = vadd.f32 %v328_v23, %v73_v18  ;;  %v330_v30 = vpop.f32.mrb[9].mxu0  ;;  %v2450_v31 = vadd.f32 %v401_v25, %v2409_v14  ;;  %v403_v35 = vpop.f32.mrb[9].mxu1 }
 0x107   :  { %v2452_v53 = vadd.f32 %v330_v30, %v77_v21  ;;  %v332_v6 = vpop.f32.mrb[10].mxu0  ;;  %v2455_v8 = vadd.f32 %v403_v35, %v2415_v17  ;;  %v405_v10 = vpop.f32.mrb[10].mxu1 }
 0x108   :  { %2913 = vst [vmem:[#allocation11_spill] sm:$0xff] %v2447_v27  ;;  %2914 = vst [vmem:[#allocation12_spill] sm:$0xff] %v2450_v31  ;;  %v2457_v2 = vadd.f32 %v332_v6, %v73_v18  ;;  %v334_v12 = vpop.f32.mrb[11].mxu0  ;;  %v2460_v22 = vadd.f32 %v405_v10, %v2409_v14  ;;  %v407_v23 = vpop.f32.mrb[11].mxu1 }
 0x109   :  { %2915 = vst [vmem:[#allocation13_spill] sm:$0xff] %v2452_v53  ;;  %2916 = vst [vmem:[#allocation14_spill] sm:$0xff] %v2455_v8  ;;  %v2462_v27 = vadd.f32 %v334_v12, %v77_v21  ;;  %v2465_v25 = vadd.f32 %v407_v23, %v2415_v17 }
 0x10a   :  { %2917 = vst [vmem:[#allocation15_spill] sm:$0xff] %v2457_v2  ;;  %2918 = vst [vmem:[#allocation16_spill] sm:$0xff] %v2460_v22 }
 0x10b   :  { %2919 = vst [vmem:[#allocation17_spill] sm:$0xff] %v2462_v27  ;;  %2920 = vst [vmem:[#allocation18_spill] sm:$0xff] %v2465_v25 }
 0x10d   :  { %v338_v31 = vpop.f32.mrb[12].mxu0  ;;  %v411_v30 = vpop.f32.mrb[12].mxu1 }
 0x10e   :  { %v2467_v53 = vadd.f32 %v338_v31, %v73_v18  ;;  %v340_v13 = vpop.f32.mrb[13].mxu0  ;;  %v2470_v35 = vadd.f32 %v411_v30, %v2409_v14  ;;  %v413_v6 = vpop.f32.mrb[13].mxu1 }
 0x10f   :  { %v2472_v2 = vadd.f32 %v340_v13, %v77_v21  ;;  %v342_v8 = vpop.f32.mrb[14].mxu0  ;;  %v2475_v10 = vadd.f32 %v413_v6, %v2415_v17  ;;  %v415_v12 = vpop.f32.mrb[14].mxu1  ;;  %v309_v13 = vadd.f32 %v2411_v15, %v73_v18  ;;  %v311_v6 = vadd.f32 %v310_v19, %v77_v21 }
 0x110   :  { %2921 = vst [vmem:[#allocation19_spill] sm:$0xff] %v2467_v53  ;;  %2922 = vst [vmem:[#allocation20_spill] sm:$0xff] %v2470_v35  ;;  %v2477_v27 = vadd.f32 %v342_v8, %v73_v18  ;;  %v344_v23 = vpop.f32.mrb[15].mxu0  ;;  %v2480_v25 = vadd.f32 %v415_v12, %v2409_v14  ;;  %v417_v31 = vpop.f32.mrb[15].mxu1 }
 0x111   :  { %2923 = vst [vmem:[#allocation21_spill] sm:$0xff] %v2472_v2  ;;  %2924 = vst [vmem:[#allocation22_spill] sm:$0xff] %v2475_v10  ;;  %v2482_v53 = vadd.f32 %v344_v23, %v77_v21  ;;  %v2485_v30 = vadd.f32 %v417_v31, %v2415_v17  ;;  %v382_v2 = vadd.f32 %v2413_v16, %v2409_v14 }
 0x112   :  { %2925 = vst [vmem:[#allocation23_spill] sm:$0xff] %v2477_v27  ;;  %2926 = vst [vmem:[#allocation24_spill] sm:$0xff] %v2480_v25  ;;  %v384_v10 = vadd.f32 %v383_v20, %v2415_v17 }
 0x113   :  { %2927 = vst [vmem:[#allocation25_spill] sm:$0xff] %v2482_v53  ;;  %2928 = vst [vmem:[#allocation26_spill] sm:$0xff] %v2485_v30 }
 0x115   :  { %v688_v8 = vpop.f32.mrb[16].mxu0  ;;  %v729_v27 = vpop.f32.mrb[16].mxu1 }
 0x116   :  { %v736_v35 = vadd.f32 %v688_v8, %v309_v13  ;;  %v738_v22 = vadd.f32 %v729_v27, %v382_v2  ;;  %v690_v12 = vpop.f32.mrb[17].mxu0  ;;  %v731_v25 = vpop.f32.mrb[17].mxu1 }
 0x117   :  { %v737_v11 = vadd.f32 %v690_v12, %v311_v6  ;;  %v739_v23 = vadd.f32 %v731_v25, %v384_v10  ;;  %v692_v53 = vpop.f32.mrb[18].mxu0  ;;  %v733_v9 = vpop.f32.mrb[18].mxu1 }
 0x118   :  { %v1707_v31 = vmul.f32 -1.442695, %v736_v35  ;;  %v693_v30 = vpop.f32.mrb[19].mxu0  ;;  %v734_v7 = vpop.f32.mrb[19].mxu1 }
 0x119   :  { %v1708_v15 = vmul.f32 -1.442695, %v737_v11  ;;  %v1709_v14 = vmul.f32 -1.442695, %v739_v23 }
 0x11a   :  { %1836 = vpow2.f32 %v1707_v31 }
 0x11b   :  { %1838 = vpow2.f32 %v1708_v15 }
 0x11c   :  { %1840 = vpow2.f32 %v1709_v14 }
 0x11d   :  { %1842 = vtanh.f32 %v738_v22  ;;  %v2929_v22 = vmov 0  }
 0x124   :  { %v1837_v16 = vpop.eup %1836 }
 0x125   :  { %v1839_v18 = vpop.eup %1838  ;;  %v743_v17 = vadd.f32 1.0, %v1837_v16 }
 0x126   :  { %v749_v19 = vadd.f32 1.0, %v1839_v18  ;;  %v1841_v2 = vpop.eup %1840 }
 0x127   :  { %1844 = vrcp.f32 %v743_v17  ;;  %v1843_v20 = vpop.eup %1842  ;;  %v756_v53 = vadd.f32 1.0, %v1841_v2 }
 0x128   :  { %1846 = vrcp.f32 %v749_v19 }
 0x129   :  { %1848 = vrcp.f32 %v756_v53 }
 0x131   :  { %v1845_v21 = vpop.eup %1844 }
 0x132   :  { %v1847_v27 = vpop.eup %1846  ;;  %v760_v9 = vmul.f32 %v1845_v21, %v1843_v20 }
 0x133   :  { %v759_v25 = vmul.f32 0.0, %v1847_v27  ;;  %v1849_v11 = vpop.eup %1848 }
 0x135   :  { %v2491_v7 = vadd.f32 %v760_v9, %v759_v25 }
 0x137   :  { %1850 = vtanh.f32 %v2491_v7 }
 0x141   :  { %v1851_v35 = vpop.eup %1850 }
 0x142   :  { %v763_v10 = vmul.f32 %v1851_v35, %v1849_v11 }
 0x144   :  { %v764_v30 = vpack.c.bf16 %v763_v10, %v763_v10 }
 0x146   :  { %765 = vst [vmem:[#allocation3] sm:$0xf] %v764_v30  ;;  %806 = vmatmul.mubr.bf16.vlgmr.msra.gmra.mrb[20].mxu0 %v764_v30  ;;  %847 = vmatmul.mubr.bf16.vlgmr.msra.gmra.mrb[20].mxu1 %v764_v30 }
 0x147   :  { %894 = vmatpush1.bf16.msra.mxu0 %v2174_v36  ;;  %935 = vmatpush1.bf16.msra.mxu1 %v2179_v37 }
 0x148   :  { %895 = vmatprep.subr.bf16.mxu0 %v2186_v38  ;;  %936 = vmatprep.subr.bf16.mxu1 %v2191_v39 }
 0x149   :  { %925 = vmatprep.mubr.bf16.mxu0 %v2929_v22  ;;  %966 = vmatprep.mubr.bf16.mxu1 %v2929_v22 }
 0x14b   :  { %896 = vmatpush1.bf16.msra.mxu0 %v2196_v40  ;;  %937 = vmatpush1.bf16.msra.mxu1 %v2203_v41 }
 0x14c   :  { %897 = vmatprep.subr.bf16.mxu0 %v2210_v42  ;;  %938 = vmatprep.subr.bf16.mxu1 %v2215_v43 }
 0x14f   :  { %898 = vmatpush1.bf16.msra.mxu0 %v2225_v45  ;;  %939 = vmatpush1.bf16.msra.mxu1 %v2230_v46 }
 0x150   :  { %899 = vmatprep.subr.bf16.mxu0 %v2237_v47  ;;  %940 = vmatprep.subr.bf16.mxu1 %v2244_v48 }
 0x153   :  { %900 = vmatpush1.bf16.msra.mxu0 %v2249_v49  ;;  %941 = vmatpush1.bf16.msra.mxu1 %v2254_v50 }
 0x154   :  { %901 = vmatprep.subr.bf16.mxu0 %v2261_v51  ;;  %942 = vmatprep.subr.bf16.mxu1 %v2268_v52 }
 0x157   :  { %902 = vmatpush1.bf16.msra.mxu0 %v2280_v54  ;;  %943 = vmatpush1.bf16.msra.mxu1 %v2285_v55 }
 0x158   :  { %903 = vmatprep.subr.bf16.mxu0 %v2292_v56  ;;  %944 = vmatprep.subr.bf16.mxu1 %v2297_v57 }
 0x15b   :  { %904 = vmatpush1.bf16.msra.mxu0 %v2304_v58  ;;  %945 = vmatpush1.bf16.msra.mxu1 %v2309_v59 }
 0x15c   :  { %905 = vmatprep.subr.bf16.mxu0 %v2316_v60  ;;  %946 = vmatprep.subr.bf16.mxu1 %v2321_v61 }
 0x15f   :  { %906 = vmatpush1.bf16.msra.mxu0 %v2333_v63  ;;  %947 = vmatpush1.bf16.msra.mxu1 %v2338_v0 }
 0x160   :  { %907 = vmatprep.subr.bf16.mxu0 %v2345_v1  ;;  %948 = vmatprep.subr.bf16.mxu1 %v2350_v3 }
 0x163   :  { %908 = vmatpush1.bf16.msra.mxu0 %v2357_v4  ;;  %949 = vmatpush1.bf16.msra.mxu1 %v2362_v5 }
 0x164   :  { %1013 = vmatprep.subr.bf16.mxu0 %v2161_v33  ;;  %1054 = vmatprep.subr.bf16.mxu1 %v2166_v34 }
 0x219   :  { %v807_v13 = vpop.f32.mrb[20].mxu0  ;;  %v848_v6 = vpop.f32.mrb[20].mxu1 }
 0x21a   :  { %v855_v8 = vadd.f32 %v807_v13, %v2417_v24  ;;  %v857_v12 = vadd.f32 %v848_v6, %v2420_v26  ;;  %v809_v23 = vpop.f32.mrb[21].mxu0  ;;  %v850_v31 = vpop.f32.mrb[21].mxu1 }
 0x21b   :  { %v856_v15 = vadd.f32 %v809_v23, %v2422_v28  ;;  %v858_v14 = vadd.f32 %v850_v31, %v2425_v29  ;;  %v811_v16 = vpop.f32.mrb[22].mxu0  ;;  %v852_v18 = vpop.f32.mrb[22].mxu1 }
 0x21c   :  { %v1710_v17 = vmul.f32 -1.442695, %v855_v8  ;;  %v812_v19 = vpop.f32.mrb[23].mxu0  ;;  %v853_v2 = vpop.f32.mrb[23].mxu1 }
 0x21d   :  { %v1711_v20 = vmul.f32 -1.442695, %v856_v15  ;;  %v1712_v21 = vmul.f32 -1.442695, %v858_v14 }
 0x21e   :  { %1852 = vpow2.f32 %v1710_v17  ;;  %v2930_v17 = vld [vmem:[#allocation6_spill] sm:$0xff] }
 0x21f   :  { %1854 = vpow2.f32 %v1711_v20 }
 0x220   :  { %1856 = vpow2.f32 %v1712_v21 }
 0x221   :  { %1858 = vtanh.f32 %v857_v12 }
 0x228   :  { %v1853_v27 = vpop.eup %1852 }
 0x229   :  { %v1855_v9 = vpop.eup %1854  ;;  %v862_v24 = vadd.f32 1.0, %v1853_v27 }
 0x22a   :  { %v868_v26 = vadd.f32 1.0, %v1855_v9  ;;  %v1857_v28 = vpop.eup %1856 }
 0x22b   :  { %1860 = vrcp.f32 %v862_v24  ;;  %v1859_v53 = vpop.eup %1858  ;;  %v875_v35 = vadd.f32 1.0, %v1857_v28 }
 0x22c   :  { %1862 = vrcp.f32 %v868_v26 }
 0x22d   :  { %1864 = vrcp.f32 %v875_v35 }
 0x235   :  { %v1861_v29 = vpop.eup %1860 }
 0x236   :  { %v1863_v25 = vpop.eup %1862  ;;  %v879_v11 = vmul.f32 %v1861_v29, %v1859_v53 }
 0x237   :  { %v878_v10 = vmul.f32 %v1863_v25, %v2491_v7  ;;  %v1865_v13 = vpop.eup %1864 }
 0x239   :  { %v2533_v30 = vadd.f32 %v879_v11, %v878_v10 }
 0x23b   :  { %1866 = vtanh.f32 %v2533_v30 }
 0x245   :  { %v1867_v6 = vpop.eup %1866 }
 0x246   :  { %v882_v8 = vmul.f32 %v1867_v6, %v1865_v13 }
 0x248   :  { %v883_v12 = vpack.c.bf16 %v882_v8, %v882_v8 }
 0x24a   :  { %885 = vst [vmem:[#allocation3 + $0x4] sm:$0xf] %v883_v12  ;;  %926 = vmatmul.mubr.bf16.vlgmr.msra.gmra.mrb[24].mxu0 %v883_v12  ;;  %967 = vmatmul.mubr.bf16.vlgmr.msra.gmra.mrb[24].mxu1 %v883_v12 }
 0x24b   :  { %1014 = vmatpush1.bf16.msra.mxu0 %v2174_v36  ;;  %1055 = vmatpush1.bf16.msra.mxu1 %v2179_v37 }
 0x24c   :  { %1015 = vmatprep.subr.bf16.mxu0 %v2186_v38  ;;  %1056 = vmatprep.subr.bf16.mxu1 %v2191_v39 }
 0x24d   :  { %1045 = vmatprep.mubr.bf16.mxu0 %v2929_v22  ;;  %1086 = vmatprep.mubr.bf16.mxu1 %v2929_v22 }
 0x24f   :  { %1016 = vmatpush1.bf16.msra.mxu0 %v2196_v40  ;;  %1057 = vmatpush1.bf16.msra.mxu1 %v2203_v41 }
 0x250   :  { %1017 = vmatprep.subr.bf16.mxu0 %v2210_v42  ;;  %1058 = vmatprep.subr.bf16.mxu1 %v2215_v43 }
 0x253   :  { %1018 = vmatpush1.bf16.msra.mxu0 %v2225_v45  ;;  %1059 = vmatpush1.bf16.msra.mxu1 %v2230_v46 }
 0x254   :  { %1019 = vmatprep.subr.bf16.mxu0 %v2237_v47  ;;  %1060 = vmatprep.subr.bf16.mxu1 %v2244_v48 }
 0x257   :  { %1020 = vmatpush1.bf16.msra.mxu0 %v2249_v49  ;;  %1061 = vmatpush1.bf16.msra.mxu1 %v2254_v50 }
 0x258   :  { %1021 = vmatprep.subr.bf16.mxu0 %v2261_v51  ;;  %1062 = vmatprep.subr.bf16.mxu1 %v2268_v52 }
 0x25b   :  { %1022 = vmatpush1.bf16.msra.mxu0 %v2280_v54  ;;  %1063 = vmatpush1.bf16.msra.mxu1 %v2285_v55 }
 0x25c   :  { %1023 = vmatprep.subr.bf16.mxu0 %v2292_v56  ;;  %1064 = vmatprep.subr.bf16.mxu1 %v2297_v57 }
 0x25f   :  { %1024 = vmatpush1.bf16.msra.mxu0 %v2304_v58  ;;  %1065 = vmatpush1.bf16.msra.mxu1 %v2309_v59 }
 0x260   :  { %1025 = vmatprep.subr.bf16.mxu0 %v2316_v60  ;;  %1066 = vmatprep.subr.bf16.mxu1 %v2321_v61 }
 0x263   :  { %1026 = vmatpush1.bf16.msra.mxu0 %v2333_v63  ;;  %1067 = vmatpush1.bf16.msra.mxu1 %v2338_v0 }
 0x264   :  { %1027 = vmatprep.subr.bf16.mxu0 %v2345_v1  ;;  %1068 = vmatprep.subr.bf16.mxu1 %v2350_v3 }
 0x267   :  { %1028 = vmatpush1.bf16.msra.mxu0 %v2357_v4  ;;  %1069 = vmatpush1.bf16.msra.mxu1 %v2362_v5 }
 0x268   :  { %1133 = vmatprep.subr.bf16.mxu0 %v2161_v33  ;;  %1174 = vmatprep.subr.bf16.mxu1 %v2166_v34 }
 0x31d   :  { %v927_v7 = vpop.f32.mrb[24].mxu0  ;;  %v968_v23 = vpop.f32.mrb[24].mxu1 }
 0x31e   :  { %v975_v31 = vadd.f32 %v927_v7, %v2427_v32  ;;  %v977_v15 = vadd.f32 %v968_v23, %v2430_v44  ;;  %v929_v14 = vpop.f32.mrb[25].mxu0  ;;  %v970_v16 = vpop.f32.mrb[25].mxu1 }
 0x31f   :  { %v976_v18 = vadd.f32 %v929_v14, %v2432_v62  ;;  %v978_v19 = vadd.f32 %v970_v16, %v2930_v17  ;;  %v931_v2 = vpop.f32.mrb[26].mxu0  ;;  %v972_v20 = vpop.f32.mrb[26].mxu1  ;;  %v2932_v16 = vld [vmem:[#allocation8_spill] sm:$0xff] }
 0x320   :  { %v1713_v21 = vmul.f32 -1.442695, %v975_v31  ;;  %v932_v27 = vpop.f32.mrb[27].mxu0  ;;  %v973_v9 = vpop.f32.mrb[27].mxu1  ;;  %v2933_v2 = vld [vmem:[#allocation9_spill] sm:$0xff] }
 0x321   :  { %v1714_v24 = vmul.f32 -1.442695, %v976_v18  ;;  %v1715_v26 = vmul.f32 -1.442695, %v978_v19 }
 0x322   :  { %1868 = vpow2.f32 %v1713_v21  ;;  %v2934_v21 = vld [vmem:[#allocation10_spill] sm:$0xff] }
 0x323   :  { %1870 = vpow2.f32 %v1714_v24 }
 0x324   :  { %1872 = vpow2.f32 %v1715_v26 }
 0x325   :  { %1874 = vtanh.f32 %v977_v15  ;;  %v2931_v15 = vld [vmem:[#allocation7_spill] sm:$0xff] }
 0x32c   :  { %v1869_v28 = vpop.eup %1868 }
 0x32d   :  { %v1871_v53 = vpop.eup %1870  ;;  %v982_v32 = vadd.f32 1.0, %v1869_v28 }
 0x32e   :  { %v988_v44 = vadd.f32 1.0, %v1871_v53  ;;  %v1873_v62 = vpop.eup %1872 }
 0x32f   :  { %1876 = vrcp.f32 %v982_v32  ;;  %v1875_v29 = vpop.eup %1874  ;;  %v995_v10 = vadd.f32 1.0, %v1873_v62 }
 0x330   :  { %1878 = vrcp.f32 %v988_v44 }
 0x331   :  { %1880 = vrcp.f32 %v995_v10 }
 0x339   :  { %v1877_v25 = vpop.eup %1876 }
 0x33a   :  { %v1879_v11 = vpop.eup %1878  ;;  %v999_v35 = vmul.f32 %v1877_v25, %v1875_v29 }
 0x33b   :  { %v998_v13 = vmul.f32 %v1879_v11, %v2533_v30  ;;  %v1881_v8 = vpop.eup %1880 }
 0x33d   :  { %v2575_v6 = vadd.f32 %v999_v35, %v998_v13 }
 0x33f   :  { %1882 = vtanh.f32 %v2575_v6 }
 0x349   :  { %v1883_v12 = vpop.eup %1882 }
 0x34a   :  { %v1002_v7 = vmul.f32 %v1883_v12, %v1881_v8 }
 0x34c   :  { %v1003_v23 = vpack.c.bf16 %v1002_v7, %v1002_v7 }
 0x34e   :  { %1005 = vst [vmem:[#allocation3 + $0x8] sm:$0xf] %v1003_v23  ;;  %1046 = vmatmul.mubr.bf16.vlgmr.msra.gmra.mrb[28].mxu0 %v1003_v23  ;;  %1087 = vmatmul.mubr.bf16.vlgmr.msra.gmra.mrb[28].mxu1 %v1003_v23 }
 0x34f   :  { %1134 = vmatpush1.bf16.msra.mxu0 %v2174_v36  ;;  %1175 = vmatpush1.bf16.msra.mxu1 %v2179_v37 }
 0x350   :  { %1135 = vmatprep.subr.bf16.mxu0 %v2186_v38  ;;  %1176 = vmatprep.subr.bf16.mxu1 %v2191_v39 }
 0x351   :  { %1165 = vmatprep.mubr.bf16.mxu0 %v2929_v22  ;;  %1206 = vmatprep.mubr.bf16.mxu1 %v2929_v22 }
 0x353   :  { %1136 = vmatpush1.bf16.msra.mxu0 %v2196_v40  ;;  %1177 = vmatpush1.bf16.msra.mxu1 %v2203_v41 }
 0x354   :  { %1137 = vmatprep.subr.bf16.mxu0 %v2210_v42  ;;  %1178 = vmatprep.subr.bf16.mxu1 %v2215_v43 }
 0x357   :  { %1138 = vmatpush1.bf16.msra.mxu0 %v2225_v45  ;;  %1179 = vmatpush1.bf16.msra.mxu1 %v2230_v46 }
 0x358   :  { %1139 = vmatprep.subr.bf16.mxu0 %v2237_v47  ;;  %1180 = vmatprep.subr.bf16.mxu1 %v2244_v48 }
 0x35b   :  { %1140 = vmatpush1.bf16.msra.mxu0 %v2249_v49  ;;  %1181 = vmatpush1.bf16.msra.mxu1 %v2254_v50 }
 0x35c   :  { %1141 = vmatprep.subr.bf16.mxu0 %v2261_v51  ;;  %1182 = vmatprep.subr.bf16.mxu1 %v2268_v52 }
 0x35f   :  { %1142 = vmatpush1.bf16.msra.mxu0 %v2280_v54  ;;  %1183 = vmatpush1.bf16.msra.mxu1 %v2285_v55 }
 0x360   :  { %1143 = vmatprep.subr.bf16.mxu0 %v2292_v56  ;;  %1184 = vmatprep.subr.bf16.mxu1 %v2297_v57 }
 0x363   :  { %1144 = vmatpush1.bf16.msra.mxu0 %v2304_v58  ;;  %1185 = vmatpush1.bf16.msra.mxu1 %v2309_v59 }
 0x364   :  { %1145 = vmatprep.subr.bf16.mxu0 %v2316_v60  ;;  %1186 = vmatprep.subr.bf16.mxu1 %v2321_v61 }
 0x367   :  { %1146 = vmatpush1.bf16.msra.mxu0 %v2333_v63  ;;  %1187 = vmatpush1.bf16.msra.mxu1 %v2338_v0 }
 0x368   :  { %1147 = vmatprep.subr.bf16.mxu0 %v2345_v1  ;;  %1188 = vmatprep.subr.bf16.mxu1 %v2350_v3 }
 0x36b   :  { %1148 = vmatpush1.bf16.msra.mxu0 %v2357_v4  ;;  %1189 = vmatpush1.bf16.msra.mxu1 %v2362_v5 }
 0x36c   :  { %1253 = vmatprep.subr.bf16.mxu0 %v2161_v33  ;;  %1294 = vmatprep.subr.bf16.mxu1 %v2166_v34 }
 0x421   :  { %v1047_v30 = vpop.f32.mrb[28].mxu0  ;;  %v1088_v31 = vpop.f32.mrb[28].mxu1 }
 0x422   :  { %v1095_v14 = vadd.f32 %v1047_v30, %v2931_v15  ;;  %v1097_v18 = vadd.f32 %v1088_v31, %v2932_v16  ;;  %v1049_v17 = vpop.f32.mrb[29].mxu0  ;;  %v1090_v19 = vpop.f32.mrb[29].mxu1 }
 0x423   :  { %v1096_v20 = vadd.f32 %v1049_v17, %v2933_v2  ;;  %v1098_v27 = vadd.f32 %v1090_v19, %v2934_v21  ;;  %v1051_v9 = vpop.f32.mrb[30].mxu0  ;;  %v1092_v24 = vpop.f32.mrb[30].mxu1 }
 0x424   :  { %v1716_v26 = vmul.f32 -1.442695, %v1095_v14  ;;  %v1052_v28 = vpop.f32.mrb[31].mxu0  ;;  %v1093_v53 = vpop.f32.mrb[31].mxu1 }
 0x425   :  { %v1717_v33 = vmul.f32 -1.442695, %v1096_v20  ;;  %v1718_v34 = vmul.f32 -1.442695, %v1098_v27 }
 0x426   :  { %1884 = vpow2.f32 %v1716_v26 }
 0x427   :  { %1886 = vpow2.f32 %v1717_v33  ;;  %v2675_v33 = vld [vmem:[%s2901_s2] ss:$16 sps:$4 sm:$0xff]  }
 0x428   :  { %1888 = vpow2.f32 %v1718_v34  ;;  %v2681_v34 = vld [vmem:[%s2901_s2 + $0x8] ss:$16 sps:$4 sm:$0xff]  }
 0x429   :  { %1890 = vtanh.f32 %v1097_v18 }
 0x430   :  { %v1885_v32 = vpop.eup %1884 }
 0x431   :  { %v1887_v44 = vpop.eup %1886  ;;  %v1102_v62 = vadd.f32 1.0, %v1885_v32  ;;  %v2687_v32 = vld [vmem:[%s2901_s2 + $0x24] ss:$16 sps:$4 sm:$0xff]  }
 0x432   :  { %v1108_v29 = vadd.f32 1.0, %v1887_v44  ;;  %v1889_v25 = vpop.eup %1888  ;;  %v2693_v44 = vld [vmem:[%s2901_s2 + $0x2c] ss:$16 sps:$4 sm:$0xff]  }
 0x433   :  { %1892 = vrcp.f32 %v1102_v62  ;;  %v1891_v11 = vpop.eup %1890  ;;  %v1115_v8 = vadd.f32 1.0, %v1889_v25  ;;  %v2701_v62 = vld [vmem:[%s2901_s2 + $0x20] ss:$16 sps:$4 sm:$0xff]   ;;  %v2713_v25 = vld [vmem:[%s2901_s2 + $0x44] ss:$16 sps:$4 sm:$0xff]  }
 0x434   :  { %1894 = vrcp.f32 %v1108_v29  ;;  %v2707_v29 = vld [vmem:[%s2901_s2 + $0x28] ss:$16 sps:$4 sm:$0xff]  }
 0x435   :  { %1896 = vrcp.f32 %v1115_v8  ;;  %v2743_v8 = vld [vmem:[%s2901_s2 + $0x6c] ss:$16 sps:$4 sm:$0xff]  }
 0x43d   :  { %v1893_v35 = vpop.eup %1892 }
 0x43e   :  { %v1895_v10 = vpop.eup %1894  ;;  %v1119_v13 = vmul.f32 %v1893_v35, %v1891_v11  ;;  %v2719_v11 = vld [vmem:[%s2901_s2 + $0x4c] ss:$16 sps:$4 sm:$0xff]   ;;  %v2725_v35 = vld [vmem:[%s2901_s2 + $0x40] ss:$16 sps:$4 sm:$0xff]  }
 0x43f   :  { %v1118_v12 = vmul.f32 %v1895_v10, %v2575_v6  ;;  %v1897_v23 = vpop.eup %1896  ;;  %v2731_v10 = vld [vmem:[%s2901_s2 + $0x48] ss:$16 sps:$4 sm:$0xff]  }
 0x441   :  { %v2617_v7 = vadd.f32 %v1119_v13, %v1118_v12  ;;  %v2737_v13 = vld [vmem:[%s2901_s2 + $0x64] ss:$16 sps:$4 sm:$0xff]   ;;  %v2749_v12 = vld [vmem:[%s2901_s2 + $0x60] ss:$16 sps:$4 sm:$0xff]  }
 0x443   :  { %1898 = vtanh.f32 %v2617_v7 }
 0x44d   :  { %v1899_v30 = vpop.eup %1898 }
 0x44e   :  { %v1122_v31 = vmul.f32 %v1899_v30, %v1897_v23  ;;  %v2761_v23 = vld [vmem:[%s2901_s2 + $0x84] ss:$16 sps:$4 sm:$0xff]   ;;  %v2767_v30 = vld [vmem:[%s2901_s2 + $0x8c] ss:$16 sps:$4 sm:$0xff]  }
 0x450   :  { %v1123_v15 = vpack.c.bf16 %v1122_v31, %v1122_v31  ;;  %v2773_v31 = vld [vmem:[%s2901_s2 + $0x80] ss:$16 sps:$4 sm:$0xff]  }
 0x452   :  { %1125 = vst [vmem:[#allocation3 + $0xc] sm:$0xf] %v1123_v15  ;;  %1166 = vmatmul.mubr.bf16.vlgmr.msra.gmra.mrb[32].mxu0 %v1123_v15  ;;  %1207 = vmatmul.mubr.bf16.vlgmr.msra.gmra.mrb[32].mxu1 %v1123_v15  ;;  %v2779_v15 = vld [vmem:[%s2901_s2 + $0x88] ss:$16 sps:$4 sm:$0xff]  }
 0x453   :  { %1254 = vmatpush1.bf16.msra.mxu0 %v2174_v36  ;;  %1295 = vmatpush1.bf16.msra.mxu1 %v2179_v37  ;;  %v2655_v36 = vld [vmem:[%s2901_s2 + $0x4] ss:$16 sps:$4 sm:$0xff]   ;;  %v2661_v37 = vld [vmem:[%s2901_s2 + $0xc] ss:$16 sps:$4 sm:$0xff]  }
 0x454   :  { %1255 = vmatprep.subr.bf16.mxu0 %v2186_v38  ;;  %1296 = vmatprep.subr.bf16.mxu1 %v2191_v39 }
 0x455   :  { %1285 = vmatprep.mubr.bf16.mxu0 %v2929_v22  ;;  %1326 = vmatprep.mubr.bf16.mxu1 %v2929_v22 }
 0x457   :  { %1256 = vmatpush1.bf16.msra.mxu0 %v2196_v40  ;;  %1297 = vmatpush1.bf16.msra.mxu1 %v2203_v41  ;;  %v2935_v40 = vld [vmem:[#allocation11_spill] sm:$0xff] }
 0x458   :  { %1257 = vmatprep.subr.bf16.mxu0 %v2210_v42  ;;  %1298 = vmatprep.subr.bf16.mxu1 %v2215_v43  ;;  %v2936_v42 = vld [vmem:[#allocation12_spill] sm:$0xff] }
 0x45b   :  { %1258 = vmatpush1.bf16.msra.mxu0 %v2225_v45  ;;  %1299 = vmatpush1.bf16.msra.mxu1 %v2230_v46 }
 0x45c   :  { %1259 = vmatprep.subr.bf16.mxu0 %v2237_v47  ;;  %1300 = vmatprep.subr.bf16.mxu1 %v2244_v48  ;;  %v2937_v47 = vld [vmem:[#allocation13_spill] sm:$0xff] }
 0x45f   :  { %1260 = vmatpush1.bf16.msra.mxu0 %v2249_v49  ;;  %1301 = vmatpush1.bf16.msra.mxu1 %v2254_v50  ;;  %v2938_v49 = vld [vmem:[#allocation14_spill] sm:$0xff] }
 0x460   :  { %1261 = vmatprep.subr.bf16.mxu0 %v2261_v51  ;;  %1302 = vmatprep.subr.bf16.mxu1 %v2268_v52 }
 0x463   :  { %1262 = vmatpush1.bf16.msra.mxu0 %v2280_v54  ;;  %1303 = vmatpush1.bf16.msra.mxu1 %v2285_v55 }
 0x464   :  { %1263 = vmatprep.subr.bf16.mxu0 %v2292_v56  ;;  %1304 = vmatprep.subr.bf16.mxu1 %v2297_v57 }
 0x467   :  { %1264 = vmatpush1.bf16.msra.mxu0 %v2304_v58  ;;  %1305 = vmatpush1.bf16.msra.mxu1 %v2309_v59 }
 0x468   :  { %1265 = vmatprep.subr.bf16.mxu0 %v2316_v60  ;;  %1306 = vmatprep.subr.bf16.mxu1 %v2321_v61 }
 0x46b   :  { %1266 = vmatpush1.bf16.msra.mxu0 %v2333_v63  ;;  %1307 = vmatpush1.bf16.msra.mxu1 %v2338_v0 }
 0x46c   :  { %1267 = vmatprep.subr.bf16.mxu0 %v2345_v1  ;;  %1308 = vmatprep.subr.bf16.mxu1 %v2350_v3 }
 0x46f   :  { %1268 = vmatpush1.bf16.msra.mxu0 %v2357_v4  ;;  %1309 = vmatpush1.bf16.msra.mxu1 %v2362_v5 }
 0x470   :  { %1373 = vmatprep.subr.bf16.mxu0 %v2655_v36  ;;  %1414 = vmatprep.subr.bf16.mxu1 %v2661_v37 }
 0x525   :  { %v1167_v38 = vpop.f32.mrb[32].mxu0  ;;  %v1208_v39 = vpop.f32.mrb[32].mxu1 }
 0x526   :  { %v1215_v41 = vadd.f32 %v1167_v38, %v2935_v40  ;;  %v1217_v43 = vadd.f32 %v1208_v39, %v2936_v42  ;;  %v1169_v45 = vpop.f32.mrb[33].mxu0  ;;  %v1210_v46 = vpop.f32.mrb[33].mxu1  ;;  %v2785_v38 = vld [vmem:[%s2901_s2 + $0xa4] ss:$16 sps:$4 sm:$0xff]   ;;  %v2791_v39 = vld [vmem:[%s2901_s2 + $0xac] ss:$16 sps:$4 sm:$0xff]  }
 0x527   :  { %v1216_v48 = vadd.f32 %v1169_v45, %v2937_v47  ;;  %v1218_v50 = vadd.f32 %v1210_v46, %v2938_v49  ;;  %v1171_v51 = vpop.f32.mrb[34].mxu0  ;;  %v1212_v52 = vpop.f32.mrb[34].mxu1  ;;  %v2797_v40 = vld [vmem:[%s2901_s2 + $0xa0] ss:$16 sps:$4 sm:$0xff]   ;;  %v2941_v47 = vld [vmem:[#allocation17_spill] sm:$0xff] }
 0x528   :  { %v1719_v54 = vmul.f32 -1.442695, %v1215_v41  ;;  %v1172_v55 = vpop.f32.mrb[35].mxu0  ;;  %v1213_v56 = vpop.f32.mrb[35].mxu1  ;;  %v2803_v41 = vld [vmem:[%s2901_s2 + $0xa8] ss:$16 sps:$4 sm:$0xff]  }
 0x529   :  { %v1720_v57 = vmul.f32 -1.442695, %v1216_v48  ;;  %v1721_v58 = vmul.f32 -1.442695, %v1218_v50  ;;  %v2940_v45 = vld [vmem:[#allocation16_spill] sm:$0xff]  ;;  %v2942_v48 = vld [vmem:[#allocation18_spill] sm:$0xff] }
 0x52a   :  { %1900 = vpow2.f32 %v1719_v54 }
 0x52b   :  { %1902 = vpow2.f32 %v1720_v57 }
 0x52c   :  { %1904 = vpow2.f32 %v1721_v58 }
 0x52d   :  { %1906 = vtanh.f32 %v1217_v43  ;;  %v2939_v43 = vld [vmem:[#allocation15_spill] sm:$0xff] }
 0x534   :  { %v1901_v59 = vpop.eup %1900 }
 0x535   :  { %v1903_v6 = vpop.eup %1902  ;;  %v1222_v14 = vadd.f32 1.0, %v1901_v59 }
 0x536   :  { %v1228_v16 = vadd.f32 1.0, %v1903_v6  ;;  %v1905_v18 = vpop.eup %1904 }
 0x537   :  { %1908 = vrcp.f32 %v1222_v14  ;;  %v1907_v17 = vpop.eup %1906  ;;  %v1235_v21 = vadd.f32 1.0, %v1905_v18 }
 0x538   :  { %1910 = vrcp.f32 %v1228_v16 }
 0x539   :  { %1912 = vrcp.f32 %v1235_v21 }
 0x541   :  { %v1909_v19 = vpop.eup %1908 }
 0x542   :  { %v1911_v2 = vpop.eup %1910  ;;  %v1239_v20 = vmul.f32 %v1909_v19, %v1907_v17 }
 0x543   :  { %v1238_v27 = vmul.f32 %v1911_v2, %v2617_v7  ;;  %v1913_v24 = vpop.eup %1912  ;;  %v2755_v7 = vld [vmem:[%s2901_s2 + $0x68] ss:$16 sps:$4 sm:$0xff]  }
 0x545   :  { %v2669_v9 = vadd.f32 %v1239_v20, %v1238_v27  ;;  %v1989_v27 = vld [vmem:[%s2901_s2 + $0xcc] ss:$16 sps:$4 sm:$0xff]  }
 0x547   :  { %1914 = vtanh.f32 %v2669_v9 }
 0x551   :  { %v1915_v26 = vpop.eup %1914 }
 0x552   :  { %v1242_v28 = vmul.f32 %v1915_v26, %v1913_v24  ;;  %v1991_v24 = vld [vmem:[%s2901_s2 + $0xc8] ss:$16 sps:$4 sm:$0xff]   ;;  %v1992_v26 = vld [vmem:[%s2901_s2 + $0xe4] ss:$16 sps:$4 sm:$0xff]  }
 0x554   :  { %v1243_v53 = vpack.c.bf16 %v1242_v28, %v1242_v28  ;;  %v1993_v28 = vld [vmem:[%s2901_s2 + $0xec] ss:$16 sps:$4 sm:$0xff]  }
 0x556   :  { %1245 = vst [vmem:[#allocation3 + $0x10] sm:$0xf] %v1243_v53  ;;  %1286 = vmatmul.mubr.bf16.vlgmr.msra.gmra.mrb[36].mxu0 %v1243_v53  ;;  %1327 = vmatmul.mubr.bf16.vlgmr.msra.gmra.mrb[36].mxu1 %v1243_v53  ;;  %v1994_v53 = vld [vmem:[%s2901_s2 + $0xe0] ss:$16 sps:$4 sm:$0xff]  }
 0x557   :  { %1374 = vmatpush1.bf16.msra.mxu0 %v2675_v33  ;;  %1415 = vmatpush1.bf16.msra.mxu1 %v2681_v34 }
 0x558   :  { %1375 = vmatprep.subr.bf16.mxu0 %v2687_v32  ;;  %1416 = vmatprep.subr.bf16.mxu1 %v2693_v44 }
 0x559   :  { %1405 = vmatprep.mubr.bf16.mxu0 %v2929_v22  ;;  %1446 = vmatprep.mubr.bf16.mxu1 %v2929_v22 }
 0x55b   :  { %1376 = vmatpush1.bf16.msra.mxu0 %v2701_v62  ;;  %1417 = vmatpush1.bf16.msra.mxu1 %v2707_v29 }
 0x55c   :  { %1377 = vmatprep.subr.bf16.mxu0 %v2713_v25  ;;  %1418 = vmatprep.subr.bf16.mxu1 %v2719_v11 }
 0x55f   :  { %1378 = vmatpush1.bf16.msra.mxu0 %v2725_v35  ;;  %1419 = vmatpush1.bf16.msra.mxu1 %v2731_v10 }
 0x560   :  { %1379 = vmatprep.subr.bf16.mxu0 %v2737_v13  ;;  %1420 = vmatprep.subr.bf16.mxu1 %v2743_v8 }
 0x563   :  { %1380 = vmatpush1.bf16.msra.mxu0 %v2749_v12  ;;  %1421 = vmatpush1.bf16.msra.mxu1 %v2755_v7 }
 0x564   :  { %1381 = vmatprep.subr.bf16.mxu0 %v2761_v23  ;;  %1422 = vmatprep.subr.bf16.mxu1 %v2767_v30 }
 0x567   :  { %1382 = vmatpush1.bf16.msra.mxu0 %v2773_v31  ;;  %1423 = vmatpush1.bf16.msra.mxu1 %v2779_v15 }
 0x568   :  { %1383 = vmatprep.subr.bf16.mxu0 %v2785_v38  ;;  %1424 = vmatprep.subr.bf16.mxu1 %v2791_v39 }
 0x56b   :  { %1384 = vmatpush1.bf16.msra.mxu0 %v2797_v40  ;;  %1425 = vmatpush1.bf16.msra.mxu1 %v2803_v41 }
 0x56c   :  { %1385 = vmatprep.subr.bf16.mxu0 %v2316_v60  ;;  %1426 = vmatprep.subr.bf16.mxu1 %v2321_v61 }
 0x56f   :  { %1386 = vmatpush1.bf16.msra.mxu0 %v2333_v63  ;;  %1427 = vmatpush1.bf16.msra.mxu1 %v2338_v0 }
 0x570   :  { %1387 = vmatprep.subr.bf16.mxu0 %v2345_v1  ;;  %1428 = vmatprep.subr.bf16.mxu1 %v2350_v3 }
 0x573   :  { %1388 = vmatpush1.bf16.msra.mxu0 %v2357_v4  ;;  %1429 = vmatpush1.bf16.msra.mxu1 %v2362_v5 }
 0x574   :  { %1493 = vmatprep.subr.bf16.mxu0 %v2655_v36  ;;  %1534 = vmatprep.subr.bf16.mxu1 %v2661_v37 }
 0x629   :  { %v1287_v42 = vpop.f32.mrb[36].mxu0  ;;  %v1328_v60 = vpop.f32.mrb[36].mxu1 }
 0x62a   :  { %v1335_v61 = vadd.f32 %v1287_v42, %v2939_v43  ;;  %v1337_v63 = vadd.f32 %v1328_v60, %v2940_v45  ;;  %v1289_v46 = vpop.f32.mrb[37].mxu0  ;;  %v1330_v0 = vpop.f32.mrb[37].mxu1 }
 0x62b   :  { %v1336_v1 = vadd.f32 %v1289_v46, %v2941_v47  ;;  %v1338_v3 = vadd.f32 %v1330_v0, %v2942_v48  ;;  %v1291_v49 = vpop.f32.mrb[38].mxu0  ;;  %v1332_v4 = vpop.f32.mrb[38].mxu1 }
 0x62c   :  { %v1722_v50 = vmul.f32 -1.442695, %v1335_v61  ;;  %v1292_v5 = vpop.f32.mrb[39].mxu0  ;;  %v1333_v51 = vpop.f32.mrb[39].mxu1 }
 0x62d   :  { %v1723_v36 = vmul.f32 -1.442695, %v1336_v1  ;;  %v1724_v37 = vmul.f32 -1.442695, %v1338_v3  ;;  %v2947_v51 = vld [vmem:[#allocation23_spill] sm:$0xff] }
 0x62e   :  { %1916 = vpow2.f32 %v1722_v50 }
 0x62f   :  { %1918 = vpow2.f32 %v1723_v36 }
 0x630   :  { %1920 = vpow2.f32 %v1724_v37  ;;  %v2948_v37 = vld [vmem:[#allocation24_spill] sm:$0xff] }
 0x631   :  { %1922 = vtanh.f32 %v1337_v63 }
 0x638   :  { %v1917_v52 = vpop.eup %1916 }
 0x639   :  { %v1919_v54 = vpop.eup %1918  ;;  %v1342_v55 = vadd.f32 1.0, %v1917_v52 }
 0x63a   :  { %v1348_v56 = vadd.f32 1.0, %v1919_v54  ;;  %v1921_v57 = vpop.eup %1920 }
 0x63b   :  { %1924 = vrcp.f32 %v1342_v55  ;;  %v1923_v58 = vpop.eup %1922  ;;  %v1355_v16 = vadd.f32 1.0, %v1921_v57 }
 0x63c   :  { %1926 = vrcp.f32 %v1348_v56  ;;  %v2949_v56 = vld [vmem:[#allocation25_spill] sm:$0xff] }
 0x63d   :  { %1928 = vrcp.f32 %v1355_v16 }
 0x645   :  { %v1925_v59 = vpop.eup %1924 }
 0x646   :  { %v1927_v6 = vpop.eup %1926  ;;  %v1359_v14 = vmul.f32 %v1925_v59, %v1923_v58  ;;  %v2950_v58 = vld [vmem:[#allocation26_spill] sm:$0xff] }
 0x647   :  { %v1358_v18 = vmul.f32 %v1927_v6, %v2669_v9  ;;  %v1929_v19 = vpop.eup %1928  ;;  %v1990_v9 = vld [vmem:[%s2901_s2 + $0xc0] ss:$16 sps:$4 sm:$0xff]  }
 0x649   :  { %v2821_v17 = vadd.f32 %v1359_v14, %v1358_v18 }
 0x64b   :  { %1930 = vtanh.f32 %v2821_v17 }
 0x655   :  { %v1931_v2 = vpop.eup %1930 }
 0x656   :  { %v1362_v20 = vmul.f32 %v1931_v2, %v1929_v19 }
 0x658   :  { %v1363_v21 = vpack.c.bf16 %v1362_v20, %v1362_v20 }
 0x65a   :  { %1365 = vst [vmem:[#allocation3 + $0x14] sm:$0xf] %v1363_v21  ;;  %1406 = vmatmul.mubr.bf16.vlgmr.msra.gmra.mrb[40].mxu0 %v1363_v21  ;;  %1447 = vmatmul.mubr.bf16.vlgmr.msra.gmra.mrb[40].mxu1 %v1363_v21 }
 0x65b   :  { %1494 = vmatpush1.bf16.msra.mxu0 %v2675_v33  ;;  %1535 = vmatpush1.bf16.msra.mxu1 %v2681_v34  ;;  %v1995_v33 = vld [vmem:[%s2901_s2 + $0xe8] ss:$16 sps:$4 sm:$0xff]  }
 0x65c   :  { %1495 = vmatprep.subr.bf16.mxu0 %v2687_v32  ;;  %1536 = vmatprep.subr.bf16.mxu1 %v2693_v44  ;;  %v2943_v44 = vld [vmem:[#allocation19_spill] sm:$0xff] }
 0x65d   :  { %1525 = vmatprep.mubr.bf16.mxu0 %v2929_v22  ;;  %1566 = vmatprep.mubr.bf16.mxu1 %v2929_v22  ;;  %v1988_v22 = vld [vmem:[%s2901_s2 + $0xc4] ss:$16 sps:$4 sm:$0xff]  }
 0x65f   :  { %1496 = vmatpush1.bf16.msra.mxu0 %v2701_v62  ;;  %1537 = vmatpush1.bf16.msra.mxu1 %v2707_v29  ;;  %v2944_v29 = vld [vmem:[#allocation20_spill] sm:$0xff] }
 0x660   :  { %1497 = vmatprep.subr.bf16.mxu0 %v2713_v25  ;;  %1538 = vmatprep.subr.bf16.mxu1 %v2719_v11 }
 0x663   :  { %1498 = vmatpush1.bf16.msra.mxu0 %v2725_v35  ;;  %1539 = vmatpush1.bf16.msra.mxu1 %v2731_v10  ;;  %v2945_v10 = vld [vmem:[#allocation21_spill] sm:$0xff] }
 0x664   :  { %1499 = vmatprep.subr.bf16.mxu0 %v2737_v13  ;;  %1540 = vmatprep.subr.bf16.mxu1 %v2743_v8  ;;  %v2946_v8 = vld [vmem:[#allocation22_spill] sm:$0xff] }
 0x667   :  { %1500 = vmatpush1.bf16.msra.mxu0 %v2749_v12  ;;  %1541 = vmatpush1.bf16.msra.mxu1 %v2755_v7 }
 0x668   :  { %1501 = vmatprep.subr.bf16.mxu0 %v2761_v23  ;;  %1542 = vmatprep.subr.bf16.mxu1 %v2767_v30 }
 0x66b   :  { %1502 = vmatpush1.bf16.msra.mxu0 %v2773_v31  ;;  %1543 = vmatpush1.bf16.msra.mxu1 %v2779_v15 }
 0x66c   :  { %1503 = vmatprep.subr.bf16.mxu0 %v2785_v38  ;;  %1544 = vmatprep.subr.bf16.mxu1 %v2791_v39 }
 0x66f   :  { %1504 = vmatpush1.bf16.msra.mxu0 %v2797_v40  ;;  %1545 = vmatpush1.bf16.msra.mxu1 %v2803_v41 }
 0x670   :  { %1505 = vmatprep.subr.bf16.mxu0 %v1988_v22  ;;  %1546 = vmatprep.subr.bf16.mxu1 %v1989_v27 }
 0x673   :  { %1506 = vmatpush1.bf16.msra.mxu0 %v1990_v9  ;;  %1547 = vmatpush1.bf16.msra.mxu1 %v1991_v24 }
 0x674   :  { %1507 = vmatprep.subr.bf16.mxu0 %v1992_v26  ;;  %1548 = vmatprep.subr.bf16.mxu1 %v1993_v28 }
 0x677   :  { %1508 = vmatpush1.bf16.msra.mxu0 %v1994_v53  ;;  %1549 = vmatpush1.bf16.msra.mxu1 %v1995_v33 }
 0x72d   :  { %v1407_v34 = vpop.f32.mrb[40].mxu0  ;;  %v1448_v32 = vpop.f32.mrb[40].mxu1 }
 0x72e   :  { %v1455_v62 = vadd.f32 %v1407_v34, %v2943_v44  ;;  %v1457_v25 = vadd.f32 %v1448_v32, %v2944_v29  ;;  %v1409_v11 = vpop.f32.mrb[41].mxu0  ;;  %v1450_v35 = vpop.f32.mrb[41].mxu1 }
 0x72f   :  { %v1456_v13 = vadd.f32 %v1409_v11, %v2945_v10  ;;  %v1458_v12 = vadd.f32 %v1450_v35, %v2946_v8  ;;  %v1411_v7 = vpop.f32.mrb[42].mxu0  ;;  %v1452_v23 = vpop.f32.mrb[42].mxu1 }
 0x730   :  { %v1725_v30 = vmul.f32 -1.442695, %v1455_v62  ;;  %v1412_v31 = vpop.f32.mrb[43].mxu0  ;;  %v1453_v15 = vpop.f32.mrb[43].mxu1 }
 0x731   :  { %v1726_v38 = vmul.f32 -1.442695, %v1456_v13  ;;  %v1727_v39 = vmul.f32 -1.442695, %v1458_v12 }
 0x732   :  { %1932 = vpow2.f32 %v1725_v30 }
 0x733   :  { %1934 = vpow2.f32 %v1726_v38 }
 0x734   :  { %1936 = vpow2.f32 %v1727_v39 }
 0x735   :  { %1938 = vtanh.f32 %v1457_v25 }
 0x73c   :  { %v1933_v40 = vpop.eup %1932 }
 0x73d   :  { %v1935_v41 = vpop.eup %1934  ;;  %v1462_v42 = vadd.f32 1.0, %v1933_v40 }
 0x73e   :  { %v1468_v60 = vadd.f32 1.0, %v1935_v41  ;;  %v1937_v43 = vpop.eup %1936 }
 0x73f   :  { %1940 = vrcp.f32 %v1462_v42  ;;  %v1939_v61 = vpop.eup %1938  ;;  %v1475_v0 = vadd.f32 1.0, %v1937_v43 }
 0x740   :  { %1942 = vrcp.f32 %v1468_v60 }
 0x741   :  { %1944 = vrcp.f32 %v1475_v0 }
 0x749   :  { %v1941_v45 = vpop.eup %1940 }
 0x74a   :  { %v1943_v63 = vpop.eup %1942  ;;  %v1479_v46 = vmul.f32 %v1941_v45, %v1939_v61 }
 0x74b   :  { %v1478_v47 = vmul.f32 %v1943_v63, %v2821_v17  ;;  %v1945_v48 = vpop.eup %1944 }
 0x74d   :  { %v1480_v1 = vadd.f32 %v1479_v46, %v1478_v47 }
 0x74f   :  { %1946 = vtanh.f32 %v1480_v1 }
 0x759   :  { %v1947_v3 = vpop.eup %1946 }
 0x75a   :  { %v1482_v49 = vmul.f32 %v1947_v3, %v1945_v48 }
 0x75c   :  { %v1483_v4 = vpack.c.bf16 %v1482_v49, %v1482_v49 }
 0x75e   :  { %1485 = vst [vmem:[#allocation3 + $0x18] sm:$0xf] %v1483_v4  ;;  %1526 = vmatmul.mubr.bf16.vlgmr.msra.gmra.mrb[44].mxu0 %v1483_v4  ;;  %1567 = vmatmul.mubr.bf16.vlgmr.msra.gmra.mrb[44].mxu1 %v1483_v4 }
 0x831   :  { %v1527_v50 = vpop.f32.mrb[44].mxu0  ;;  %v1568_v5 = vpop.f32.mrb[44].mxu1 }
 0x832   :  { %v1575_v36 = vadd.f32 %v1527_v50, %v2947_v51  ;;  %v1577_v52 = vadd.f32 %v1568_v5, %v2948_v37  ;;  %v1529_v54 = vpop.f32.mrb[45].mxu0  ;;  %v1570_v55 = vpop.f32.mrb[45].mxu1 }
 0x833   :  { %v1576_v57 = vadd.f32 %v1529_v54, %v2949_v56  ;;  %v1578_v59 = vadd.f32 %v1570_v55, %v2950_v58  ;;  %v1531_v6 = vpop.f32.mrb[46].mxu0  ;;  %v1572_v14 = vpop.f32.mrb[46].mxu1 }
 0x834   :  { %v1728_v16 = vmul.f32 -1.442695, %v1575_v36  ;;  %v1532_v18 = vpop.f32.mrb[47].mxu0  ;;  %v1573_v17 = vpop.f32.mrb[47].mxu1 }
 0x835   :  { %v1729_v19 = vmul.f32 -1.442695, %v1576_v57  ;;  %v1730_v2 = vmul.f32 -1.442695, %v1578_v59 }
 0x836   :  { %1948 = vpow2.f32 %v1728_v16 }
 0x837   :  { %1950 = vpow2.f32 %v1729_v19 }
 0x838   :  { %1952 = vpow2.f32 %v1730_v2 }
 0x839   :  { %1954 = vtanh.f32 %v1577_v52 }
 0x840   :  { %v1949_v20 = vpop.eup %1948 }
 0x841   :  { %v1951_v21 = vpop.eup %1950  ;;  %v1582_v22 = vadd.f32 1.0, %v1949_v20 }
 0x842   :  { %v1588_v27 = vadd.f32 1.0, %v1951_v21  ;;  %v1953_v9 = vpop.eup %1952 }
 0x843   :  { %1956 = vrcp.f32 %v1582_v22  ;;  %v1955_v24 = vpop.eup %1954  ;;  %v1595_v33 = vadd.f32 1.0, %v1953_v9 }
 0x844   :  { %1958 = vrcp.f32 %v1588_v27 }
 0x845   :  { %1960 = vrcp.f32 %v1595_v33 }
 0x84d   :  { %v1957_v26 = vpop.eup %1956 }
 0x84e   :  { %v1959_v28 = vpop.eup %1958  ;;  %v1599_v53 = vmul.f32 %v1957_v26, %v1955_v24 }
 0x84f   :  { %v1598_v34 = vmul.f32 %v1959_v28, %v1480_v1  ;;  %v1961_v44 = vpop.eup %1960 }
 0x851   :  { %v1600_v32 = vadd.f32 %v1599_v53, %v1598_v34 }
 0x853   :  { %1962 = vtanh.f32 %v1600_v32  ;;  %1607 = vst [vmem:[%s2905_s6] sm:$0xff] %v1600_v32 }
 0x85d   :  { %v1963_v62 = vpop.eup %1962 }
 0x85e   :  { %v1602_v29 = vmul.f32 %v1963_v62, %v1961_v44 }
 0x860   :  { %v1603_v25 = vpack.c.bf16 %v1602_v29, %v1602_v29  ;;  %1606 = vst [vmem:[%s2904_s5] sm:$0xff] %v1602_v29 }
 0x862   :  { %1605 = vst [vmem:[#allocation3 + $0x1c] sm:$0xf] %v1603_v25 }
 0x863   :  { %2007 = shalt.err (!%p2004_p4)
}
 0x864   :  { %s2008_s26 = scalar_lea.hbm %s2903_s4, 512 }
 0x865   :  { %p2009_p5 = scmp.ne.s32.totalorder %s2903_s4, %s2008_s26  ;;  %p2012_p6 = scmp.lt.u32.totalorder %s2008_s26, %s2903_s4 }
 0x867   :  { %p2014_p7 = pnand %p2012_p6, %p2009_p5 }
 0x869   :  { %2017 = shalt.err (!%p2014_p7)
}
 0x86a   :  { %s2023_s5 = smov 64   ;;  %s2024_s30 = smov 4  }
 0x86b   :  { %1619 = dma.vmem_to_hbm [thread:$0]  %s1614_s21, 512, %s2903_s4, [#allocation4], %s2023_s5, %s2023_s5, %s2024_s30  }
 0x86c   :  { %2018 = dma.done.wait [#allocation4], 512  }
 0x86d   :  { %2019 = vsyncadd [#allocation4], 4294966784 }
 0x86e   :  { %1631 = vsyncpa [#allocation4], 1 }

// kernel: encoder_forward.2
= control target key start
LH: loop header
LB: loop body
LE: loop exit
PB: predicated region body
PF: predicated region fallthrough
CT: control target
= control target key end

     0   :  { %12 = vsyncpa [#allocation4], 0  ;;  %s2029_s21 = smov [#allocation3]   ;;  %s2740_s0 = inlined_call_operand.vmem [shape: bf16[8,8,128], index: 0, kind: input, shape index: {}]   ;;  %s2741_s1 = inlined_call_operand.vmem [shape: bf16[128,512], index: 1, kind: input, shape index: {}]   ;;  %s2742_s2 = inlined_call_operand.hbm [shape: bf16[128,512], index: 2, kind: input, shape index: {}]   ;;  %s2743_s3 = inlined_call_operand.vmem [shape: f32[1,512], index: 3, kind: input, shape index: {}]   ;;  %s2744_s4 = inlined_call_operand.vmem [shape: bf16[8,8,128], index: 4, kind: output, shape index: {0}]   ;;  %s2745_s5 = inlined_call_operand.vmem [shape: f32[8,128], index: 5, kind: output, shape index: {1}]   ;;  %s2746_s6 = inlined_call_operand.vmem [shape: f32[8,128], index: 6, kind: output, shape index: {2}]  }
   0x1   :  { %s22_s22 = sshll.u32 %s2029_s21, 4  ;;  %s2005_s25 = scalar_lea.hbm %s2742_s2, 4096  ;;  %s23_s22 = int_to_ptr.vmem [resolvable:$true] %s22_s22 }
   0x2   :  { %p2006_p0 = scmp.ne.s32.totalorder %s2742_s2, %s2005_s25  ;;  %p2009_p1 = scmp.lt.u32.totalorder %s2005_s25, %s2742_s2 }
   0x4   :  { %p2011_p2 = pnand %p2009_p1, %p2006_p0 }
   0x6   :  { %2014 = shalt.err (!%p2011_p2)
}
   0x7   :  { %s2015_s30 = scalar_lea.vmem %s23_s22, 4096  ;;  %p2020_p4 = scmp.lt.s32.totalorder %s23_s22, %s23_s22 }
   0x8   :  { %p2016_p3 = scmp.ne.s32.totalorder %s23_s22, %s2015_s30  ;;  %p2021_p5 = scmp.lt.s32.totalorder %s2015_s30, %s2015_s30 }
   0xa   :  { %p2022_p6 = por %p2021_p5, %p2020_p4 }
   0xc   :  { %p2023_p7 = pnand %p2022_p6, %p2016_p3 }
   0xe   :  { %2026 = shalt.err (!%p2023_p7)
}
   0xf   :  { %s2030_s7 = smov 256   ;;  %s2031_s8 = smov 16  }
  0x10   :  { %28 = dma.hbm_to_vmem [thread:$0]  %s2742_s2, 4096, %s23_s22, [#allocation4], %s2030_s7, %s2030_s7, %s2031_s8  }
  0x11   :  { %2027 = dma.done.wait [#allocation4], 4096  }
  0x12   :  { %2028 = vsyncadd [#allocation4], 4294963200  ;;  %v2747_v0 = vmov 0   ;;  %v1745_v1 = vld [vmem:[%s2741_s1 + $0x4] ss:$16 sps:$4 sm:$0xff]   ;;  %v1806_v44 = vld [vmem:[%s2740_s0 + $0x8] sm:$0xff]  }
  0x13   :  { %319 = vmatprep.mubr.bf16.mxu0 %v2747_v0  ;;  %392 = vmatprep.mubr.bf16.mxu1 %v2747_v0  ;;  %v1747_v2 = vld [vmem:[%s2741_s1 + $0xc] ss:$16 sps:$4 sm:$0xff]   ;;  %v1749_v3 = vld [vmem:[%s2741_s1] ss:$16 sps:$4 sm:$0xff]   ;;  %v1750_v4 = vld [vmem:[%s2741_s1 + $0x8] ss:$16 sps:$4 sm:$0xff]  }
  0x14   :  { %287 = vmatprep.subr.bf16.mxu0 %v1745_v1  ;;  %360 = vmatprep.subr.bf16.mxu1 %v1747_v2  ;;  %v1751_v5 = vld [vmem:[%s2741_s1 + $0x24] ss:$16 sps:$4 sm:$0xff]   ;;  %v1753_v6 = vld [vmem:[%s2741_s1 + $0x2c] ss:$16 sps:$4 sm:$0xff]   ;;  %v1755_v7 = vld [vmem:[%s2741_s1 + $0x20] ss:$16 sps:$4 sm:$0xff]  }
  0x15   :  { %288 = vmatpush1.bf16.msra.mxu0 %v1749_v3  ;;  %361 = vmatpush1.bf16.msra.mxu1 %v1750_v4  ;;  %v1756_v8 = vld [vmem:[%s2741_s1 + $0x28] ss:$16 sps:$4 sm:$0xff]   ;;  %v1757_v9 = vld [vmem:[%s2741_s1 + $0x44] ss:$16 sps:$4 sm:$0xff]   ;;  %v1759_v10 = vld [vmem:[%s2741_s1 + $0x4c] ss:$16 sps:$4 sm:$0xff]  }
  0x16   :  { %289 = vmatprep.subr.bf16.mxu0 %v1751_v5  ;;  %362 = vmatprep.subr.bf16.mxu1 %v1753_v6  ;;  %v1761_v11 = vld [vmem:[%s2741_s1 + $0x40] ss:$16 sps:$4 sm:$0xff]   ;;  %v1762_v12 = vld [vmem:[%s2741_s1 + $0x48] ss:$16 sps:$4 sm:$0xff]   ;;  %v1763_v13 = vld [vmem:[%s2741_s1 + $0x64] ss:$16 sps:$4 sm:$0xff]  }
  0x17   :  { %v1765_v14 = vld [vmem:[%s2741_s1 + $0x6c] ss:$16 sps:$4 sm:$0xff]   ;;  %v1767_v15 = vld [vmem:[%s2741_s1 + $0x60] ss:$16 sps:$4 sm:$0xff]   ;;  %v1768_v16 = vld [vmem:[%s2741_s1 + $0x68] ss:$16 sps:$4 sm:$0xff]  }
  0x18   :  { %v1769_v17 = vld [vmem:[%s2741_s1 + $0x84] ss:$16 sps:$4 sm:$0xff]   ;;  %v1771_v18 = vld [vmem:[%s2741_s1 + $0x8c] ss:$16 sps:$4 sm:$0xff]   ;;  %v1773_v19 = vld [vmem:[%s2741_s1 + $0x80] ss:$16 sps:$4 sm:$0xff]  }
  0x19   :  { %290 = vmatpush1.bf16.msra.mxu0 %v1755_v7  ;;  %363 = vmatpush1.bf16.msra.mxu1 %v1756_v8  ;;  %v1774_v20 = vld [vmem:[%s2741_s1 + $0x88] ss:$16 sps:$4 sm:$0xff]   ;;  %v1775_v21 = vld [vmem:[%s2741_s1 + $0xa4] ss:$16 sps:$4 sm:$0xff]   ;;  %v1777_v22 = vld [vmem:[%s2741_s1 + $0xac] ss:$16 sps:$4 sm:$0xff]   ;;  %v83_v7 = vlaneseq }
  0x1a   :  { %291 = vmatprep.subr.bf16.mxu0 %v1757_v9  ;;  %364 = vmatprep.subr.bf16.mxu1 %v1759_v10  ;;  %v1779_v23 = vld [vmem:[%s2741_s1 + $0xa0] ss:$16 sps:$4 sm:$0xff]   ;;  %v1780_v24 = vld [vmem:[%s2741_s1 + $0xa8] ss:$16 sps:$4 sm:$0xff]   ;;  %v1781_v25 = vld [vmem:[%s2741_s1 + $0xc4] ss:$16 sps:$4 sm:$0xff]  }
  0x1b   :  { %v1783_v26 = vld [vmem:[%s2741_s1 + $0xcc] ss:$16 sps:$4 sm:$0xff]   ;;  %v1785_v27 = vld [vmem:[%s2741_s1 + $0xc0] ss:$16 sps:$4 sm:$0xff]   ;;  %v1786_v28 = vld [vmem:[%s2741_s1 + $0xc8] ss:$16 sps:$4 sm:$0xff]  }
  0x1c   :  { %v1787_v29 = vld [vmem:[%s2741_s1 + $0xe4] ss:$16 sps:$4 sm:$0xff]   ;;  %v1789_v30 = vld [vmem:[%s2741_s1 + $0xec] ss:$16 sps:$4 sm:$0xff]   ;;  %v1791_v31 = vld [vmem:[%s2741_s1 + $0xe0] ss:$16 sps:$4 sm:$0xff]  }
  0x1d   :  { %292 = vmatpush1.bf16.msra.mxu0 %v1761_v11  ;;  %365 = vmatpush1.bf16.msra.mxu1 %v1762_v12  ;;  %v1792_v32 = vld [vmem:[%s2741_s1 + $0xe8] ss:$16 sps:$4 sm:$0xff]   ;;  %v2179_v33 = vld [vmem:[#allocation3 + $0x4] ss:$16 sps:$4 sm:$0xff]   ;;  %v2181_v34 = vld [vmem:[#allocation3 + $0xc] ss:$16 sps:$4 sm:$0xff]  }
  0x1e   :  { %293 = vmatprep.subr.bf16.mxu0 %v1763_v13  ;;  %366 = vmatprep.subr.bf16.mxu1 %v1765_v14  ;;  %v1793_v35 = vld [vmem:[%s2740_s0] sm:$0xff]   ;;  %v2188_v37 = vld [vmem:[#allocation3 + $0x8] ss:$16 sps:$4 sm:$0xff]   ;;  %v2194_v39 = vld [vmem:[#allocation3 + $0x2c] ss:$16 sps:$4 sm:$0xff]   ;;  %v2033_v6 = vmov 0.0|0.0  }
  0x1f   :  { %v2186_v36 = vld [vmem:[#allocation3] ss:$16 sps:$4 sm:$0xff]   ;;  %v2192_v38 = vld [vmem:[#allocation3 + $0x24] ss:$16 sps:$4 sm:$0xff]   ;;  %v2200_v41 = vld [vmem:[#allocation3 + $0x28] ss:$16 sps:$4 sm:$0xff]  }
  0x20   :  { %v2196_v40 = vld [vmem:[#allocation3 + $0x20] ss:$16 sps:$4 sm:$0xff]   ;;  %v2204_v42 = vld [vmem:[#allocation3 + $0x44] ss:$16 sps:$4 sm:$0xff]   ;;  %v2206_v43 = vld [vmem:[#allocation3 + $0x4c] ss:$16 sps:$4 sm:$0xff]  }
  0x21   :  { %294 = vmatpush1.bf16.msra.mxu0 %v1767_v15  ;;  %367 = vmatpush1.bf16.msra.mxu1 %v1768_v16  ;;  %v2213_v45 = vld [vmem:[#allocation3 + $0x40] ss:$16 sps:$4 sm:$0xff]   ;;  %v2215_v46 = vld [vmem:[#allocation3 + $0x48] ss:$16 sps:$4 sm:$0xff]   ;;  %v2219_v47 = vld [vmem:[#allocation3 + $0x64] ss:$16 sps:$4 sm:$0xff]  }
  0x22   :  { %295 = vmatprep.subr.bf16.mxu0 %v1769_v17  ;;  %368 = vmatprep.subr.bf16.mxu1 %v1771_v18  ;;  %v2223_v48 = vld [vmem:[#allocation3 + $0x6c] ss:$16 sps:$4 sm:$0xff]   ;;  %v2225_v49 = vld [vmem:[#allocation3 + $0x60] ss:$16 sps:$4 sm:$0xff]   ;;  %v2227_v50 = vld [vmem:[#allocation3 + $0x68] ss:$16 sps:$4 sm:$0xff]  }
  0x23   :  { %v2231_v51 = vld [vmem:[#allocation3 + $0x84] ss:$16 sps:$4 sm:$0xff]   ;;  %v2235_v52 = vld [vmem:[#allocation3 + $0x8c] ss:$16 sps:$4 sm:$0xff]   ;;  %v2244_v54 = vld [vmem:[#allocation3 + $0x80] ss:$16 sps:$4 sm:$0xff]  }
  0x24   :  { %v1819_v53 = vld [vmem:[%s2740_s0 + $0x10] sm:$0xff]   ;;  %v2246_v55 = vld [vmem:[#allocation3 + $0x88] ss:$16 sps:$4 sm:$0xff]   ;;  %v2252_v57 = vld [vmem:[#allocation3 + $0xac] ss:$16 sps:$4 sm:$0xff]   ;;  %v84_v8 = vshrl.u32 %v83_v7, 7 }
  0x25   :  { %296 = vmatpush1.bf16.msra.mxu0 %v1773_v19  ;;  %369 = vmatpush1.bf16.msra.mxu1 %v1774_v20  ;;  %v2250_v56 = vld [vmem:[#allocation3 + $0xa4] ss:$16 sps:$4 sm:$0xff]   ;;  %v2256_v58 = vld [vmem:[#allocation3 + $0xa0] ss:$16 sps:$4 sm:$0xff]   ;;  %v2258_v59 = vld [vmem:[#allocation3 + $0xa8] ss:$16 sps:$4 sm:$0xff]  }
  0x26   :  { %297 = vmatprep.subr.bf16.mxu0 %v1775_v21  ;;  %370 = vmatprep.subr.bf16.mxu1 %v1777_v22  ;;  %v2262_v60 = vld [vmem:[#allocation3 + $0xc4] ss:$16 sps:$4 sm:$0xff]   ;;  %v2264_v61 = vld [vmem:[#allocation3 + $0xcc] ss:$16 sps:$4 sm:$0xff]   ;;  %v2273_v63 = vld [vmem:[#allocation3 + $0xc0] ss:$16 sps:$4 sm:$0xff]  }
  0x27   :  { %v1832_v62 = vld [vmem:[%s2740_s0 + $0x18] sm:$0xff]   ;;  %v2279_v2 = vld [vmem:[#allocation3 + $0xe4] ss:$16 sps:$4 sm:$0xff]   ;;  %v2285_v4 = vld [vmem:[#allocation3 + $0xe0] ss:$16 sps:$4 sm:$0xff]   ;;  %v93_v9 = vsub.s32 2, %v84_v8 }
  0x28   :  { %v2275_v1 = vld [vmem:[#allocation3 + $0xc8] ss:$16 sps:$4 sm:$0xff]   ;;  %v2281_v3 = vld [vmem:[#allocation3 + $0xec] ss:$16 sps:$4 sm:$0xff]   ;;  %v97_v10 = vsub.s32 3, %v84_v8  ;;  %v85_v11 = vsub.s32 0, %v84_v8 }
  0x29   :  { %298 = vmatpush1.bf16.msra.mxu0 %v1779_v23  ;;  %371 = vmatpush1.bf16.msra.mxu1 %v1780_v24  ;;  %v2287_v5 = vld [vmem:[#allocation3 + $0xe8] ss:$16 sps:$4 sm:$0xff]   ;;  %v81_v12 = vld [vmem:[%s2743_s3] sm:$0xf]  ;;  %v89_v13 = vsub.s32 1, %v84_v8 }
  0x2a   :  { %299 = vmatprep.subr.bf16.mxu0 %v1781_v25  ;;  %372 = vmatprep.subr.bf16.mxu1 %v1783_v26  ;;  %v2334_v14 = vrot.slane %v81_v12, %v93_v9  ;;  %v2340_v17 = vrot.slane %v81_v12, %v97_v10  ;;  %v86_v18 = vrot.slane %v81_v12, %v85_v11 }
  0x2b   :  { %v90_v21 = vrot.slane %v81_v12, %v89_v13 }
  0x2d   :  { %300 = vmatpush1.bf16.msra.mxu0 %v1785_v27  ;;  %373 = vmatpush1.bf16.msra.mxu1 %v1786_v28 }
  0x2e   :  { %301 = vmatprep.subr.bf16.mxu0 %v1787_v29  ;;  %374 = vmatprep.subr.bf16.mxu1 %v1789_v30 }
  0x31   :  { %302 = vmatpush1.bf16.msra.mxu0 %v1791_v31  ;;  %375 = vmatpush1.bf16.msra.mxu1 %v1792_v32 }
  0x32   :  { %667 = vmatprep.subr.bf16.mxu0 %v2179_v33  ;;  %708 = vmatprep.subr.bf16.mxu1 %v2181_v34 }
  0x34   :  { %320 = vmatmul.mubr.bf16.vlgmr.msra.gmra.mrb[0].mxu0 %v1793_v35  ;;  %393 = vmatmul.mubr.bf16.vlgmr.msra.gmra.mrb[0].mxu1 %v1793_v35 }
  0x35   :  { %668 = vmatpush1.bf16.msra.mxu0 %v2186_v36  ;;  %709 = vmatpush1.bf16.msra.mxu1 %v2188_v37 }
  0x36   :  { %669 = vmatprep.subr.bf16.mxu0 %v2192_v38  ;;  %710 = vmatprep.subr.bf16.mxu1 %v2194_v39 }
  0x37   :  { %329 = vmatprep.mubr.bf16.mxu0 %v2747_v0  ;;  %402 = vmatprep.mubr.bf16.mxu1 %v2747_v0 }
  0x39   :  { %670 = vmatpush1.bf16.msra.mxu0 %v2196_v40  ;;  %711 = vmatpush1.bf16.msra.mxu1 %v2200_v41 }
  0x3a   :  { %671 = vmatprep.subr.bf16.mxu0 %v2204_v42  ;;  %712 = vmatprep.subr.bf16.mxu1 %v2206_v43 }
  0x3c   :  { %330 = vmatmul.mubr.bf16.gmra.mrb[4].mxu0 %v1806_v44  ;;  %403 = vmatmul.mubr.bf16.gmra.mrb[4].mxu1 %v1806_v44 }
  0x3d   :  { %672 = vmatpush1.bf16.msra.mxu0 %v2213_v45  ;;  %713 = vmatpush1.bf16.msra.mxu1 %v2215_v46 }
  0x3e   :  { %673 = vmatprep.subr.bf16.mxu0 %v2219_v47  ;;  %714 = vmatprep.subr.bf16.mxu1 %v2223_v48 }
  0x3f   :  { %339 = vmatprep.mubr.bf16.mxu0 %v2747_v0  ;;  %412 = vmatprep.mubr.bf16.mxu1 %v2747_v0 }
  0x41   :  { %674 = vmatpush1.bf16.msra.mxu0 %v2225_v49  ;;  %715 = vmatpush1.bf16.msra.mxu1 %v2227_v50 }
  0x42   :  { %675 = vmatprep.subr.bf16.mxu0 %v2231_v51  ;;  %716 = vmatprep.subr.bf16.mxu1 %v2235_v52 }
  0x44   :  { %340 = vmatmul.mubr.bf16.gmra.mrb[8].mxu0 %v1819_v53  ;;  %413 = vmatmul.mubr.bf16.gmra.mrb[8].mxu1 %v1819_v53 }
  0x45   :  { %676 = vmatpush1.bf16.msra.mxu0 %v2244_v54  ;;  %717 = vmatpush1.bf16.msra.mxu1 %v2246_v55 }
  0x46   :  { %677 = vmatprep.subr.bf16.mxu0 %v2250_v56  ;;  %718 = vmatprep.subr.bf16.mxu1 %v2252_v57 }
  0x47   :  { %349 = vmatprep.mubr.bf16.mxu0 %v2747_v0  ;;  %422 = vmatprep.mubr.bf16.mxu1 %v2747_v0 }
  0x49   :  { %678 = vmatpush1.bf16.msra.mxu0 %v2256_v58  ;;  %719 = vmatpush1.bf16.msra.mxu1 %v2258_v59 }
  0x4a   :  { %679 = vmatprep.subr.bf16.mxu0 %v2262_v60  ;;  %720 = vmatprep.subr.bf16.mxu1 %v2264_v61 }
  0x4c   :  { %350 = vmatmul.mubr.bf16.gmra.mrb[12].mxu0 %v1832_v62  ;;  %423 = vmatmul.mubr.bf16.gmra.mrb[12].mxu1 %v1832_v62 }
  0x4d   :  { %680 = vmatpush1.bf16.msra.mxu0 %v2273_v63  ;;  %721 = vmatpush1.bf16.msra.mxu1 %v2275_v1 }
  0x4e   :  { %681 = vmatprep.subr.bf16.mxu0 %v2279_v2  ;;  %722 = vmatprep.subr.bf16.mxu1 %v2281_v3 }
  0x4f   :  { %699 = vmatprep.mubr.bf16.mxu0 %v2747_v0  ;;  %740 = vmatprep.mubr.bf16.mxu1 %v2747_v0 }
  0x51   :  { %682 = vmatpush1.bf16.msra.mxu0 %v2285_v4  ;;  %723 = vmatpush1.bf16.msra.mxu1 %v2287_v5 }
  0x52   :  { %786 = vmatprep.subr.bf16.mxu0 %v2179_v33  ;;  %827 = vmatprep.subr.bf16.mxu1 %v2181_v34 }
  0x54   :  { %700 = vmatmul.mubr.bf16.vlgmr.msra.gmra.mrb[16].mxu0 %v2033_v6  ;;  %741 = vmatmul.mubr.bf16.vlgmr.msra.gmra.mrb[16].mxu1 %v2033_v6 }
  0x55   :  { %787 = vmatpush1.bf16.msra.mxu0 %v2186_v36  ;;  %828 = vmatpush1.bf16.msra.mxu1 %v2188_v37 }
  0x56   :  { %788 = vmatprep.subr.bf16.mxu0 %v2192_v38  ;;  %829 = vmatprep.subr.bf16.mxu1 %v2194_v39 }
  0x57   :  { %818 = vmatprep.mubr.bf16.mxu0 %v2747_v0  ;;  %859 = vmatprep.mubr.bf16.mxu1 %v2747_v0 }
  0x59   :  { %789 = vmatpush1.bf16.msra.mxu0 %v2196_v40  ;;  %830 = vmatpush1.bf16.msra.mxu1 %v2200_v41 }
  0x5a   :  { %790 = vmatprep.subr.bf16.mxu0 %v2204_v42  ;;  %831 = vmatprep.subr.bf16.mxu1 %v2206_v43 }
  0x5d   :  { %791 = vmatpush1.bf16.msra.mxu0 %v2213_v45  ;;  %832 = vmatpush1.bf16.msra.mxu1 %v2215_v46 }
  0x5e   :  { %792 = vmatprep.subr.bf16.mxu0 %v2219_v47  ;;  %833 = vmatprep.subr.bf16.mxu1 %v2223_v48 }
  0x61   :  { %793 = vmatpush1.bf16.msra.mxu0 %v2225_v49  ;;  %834 = vmatpush1.bf16.msra.mxu1 %v2227_v50 }
  0x62   :  { %794 = vmatprep.subr.bf16.mxu0 %v2231_v51  ;;  %835 = vmatprep.subr.bf16.mxu1 %v2235_v52 }
  0x65   :  { %795 = vmatpush1.bf16.msra.mxu0 %v2244_v54  ;;  %836 = vmatpush1.bf16.msra.mxu1 %v2246_v55 }
  0x66   :  { %796 = vmatprep.subr.bf16.mxu0 %v2250_v56  ;;  %837 = vmatprep.subr.bf16.mxu1 %v2252_v57 }
  0x69   :  { %797 = vmatpush1.bf16.msra.mxu0 %v2256_v58  ;;  %838 = vmatpush1.bf16.msra.mxu1 %v2258_v59 }
  0x6a   :  { %798 = vmatprep.subr.bf16.mxu0 %v2262_v60  ;;  %839 = vmatprep.subr.bf16.mxu1 %v2264_v61 }
  0x6d   :  { %799 = vmatpush1.bf16.msra.mxu0 %v2273_v63  ;;  %840 = vmatpush1.bf16.msra.mxu1 %v2275_v1 }
  0x6e   :  { %800 = vmatprep.subr.bf16.mxu0 %v2279_v2  ;;  %841 = vmatprep.subr.bf16.mxu1 %v2281_v3 }
  0x71   :  { %801 = vmatpush1.bf16.msra.mxu0 %v2285_v4  ;;  %842 = vmatpush1.bf16.msra.mxu1 %v2287_v5 }
  0x72   :  { %906 = vmatprep.subr.bf16.mxu0 %v2179_v33  ;;  %947 = vmatprep.subr.bf16.mxu1 %v2181_v34 }
 0x107   :  { %v2336_v15 = vpop.f32.mrb[0].mxu0  ;;  %v2338_v16 = vpop.f32.mrb[0].mxu1 }
 0x108   :  { %v323_v19 = vpop.f32.mrb[1].mxu0  ;;  %v396_v20 = vpop.f32.mrb[1].mxu1 }
 0x109   :  { %v325_v22 = vpop.f32.mrb[2].mxu0  ;;  %v398_v23 = vpop.f32.mrb[2].mxu1 }
 0x10a   :  { %v2342_v24 = vadd.f32 %v325_v22, %v86_v18  ;;  %v327_v25 = vpop.f32.mrb[3].mxu0  ;;  %v2345_v26 = vadd.f32 %v398_v23, %v2334_v14  ;;  %v400_v27 = vpop.f32.mrb[3].mxu1 }
 0x10b   :  { %v2347_v28 = vadd.f32 %v327_v25, %v90_v21  ;;  %v2350_v29 = vadd.f32 %v400_v27, %v2340_v17 }
 0x10f   :  { %v331_v30 = vpop.f32.mrb[4].mxu0  ;;  %v404_v31 = vpop.f32.mrb[4].mxu1 }
 0x110   :  { %v2352_v32 = vadd.f32 %v331_v30, %v86_v18  ;;  %v333_v35 = vpop.f32.mrb[5].mxu0  ;;  %v2355_v44 = vadd.f32 %v404_v31, %v2334_v14  ;;  %v406_v53 = vpop.f32.mrb[5].mxu1 }
 0x111   :  { %v2357_v62 = vadd.f32 %v333_v35, %v90_v21  ;;  %v335_v6 = vpop.f32.mrb[6].mxu0  ;;  %v2360_v7 = vadd.f32 %v406_v53, %v2340_v17  ;;  %v408_v8 = vpop.f32.mrb[6].mxu1 }
 0x112   :  { %v2362_v9 = vadd.f32 %v335_v6, %v86_v18  ;;  %v337_v10 = vpop.f32.mrb[7].mxu0  ;;  %v2365_v11 = vadd.f32 %v408_v8, %v2334_v14  ;;  %v410_v12 = vpop.f32.mrb[7].mxu1 }
 0x113   :  { %2749 = vst [vmem:[#allocation6_spill] sm:$0xff] %v2360_v7  ;;  %v2367_v13 = vadd.f32 %v337_v10, %v90_v21  ;;  %v2370_v22 = vadd.f32 %v410_v12, %v2340_v17 }
 0x114   :  { %2750 = vst [vmem:[#allocation7_spill] sm:$0xff] %v2362_v9  ;;  %2751 = vst [vmem:[#allocation8_spill] sm:$0xff] %v2365_v11 }
 0x115   :  { %2752 = vst [vmem:[#allocation9_spill] sm:$0xff] %v2367_v13  ;;  %2753 = vst [vmem:[#allocation10_spill] sm:$0xff] %v2370_v22 }
 0x117   :  { %v341_v23 = vpop.f32.mrb[8].mxu0  ;;  %v414_v25 = vpop.f32.mrb[8].mxu1 }
 0x118   :  { %v2372_v27 = vadd.f32 %v341_v23, %v86_v18  ;;  %v343_v30 = vpop.f32.mrb[9].mxu0  ;;  %v2375_v31 = vadd.f32 %v414_v25, %v2334_v14  ;;  %v416_v35 = vpop.f32.mrb[9].mxu1 }
 0x119   :  { %v2377_v53 = vadd.f32 %v343_v30, %v90_v21  ;;  %v345_v6 = vpop.f32.mrb[10].mxu0  ;;  %v2380_v8 = vadd.f32 %v416_v35, %v2340_v17  ;;  %v418_v10 = vpop.f32.mrb[10].mxu1 }
 0x11a   :  { %2754 = vst [vmem:[#allocation11_spill] sm:$0xff] %v2372_v27  ;;  %2755 = vst [vmem:[#allocation12_spill] sm:$0xff] %v2375_v31  ;;  %v2382_v0 = vadd.f32 %v345_v6, %v86_v18  ;;  %v347_v12 = vpop.f32.mrb[11].mxu0  ;;  %v2385_v22 = vadd.f32 %v418_v10, %v2334_v14  ;;  %v420_v23 = vpop.f32.mrb[11].mxu1 }
 0x11b   :  { %2756 = vst [vmem:[#allocation13_spill] sm:$0xff] %v2377_v53  ;;  %2757 = vst [vmem:[#allocation14_spill] sm:$0xff] %v2380_v8  ;;  %v2387_v27 = vadd.f32 %v347_v12, %v90_v21  ;;  %v2390_v25 = vadd.f32 %v420_v23, %v2340_v17 }
 0x11c   :  { %2758 = vst [vmem:[#allocation15_spill] sm:$0xff] %v2382_v0  ;;  %2759 = vst [vmem:[#allocation16_spill] sm:$0xff] %v2385_v22 }
 0x11d   :  { %2760 = vst [vmem:[#allocation17_spill] sm:$0xff] %v2387_v27  ;;  %2761 = vst [vmem:[#allocation18_spill] sm:$0xff] %v2390_v25 }
 0x11f   :  { %v351_v31 = vpop.f32.mrb[12].mxu0  ;;  %v424_v30 = vpop.f32.mrb[12].mxu1 }
 0x120   :  { %v2392_v53 = vadd.f32 %v351_v31, %v86_v18  ;;  %v353_v13 = vpop.f32.mrb[13].mxu0  ;;  %v2395_v35 = vadd.f32 %v424_v30, %v2334_v14  ;;  %v426_v6 = vpop.f32.mrb[13].mxu1 }
 0x121   :  { %v2397_v0 = vadd.f32 %v353_v13, %v90_v21  ;;  %v355_v8 = vpop.f32.mrb[14].mxu0  ;;  %v2400_v10 = vadd.f32 %v426_v6, %v2340_v17  ;;  %v428_v12 = vpop.f32.mrb[14].mxu1  ;;  %v322_v13 = vadd.f32 %v2336_v15, %v86_v18  ;;  %v324_v6 = vadd.f32 %v323_v19, %v90_v21 }
 0x122   :  { %2762 = vst [vmem:[#allocation19_spill] sm:$0xff] %v2392_v53  ;;  %2763 = vst [vmem:[#allocation20_spill] sm:$0xff] %v2395_v35  ;;  %v2402_v27 = vadd.f32 %v355_v8, %v86_v18  ;;  %v357_v23 = vpop.f32.mrb[15].mxu0  ;;  %v2405_v25 = vadd.f32 %v428_v12, %v2334_v14  ;;  %v430_v31 = vpop.f32.mrb[15].mxu1 }
 0x123   :  { %2764 = vst [vmem:[#allocation21_spill] sm:$0xff] %v2397_v0  ;;  %2765 = vst [vmem:[#allocation22_spill] sm:$0xff] %v2400_v10  ;;  %v2407_v53 = vadd.f32 %v357_v23, %v90_v21  ;;  %v2410_v30 = vadd.f32 %v430_v31, %v2340_v17  ;;  %v395_v0 = vadd.f32 %v2338_v16, %v2334_v14 }
 0x124   :  { %2766 = vst [vmem:[#allocation23_spill] sm:$0xff] %v2402_v27  ;;  %2767 = vst [vmem:[#allocation24_spill] sm:$0xff] %v2405_v25  ;;  %v397_v10 = vadd.f32 %v396_v20, %v2340_v17 }
 0x125   :  { %2768 = vst [vmem:[#allocation25_spill] sm:$0xff] %v2407_v53  ;;  %2769 = vst [vmem:[#allocation26_spill] sm:$0xff] %v2410_v30 }
 0x127   :  { %v701_v8 = vpop.f32.mrb[16].mxu0  ;;  %v742_v27 = vpop.f32.mrb[16].mxu1 }
 0x128   :  { %v749_v35 = vadd.f32 %v701_v8, %v322_v13  ;;  %v751_v22 = vadd.f32 %v742_v27, %v395_v0  ;;  %v703_v12 = vpop.f32.mrb[17].mxu0  ;;  %v744_v25 = vpop.f32.mrb[17].mxu1 }
 0x129   :  { %v750_v11 = vadd.f32 %v703_v12, %v324_v6  ;;  %v752_v23 = vadd.f32 %v744_v25, %v397_v10  ;;  %v705_v53 = vpop.f32.mrb[18].mxu0  ;;  %v746_v9 = vpop.f32.mrb[18].mxu1 }
 0x12a   :  { %v1709_v31 = vmul.f32 -1.442695, %v749_v35  ;;  %v706_v30 = vpop.f32.mrb[19].mxu0  ;;  %v747_v7 = vpop.f32.mrb[19].mxu1 }
 0x12b   :  { %v1710_v15 = vmul.f32 -1.442695, %v750_v11  ;;  %v1711_v14 = vmul.f32 -1.442695, %v752_v23 }
 0x12c   :  { %1845 = vpow2.f32 %v1709_v31 }
 0x12d   :  { %1847 = vpow2.f32 %v1710_v15 }
 0x12e   :  { %1849 = vpow2.f32 %v1711_v14 }
 0x12f   :  { %1851 = vtanh.f32 %v751_v22  ;;  %v2770_v22 = vmov 0  }
 0x136   :  { %v1846_v16 = vpop.eup %1845 }
 0x137   :  { %v1848_v18 = vpop.eup %1847  ;;  %v756_v17 = vadd.f32 1.0, %v1846_v16 }
 0x138   :  { %v762_v19 = vadd.f32 1.0, %v1848_v18  ;;  %v1850_v0 = vpop.eup %1849 }
 0x139   :  { %1853 = vrcp.f32 %v756_v17  ;;  %v1852_v20 = vpop.eup %1851  ;;  %v769_v53 = vadd.f32 1.0, %v1850_v0 }
 0x13a   :  { %1855 = vrcp.f32 %v762_v19 }
 0x13b   :  { %1857 = vrcp.f32 %v769_v53 }
 0x143   :  { %v1854_v21 = vpop.eup %1853 }
 0x144   :  { %v1856_v27 = vpop.eup %1855  ;;  %v773_v9 = vmul.f32 %v1854_v21, %v1852_v20 }
 0x145   :  { %v772_v25 = vmul.f32 0.0, %v1856_v27  ;;  %v1858_v11 = vpop.eup %1857 }
 0x147   :  { %v2416_v7 = vadd.f32 %v773_v9, %v772_v25 }
 0x149   :  { %1859 = vtanh.f32 %v2416_v7 }
 0x153   :  { %v1860_v35 = vpop.eup %1859 }
 0x154   :  { %v776_v10 = vmul.f32 %v1860_v35, %v1858_v11 }
 0x156   :  { %v777_v30 = vpack.c.bf16 %v776_v10, %v776_v10 }
 0x158   :  { %778 = vst [vmem:[%s2744_s4] sm:$0xf] %v777_v30  ;;  %819 = vmatmul.mubr.bf16.vlgmr.msra.gmra.mrb[20].mxu0 %v777_v30  ;;  %860 = vmatmul.mubr.bf16.vlgmr.msra.gmra.mrb[20].mxu1 %v777_v30 }
 0x159   :  { %907 = vmatpush1.bf16.msra.mxu0 %v2186_v36  ;;  %948 = vmatpush1.bf16.msra.mxu1 %v2188_v37 }
 0x15a   :  { %908 = vmatprep.subr.bf16.mxu0 %v2192_v38  ;;  %949 = vmatprep.subr.bf16.mxu1 %v2194_v39 }
 0x15b   :  { %938 = vmatprep.mubr.bf16.mxu0 %v2770_v22  ;;  %979 = vmatprep.mubr.bf16.mxu1 %v2770_v22 }
 0x15d   :  { %909 = vmatpush1.bf16.msra.mxu0 %v2196_v40  ;;  %950 = vmatpush1.bf16.msra.mxu1 %v2200_v41 }
 0x15e   :  { %910 = vmatprep.subr.bf16.mxu0 %v2204_v42  ;;  %951 = vmatprep.subr.bf16.mxu1 %v2206_v43 }
 0x161   :  { %911 = vmatpush1.bf16.msra.mxu0 %v2213_v45  ;;  %952 = vmatpush1.bf16.msra.mxu1 %v2215_v46 }
 0x162   :  { %912 = vmatprep.subr.bf16.mxu0 %v2219_v47  ;;  %953 = vmatprep.subr.bf16.mxu1 %v2223_v48 }
 0x165   :  { %913 = vmatpush1.bf16.msra.mxu0 %v2225_v49  ;;  %954 = vmatpush1.bf16.msra.mxu1 %v2227_v50 }
 0x166   :  { %914 = vmatprep.subr.bf16.mxu0 %v2231_v51  ;;  %955 = vmatprep.subr.bf16.mxu1 %v2235_v52 }
 0x169   :  { %915 = vmatpush1.bf16.msra.mxu0 %v2244_v54  ;;  %956 = vmatpush1.bf16.msra.mxu1 %v2246_v55 }
 0x16a   :  { %916 = vmatprep.subr.bf16.mxu0 %v2250_v56  ;;  %957 = vmatprep.subr.bf16.mxu1 %v2252_v57 }
 0x16d   :  { %917 = vmatpush1.bf16.msra.mxu0 %v2256_v58  ;;  %958 = vmatpush1.bf16.msra.mxu1 %v2258_v59 }
 0x16e   :  { %918 = vmatprep.subr.bf16.mxu0 %v2262_v60  ;;  %959 = vmatprep.subr.bf16.mxu1 %v2264_v61 }
 0x171   :  { %919 = vmatpush1.bf16.msra.mxu0 %v2273_v63  ;;  %960 = vmatpush1.bf16.msra.mxu1 %v2275_v1 }
 0x172   :  { %920 = vmatprep.subr.bf16.mxu0 %v2279_v2  ;;  %961 = vmatprep.subr.bf16.mxu1 %v2281_v3 }
 0x175   :  { %921 = vmatpush1.bf16.msra.mxu0 %v2285_v4  ;;  %962 = vmatpush1.bf16.msra.mxu1 %v2287_v5 }
 0x176   :  { %1026 = vmatprep.subr.bf16.mxu0 %v2179_v33  ;;  %1067 = vmatprep.subr.bf16.mxu1 %v2181_v34 }
 0x22b   :  { %v820_v13 = vpop.f32.mrb[20].mxu0  ;;  %v861_v6 = vpop.f32.mrb[20].mxu1 }
 0x22c   :  { %v868_v8 = vadd.f32 %v820_v13, %v2342_v24  ;;  %v870_v12 = vadd.f32 %v861_v6, %v2345_v26  ;;  %v822_v23 = vpop.f32.mrb[21].mxu0  ;;  %v863_v31 = vpop.f32.mrb[21].mxu1 }
 0x22d   :  { %v869_v15 = vadd.f32 %v822_v23, %v2347_v28  ;;  %v871_v14 = vadd.f32 %v863_v31, %v2350_v29  ;;  %v824_v16 = vpop.f32.mrb[22].mxu0  ;;  %v865_v18 = vpop.f32.mrb[22].mxu1 }
 0x22e   :  { %v1712_v17 = vmul.f32 -1.442695, %v868_v8  ;;  %v825_v19 = vpop.f32.mrb[23].mxu0  ;;  %v866_v0 = vpop.f32.mrb[23].mxu1 }
 0x22f   :  { %v1713_v20 = vmul.f32 -1.442695, %v869_v15  ;;  %v1714_v21 = vmul.f32 -1.442695, %v871_v14 }
 0x230   :  { %1861 = vpow2.f32 %v1712_v17  ;;  %v2771_v17 = vld [vmem:[#allocation6_spill] sm:$0xff] }
 0x231   :  { %1863 = vpow2.f32 %v1713_v20 }
 0x232   :  { %1865 = vpow2.f32 %v1714_v21 }
 0x233   :  { %1867 = vtanh.f32 %v870_v12 }
 0x23a   :  { %v1862_v27 = vpop.eup %1861 }
 0x23b   :  { %v1864_v9 = vpop.eup %1863  ;;  %v875_v24 = vadd.f32 1.0, %v1862_v27 }
 0x23c   :  { %v881_v26 = vadd.f32 1.0, %v1864_v9  ;;  %v1866_v28 = vpop.eup %1865 }
 0x23d   :  { %1869 = vrcp.f32 %v875_v24  ;;  %v1868_v53 = vpop.eup %1867  ;;  %v888_v35 = vadd.f32 1.0, %v1866_v28 }
 0x23e   :  { %1871 = vrcp.f32 %v881_v26 }
 0x23f   :  { %1873 = vrcp.f32 %v888_v35 }
 0x247   :  { %v1870_v29 = vpop.eup %1869 }
 0x248   :  { %v1872_v25 = vpop.eup %1871  ;;  %v892_v11 = vmul.f32 %v1870_v29, %v1868_v53 }
 0x249   :  { %v891_v10 = vmul.f32 %v1872_v25, %v2416_v7  ;;  %v1874_v13 = vpop.eup %1873 }
 0x24b   :  { %v2461_v30 = vadd.f32 %v892_v11, %v891_v10 }
 0x24d   :  { %1875 = vtanh.f32 %v2461_v30 }
 0x257   :  { %v1876_v6 = vpop.eup %1875 }
 0x258   :  { %v895_v8 = vmul.f32 %v1876_v6, %v1874_v13 }
 0x25a   :  { %v896_v12 = vpack.c.bf16 %v895_v8, %v895_v8 }
 0x25c   :  { %1715 = vst [vmem:[%s2744_s4 + $0x4] sm:$0xf] %v896_v12  ;;  %939 = vmatmul.mubr.bf16.vlgmr.msra.gmra.mrb[24].mxu0 %v896_v12  ;;  %980 = vmatmul.mubr.bf16.vlgmr.msra.gmra.mrb[24].mxu1 %v896_v12 }
 0x25d   :  { %1027 = vmatpush1.bf16.msra.mxu0 %v2186_v36  ;;  %1068 = vmatpush1.bf16.msra.mxu1 %v2188_v37 }
 0x25e   :  { %1028 = vmatprep.subr.bf16.mxu0 %v2192_v38  ;;  %1069 = vmatprep.subr.bf16.mxu1 %v2194_v39 }
 0x25f   :  { %1058 = vmatprep.mubr.bf16.mxu0 %v2770_v22  ;;  %1099 = vmatprep.mubr.bf16.mxu1 %v2770_v22 }
 0x261   :  { %1029 = vmatpush1.bf16.msra.mxu0 %v2196_v40  ;;  %1070 = vmatpush1.bf16.msra.mxu1 %v2200_v41 }
 0x262   :  { %1030 = vmatprep.subr.bf16.mxu0 %v2204_v42  ;;  %1071 = vmatprep.subr.bf16.mxu1 %v2206_v43 }
 0x265   :  { %1031 = vmatpush1.bf16.msra.mxu0 %v2213_v45  ;;  %1072 = vmatpush1.bf16.msra.mxu1 %v2215_v46 }
 0x266   :  { %1032 = vmatprep.subr.bf16.mxu0 %v2219_v47  ;;  %1073 = vmatprep.subr.bf16.mxu1 %v2223_v48 }
 0x269   :  { %1033 = vmatpush1.bf16.msra.mxu0 %v2225_v49  ;;  %1074 = vmatpush1.bf16.msra.mxu1 %v2227_v50 }
 0x26a   :  { %1034 = vmatprep.subr.bf16.mxu0 %v2231_v51  ;;  %1075 = vmatprep.subr.bf16.mxu1 %v2235_v52 }
 0x26d   :  { %1035 = vmatpush1.bf16.msra.mxu0 %v2244_v54  ;;  %1076 = vmatpush1.bf16.msra.mxu1 %v2246_v55 }
 0x26e   :  { %1036 = vmatprep.subr.bf16.mxu0 %v2250_v56  ;;  %1077 = vmatprep.subr.bf16.mxu1 %v2252_v57 }
 0x271   :  { %1037 = vmatpush1.bf16.msra.mxu0 %v2256_v58  ;;  %1078 = vmatpush1.bf16.msra.mxu1 %v2258_v59 }
 0x272   :  { %1038 = vmatprep.subr.bf16.mxu0 %v2262_v60  ;;  %1079 = vmatprep.subr.bf16.mxu1 %v2264_v61 }
 0x275   :  { %1039 = vmatpush1.bf16.msra.mxu0 %v2273_v63  ;;  %1080 = vmatpush1.bf16.msra.mxu1 %v2275_v1 }
 0x276   :  { %1040 = vmatprep.subr.bf16.mxu0 %v2279_v2  ;;  %1081 = vmatprep.subr.bf16.mxu1 %v2281_v3 }
 0x279   :  { %1041 = vmatpush1.bf16.msra.mxu0 %v2285_v4  ;;  %1082 = vmatpush1.bf16.msra.mxu1 %v2287_v5 }
 0x27a   :  { %1146 = vmatprep.subr.bf16.mxu0 %v2179_v33  ;;  %1187 = vmatprep.subr.bf16.mxu1 %v2181_v34 }
 0x32f   :  { %v940_v7 = vpop.f32.mrb[24].mxu0  ;;  %v981_v23 = vpop.f32.mrb[24].mxu1 }
 0x330   :  { %v988_v31 = vadd.f32 %v940_v7, %v2352_v32  ;;  %v990_v15 = vadd.f32 %v981_v23, %v2355_v44  ;;  %v942_v14 = vpop.f32.mrb[25].mxu0  ;;  %v983_v16 = vpop.f32.mrb[25].mxu1 }
 0x331   :  { %v989_v18 = vadd.f32 %v942_v14, %v2357_v62  ;;  %v991_v19 = vadd.f32 %v983_v16, %v2771_v17  ;;  %v944_v0 = vpop.f32.mrb[26].mxu0  ;;  %v985_v20 = vpop.f32.mrb[26].mxu1  ;;  %v2773_v16 = vld [vmem:[#allocation8_spill] sm:$0xff] }
 0x332   :  { %v1716_v21 = vmul.f32 -1.442695, %v988_v31  ;;  %v945_v27 = vpop.f32.mrb[27].mxu0  ;;  %v986_v9 = vpop.f32.mrb[27].mxu1  ;;  %v2774_v0 = vld [vmem:[#allocation9_spill] sm:$0xff] }
 0x333   :  { %v1717_v24 = vmul.f32 -1.442695, %v989_v18  ;;  %v1718_v26 = vmul.f32 -1.442695, %v991_v19 }
 0x334   :  { %1877 = vpow2.f32 %v1716_v21  ;;  %v2775_v21 = vld [vmem:[#allocation10_spill] sm:$0xff] }
 0x335   :  { %1879 = vpow2.f32 %v1717_v24 }
 0x336   :  { %1881 = vpow2.f32 %v1718_v26 }
 0x337   :  { %1883 = vtanh.f32 %v990_v15  ;;  %v2772_v15 = vld [vmem:[#allocation7_spill] sm:$0xff] }
 0x33e   :  { %v1878_v28 = vpop.eup %1877 }
 0x33f   :  { %v1880_v53 = vpop.eup %1879  ;;  %v995_v32 = vadd.f32 1.0, %v1878_v28 }
 0x340   :  { %v1001_v44 = vadd.f32 1.0, %v1880_v53  ;;  %v1882_v62 = vpop.eup %1881 }
 0x341   :  { %1885 = vrcp.f32 %v995_v32  ;;  %v1884_v29 = vpop.eup %1883  ;;  %v1008_v10 = vadd.f32 1.0, %v1882_v62 }
 0x342   :  { %1887 = vrcp.f32 %v1001_v44 }
 0x343   :  { %1889 = vrcp.f32 %v1008_v10 }
 0x34b   :  { %v1886_v25 = vpop.eup %1885 }
 0x34c   :  { %v1888_v11 = vpop.eup %1887  ;;  %v1012_v35 = vmul.f32 %v1886_v25, %v1884_v29 }
 0x34d   :  { %v1011_v13 = vmul.f32 %v1888_v11, %v2461_v30  ;;  %v1890_v8 = vpop.eup %1889 }
 0x34f   :  { %v2506_v6 = vadd.f32 %v1012_v35, %v1011_v13 }
 0x351   :  { %1891 = vtanh.f32 %v2506_v6 }
 0x35b   :  { %v1892_v12 = vpop.eup %1891 }
 0x35c   :  { %v1015_v7 = vmul.f32 %v1892_v12, %v1890_v8 }
 0x35e   :  { %v1016_v23 = vpack.c.bf16 %v1015_v7, %v1015_v7 }
 0x360   :  { %1719 = vst [vmem:[%s2744_s4 + $0x8] sm:$0xf] %v1016_v23  ;;  %1059 = vmatmul.mubr.bf16.vlgmr.msra.gmra.mrb[28].mxu0 %v1016_v23  ;;  %1100 = vmatmul.mubr.bf16.vlgmr.msra.gmra.mrb[28].mxu1 %v1016_v23 }
 0x361   :  { %1147 = vmatpush1.bf16.msra.mxu0 %v2186_v36  ;;  %1188 = vmatpush1.bf16.msra.mxu1 %v2188_v37 }
 0x362   :  { %1148 = vmatprep.subr.bf16.mxu0 %v2192_v38  ;;  %1189 = vmatprep.subr.bf16.mxu1 %v2194_v39 }
 0x363   :  { %1178 = vmatprep.mubr.bf16.mxu0 %v2770_v22  ;;  %1219 = vmatprep.mubr.bf16.mxu1 %v2770_v22 }
 0x365   :  { %1149 = vmatpush1.bf16.msra.mxu0 %v2196_v40  ;;  %1190 = vmatpush1.bf16.msra.mxu1 %v2200_v41 }
 0x366   :  { %1150 = vmatprep.subr.bf16.mxu0 %v2204_v42  ;;  %1191 = vmatprep.subr.bf16.mxu1 %v2206_v43 }
 0x369   :  { %1151 = vmatpush1.bf16.msra.mxu0 %v2213_v45  ;;  %1192 = vmatpush1.bf16.msra.mxu1 %v2215_v46 }
 0x36a   :  { %1152 = vmatprep.subr.bf16.mxu0 %v2219_v47  ;;  %1193 = vmatprep.subr.bf16.mxu1 %v2223_v48 }
 0x36d   :  { %1153 = vmatpush1.bf16.msra.mxu0 %v2225_v49  ;;  %1194 = vmatpush1.bf16.msra.mxu1 %v2227_v50 }
 0x36e   :  { %1154 = vmatprep.subr.bf16.mxu0 %v2231_v51  ;;  %1195 = vmatprep.subr.bf16.mxu1 %v2235_v52 }
 0x371   :  { %1155 = vmatpush1.bf16.msra.mxu0 %v2244_v54  ;;  %1196 = vmatpush1.bf16.msra.mxu1 %v2246_v55 }
 0x372   :  { %1156 = vmatprep.subr.bf16.mxu0 %v2250_v56  ;;  %1197 = vmatprep.subr.bf16.mxu1 %v2252_v57 }
 0x375   :  { %1157 = vmatpush1.bf16.msra.mxu0 %v2256_v58  ;;  %1198 = vmatpush1.bf16.msra.mxu1 %v2258_v59 }
 0x376   :  { %1158 = vmatprep.subr.bf16.mxu0 %v2262_v60  ;;  %1199 = vmatprep.subr.bf16.mxu1 %v2264_v61 }
 0x379   :  { %1159 = vmatpush1.bf16.msra.mxu0 %v2273_v63  ;;  %1200 = vmatpush1.bf16.msra.mxu1 %v2275_v1 }
 0x37a   :  { %1160 = vmatprep.subr.bf16.mxu0 %v2279_v2  ;;  %1201 = vmatprep.subr.bf16.mxu1 %v2281_v3 }
 0x37d   :  { %1161 = vmatpush1.bf16.msra.mxu0 %v2285_v4  ;;  %1202 = vmatpush1.bf16.msra.mxu1 %v2287_v5 }
 0x37e   :  { %1266 = vmatprep.subr.bf16.mxu0 %v2179_v33  ;;  %1307 = vmatprep.subr.bf16.mxu1 %v2181_v34 }
 0x433   :  { %v1060_v30 = vpop.f32.mrb[28].mxu0  ;;  %v1101_v31 = vpop.f32.mrb[28].mxu1 }
 0x434   :  { %v1108_v14 = vadd.f32 %v1060_v30, %v2772_v15  ;;  %v1110_v18 = vadd.f32 %v1101_v31, %v2773_v16  ;;  %v1062_v17 = vpop.f32.mrb[29].mxu0  ;;  %v1103_v19 = vpop.f32.mrb[29].mxu1 }
 0x435   :  { %v1109_v20 = vadd.f32 %v1062_v17, %v2774_v0  ;;  %v1111_v27 = vadd.f32 %v1103_v19, %v2775_v21  ;;  %v1064_v9 = vpop.f32.mrb[30].mxu0  ;;  %v1105_v24 = vpop.f32.mrb[30].mxu1 }
 0x436   :  { %v1720_v26 = vmul.f32 -1.442695, %v1108_v14  ;;  %v1065_v28 = vpop.f32.mrb[31].mxu0  ;;  %v1106_v53 = vpop.f32.mrb[31].mxu1 }
 0x437   :  { %v1721_v33 = vmul.f32 -1.442695, %v1109_v20  ;;  %v1722_v34 = vmul.f32 -1.442695, %v1111_v27 }
 0x438   :  { %1893 = vpow2.f32 %v1720_v26 }
 0x439   :  { %1895 = vpow2.f32 %v1721_v33  ;;  %v2606_v33 = vld [vmem:[#allocation3] ss:$16 sps:$4 sm:$0xff]  }
 0x43a   :  { %1897 = vpow2.f32 %v1722_v34  ;;  %v2609_v34 = vld [vmem:[#allocation3 + $0x8] ss:$16 sps:$4 sm:$0xff]  }
 0x43b   :  { %1899 = vtanh.f32 %v1110_v18 }
 0x442   :  { %v1894_v32 = vpop.eup %1893 }
 0x443   :  { %v1896_v44 = vpop.eup %1895  ;;  %v1115_v62 = vadd.f32 1.0, %v1894_v32  ;;  %v2612_v32 = vld [vmem:[#allocation3 + $0x24] ss:$16 sps:$4 sm:$0xff]  }
 0x444   :  { %v1121_v29 = vadd.f32 1.0, %v1896_v44  ;;  %v1898_v25 = vpop.eup %1897  ;;  %v2615_v44 = vld [vmem:[#allocation3 + $0x2c] ss:$16 sps:$4 sm:$0xff]  }
 0x445   :  { %1901 = vrcp.f32 %v1115_v62  ;;  %v1900_v11 = vpop.eup %1899  ;;  %v1128_v8 = vadd.f32 1.0, %v1898_v25  ;;  %v2620_v62 = vld [vmem:[#allocation3 + $0x20] ss:$16 sps:$4 sm:$0xff]   ;;  %v2626_v25 = vld [vmem:[#allocation3 + $0x44] ss:$16 sps:$4 sm:$0xff]  }
 0x446   :  { %1903 = vrcp.f32 %v1121_v29  ;;  %v2623_v29 = vld [vmem:[#allocation3 + $0x28] ss:$16 sps:$4 sm:$0xff]  }
 0x447   :  { %1905 = vrcp.f32 %v1128_v8  ;;  %v2641_v8 = vld [vmem:[#allocation3 + $0x6c] ss:$16 sps:$4 sm:$0xff]  }
 0x44f   :  { %v1902_v35 = vpop.eup %1901 }
 0x450   :  { %v1904_v10 = vpop.eup %1903  ;;  %v1132_v13 = vmul.f32 %v1902_v35, %v1900_v11  ;;  %v2629_v11 = vld [vmem:[#allocation3 + $0x4c] ss:$16 sps:$4 sm:$0xff]   ;;  %v2632_v35 = vld [vmem:[#allocation3 + $0x40] ss:$16 sps:$4 sm:$0xff]  }
 0x451   :  { %v1131_v12 = vmul.f32 %v1904_v10, %v2506_v6  ;;  %v1906_v23 = vpop.eup %1905  ;;  %v2635_v10 = vld [vmem:[#allocation3 + $0x48] ss:$16 sps:$4 sm:$0xff]  }
 0x453   :  { %v2551_v7 = vadd.f32 %v1132_v13, %v1131_v12  ;;  %v2638_v13 = vld [vmem:[#allocation3 + $0x64] ss:$16 sps:$4 sm:$0xff]   ;;  %v2644_v12 = vld [vmem:[#allocation3 + $0x60] ss:$16 sps:$4 sm:$0xff]  }
 0x455   :  { %1907 = vtanh.f32 %v2551_v7 }
 0x45f   :  { %v1908_v30 = vpop.eup %1907 }
 0x460   :  { %v1135_v31 = vmul.f32 %v1908_v30, %v1906_v23  ;;  %v2650_v23 = vld [vmem:[#allocation3 + $0x84] ss:$16 sps:$4 sm:$0xff]   ;;  %v2653_v30 = vld [vmem:[#allocation3 + $0x8c] ss:$16 sps:$4 sm:$0xff]  }
 0x462   :  { %v1136_v15 = vpack.c.bf16 %v1135_v31, %v1135_v31  ;;  %v2656_v31 = vld [vmem:[#allocation3 + $0x80] ss:$16 sps:$4 sm:$0xff]  }
 0x464   :  { %1723 = vst [vmem:[%s2744_s4 + $0xc] sm:$0xf] %v1136_v15  ;;  %1179 = vmatmul.mubr.bf16.vlgmr.msra.gmra.mrb[32].mxu0 %v1136_v15  ;;  %1220 = vmatmul.mubr.bf16.vlgmr.msra.gmra.mrb[32].mxu1 %v1136_v15  ;;  %v2659_v15 = vld [vmem:[#allocation3 + $0x88] ss:$16 sps:$4 sm:$0xff]  }
 0x465   :  { %1267 = vmatpush1.bf16.msra.mxu0 %v2186_v36  ;;  %1308 = vmatpush1.bf16.msra.mxu1 %v2188_v37  ;;  %v2589_v36 = vld [vmem:[#allocation3 + $0x4] ss:$16 sps:$4 sm:$0xff]   ;;  %v2592_v37 = vld [vmem:[#allocation3 + $0xc] ss:$16 sps:$4 sm:$0xff]  }
 0x466   :  { %1268 = vmatprep.subr.bf16.mxu0 %v2192_v38  ;;  %1309 = vmatprep.subr.bf16.mxu1 %v2194_v39 }
 0x467   :  { %1298 = vmatprep.mubr.bf16.mxu0 %v2770_v22  ;;  %1339 = vmatprep.mubr.bf16.mxu1 %v2770_v22 }
 0x469   :  { %1269 = vmatpush1.bf16.msra.mxu0 %v2196_v40  ;;  %1310 = vmatpush1.bf16.msra.mxu1 %v2200_v41  ;;  %v2776_v40 = vld [vmem:[#allocation11_spill] sm:$0xff] }
 0x46a   :  { %1270 = vmatprep.subr.bf16.mxu0 %v2204_v42  ;;  %1311 = vmatprep.subr.bf16.mxu1 %v2206_v43  ;;  %v2777_v42 = vld [vmem:[#allocation12_spill] sm:$0xff] }
 0x46d   :  { %1271 = vmatpush1.bf16.msra.mxu0 %v2213_v45  ;;  %1312 = vmatpush1.bf16.msra.mxu1 %v2215_v46 }
 0x46e   :  { %1272 = vmatprep.subr.bf16.mxu0 %v2219_v47  ;;  %1313 = vmatprep.subr.bf16.mxu1 %v2223_v48  ;;  %v2778_v47 = vld [vmem:[#allocation13_spill] sm:$0xff] }
 0x471   :  { %1273 = vmatpush1.bf16.msra.mxu0 %v2225_v49  ;;  %1314 = vmatpush1.bf16.msra.mxu1 %v2227_v50  ;;  %v2779_v49 = vld [vmem:[#allocation14_spill] sm:$0xff] }
 0x472   :  { %1274 = vmatprep.subr.bf16.mxu0 %v2231_v51  ;;  %1315 = vmatprep.subr.bf16.mxu1 %v2235_v52 }
 0x475   :  { %1275 = vmatpush1.bf16.msra.mxu0 %v2244_v54  ;;  %1316 = vmatpush1.bf16.msra.mxu1 %v2246_v55 }
 0x476   :  { %1276 = vmatprep.subr.bf16.mxu0 %v2250_v56  ;;  %1317 = vmatprep.subr.bf16.mxu1 %v2252_v57 }
 0x479   :  { %1277 = vmatpush1.bf16.msra.mxu0 %v2256_v58  ;;  %1318 = vmatpush1.bf16.msra.mxu1 %v2258_v59 }
 0x47a   :  { %1278 = vmatprep.subr.bf16.mxu0 %v2262_v60  ;;  %1319 = vmatprep.subr.bf16.mxu1 %v2264_v61 }
 0x47d   :  { %1279 = vmatpush1.bf16.msra.mxu0 %v2273_v63  ;;  %1320 = vmatpush1.bf16.msra.mxu1 %v2275_v1 }
 0x47e   :  { %1280 = vmatprep.subr.bf16.mxu0 %v2279_v2  ;;  %1321 = vmatprep.subr.bf16.mxu1 %v2281_v3 }
 0x481   :  { %1281 = vmatpush1.bf16.msra.mxu0 %v2285_v4  ;;  %1322 = vmatpush1.bf16.msra.mxu1 %v2287_v5 }
 0x482   :  { %1386 = vmatprep.subr.bf16.mxu0 %v2589_v36  ;;  %1427 = vmatprep.subr.bf16.mxu1 %v2592_v37 }
 0x537   :  { %v1180_v38 = vpop.f32.mrb[32].mxu0  ;;  %v1221_v39 = vpop.f32.mrb[32].mxu1 }
 0x538   :  { %v1228_v41 = vadd.f32 %v1180_v38, %v2776_v40  ;;  %v1230_v43 = vadd.f32 %v1221_v39, %v2777_v42  ;;  %v1182_v45 = vpop.f32.mrb[33].mxu0  ;;  %v1223_v46 = vpop.f32.mrb[33].mxu1  ;;  %v2662_v38 = vld [vmem:[#allocation3 + $0xa4] ss:$16 sps:$4 sm:$0xff]   ;;  %v2665_v39 = vld [vmem:[#allocation3 + $0xac] ss:$16 sps:$4 sm:$0xff]  }
 0x539   :  { %v1229_v48 = vadd.f32 %v1182_v45, %v2778_v47  ;;  %v1231_v50 = vadd.f32 %v1223_v46, %v2779_v49  ;;  %v1184_v51 = vpop.f32.mrb[34].mxu0  ;;  %v1225_v52 = vpop.f32.mrb[34].mxu1  ;;  %v2668_v40 = vld [vmem:[#allocation3 + $0xa0] ss:$16 sps:$4 sm:$0xff]   ;;  %v2782_v47 = vld [vmem:[#allocation17_spill] sm:$0xff] }
 0x53a   :  { %v1724_v54 = vmul.f32 -1.442695, %v1228_v41  ;;  %v1185_v55 = vpop.f32.mrb[35].mxu0  ;;  %v1226_v56 = vpop.f32.mrb[35].mxu1  ;;  %v2671_v41 = vld [vmem:[#allocation3 + $0xa8] ss:$16 sps:$4 sm:$0xff]  }
 0x53b   :  { %v1725_v57 = vmul.f32 -1.442695, %v1229_v48  ;;  %v1726_v58 = vmul.f32 -1.442695, %v1231_v50  ;;  %v2781_v45 = vld [vmem:[#allocation16_spill] sm:$0xff]  ;;  %v2783_v48 = vld [vmem:[#allocation18_spill] sm:$0xff] }
 0x53c   :  { %1909 = vpow2.f32 %v1724_v54 }
 0x53d   :  { %1911 = vpow2.f32 %v1725_v57 }
 0x53e   :  { %1913 = vpow2.f32 %v1726_v58 }
 0x53f   :  { %1915 = vtanh.f32 %v1230_v43  ;;  %v2780_v43 = vld [vmem:[#allocation15_spill] sm:$0xff] }
 0x546   :  { %v1910_v59 = vpop.eup %1909 }
 0x547   :  { %v1912_v6 = vpop.eup %1911  ;;  %v1235_v14 = vadd.f32 1.0, %v1910_v59 }
 0x548   :  { %v1241_v16 = vadd.f32 1.0, %v1912_v6  ;;  %v1914_v18 = vpop.eup %1913 }
 0x549   :  { %1917 = vrcp.f32 %v1235_v14  ;;  %v1916_v17 = vpop.eup %1915  ;;  %v1248_v21 = vadd.f32 1.0, %v1914_v18 }
 0x54a   :  { %1919 = vrcp.f32 %v1241_v16 }
 0x54b   :  { %1921 = vrcp.f32 %v1248_v21 }
 0x553   :  { %v1918_v19 = vpop.eup %1917 }
 0x554   :  { %v1920_v0 = vpop.eup %1919  ;;  %v1252_v20 = vmul.f32 %v1918_v19, %v1916_v17 }
 0x555   :  { %v1251_v27 = vmul.f32 %v1920_v0, %v2551_v7  ;;  %v1922_v24 = vpop.eup %1921  ;;  %v2647_v7 = vld [vmem:[#allocation3 + $0x68] ss:$16 sps:$4 sm:$0xff]  }
 0x557   :  { %v2600_v9 = vadd.f32 %v1252_v20, %v1251_v27  ;;  %v1998_v27 = vld [vmem:[#allocation3 + $0xcc] ss:$16 sps:$4 sm:$0xff]  }
 0x559   :  { %1923 = vtanh.f32 %v2600_v9 }
 0x563   :  { %v1924_v26 = vpop.eup %1923 }
 0x564   :  { %v1255_v28 = vmul.f32 %v1924_v26, %v1922_v24  ;;  %v2000_v24 = vld [vmem:[#allocation3 + $0xc8] ss:$16 sps:$4 sm:$0xff]   ;;  %v2001_v26 = vld [vmem:[#allocation3 + $0xe4] ss:$16 sps:$4 sm:$0xff]  }
 0x566   :  { %v1256_v53 = vpack.c.bf16 %v1255_v28, %v1255_v28  ;;  %v2002_v28 = vld [vmem:[#allocation3 + $0xec] ss:$16 sps:$4 sm:$0xff]  }
 0x568   :  { %1727 = vst [vmem:[%s2744_s4 + $0x10] sm:$0xf] %v1256_v53  ;;  %1299 = vmatmul.mubr.bf16.vlgmr.msra.gmra.mrb[36].mxu0 %v1256_v53  ;;  %1340 = vmatmul.mubr.bf16.vlgmr.msra.gmra.mrb[36].mxu1 %v1256_v53  ;;  %v2003_v53 = vld [vmem:[#allocation3 + $0xe0] ss:$16 sps:$4 sm:$0xff]  }
 0x569   :  { %1387 = vmatpush1.bf16.msra.mxu0 %v2606_v33  ;;  %1428 = vmatpush1.bf16.msra.mxu1 %v2609_v34 }
 0x56a   :  { %1388 = vmatprep.subr.bf16.mxu0 %v2612_v32  ;;  %1429 = vmatprep.subr.bf16.mxu1 %v2615_v44 }
 0x56b   :  { %1418 = vmatprep.mubr.bf16.mxu0 %v2770_v22  ;;  %1459 = vmatprep.mubr.bf16.mxu1 %v2770_v22 }
 0x56d   :  { %1389 = vmatpush1.bf16.msra.mxu0 %v2620_v62  ;;  %1430 = vmatpush1.bf16.msra.mxu1 %v2623_v29 }
 0x56e   :  { %1390 = vmatprep.subr.bf16.mxu0 %v2626_v25  ;;  %1431 = vmatprep.subr.bf16.mxu1 %v2629_v11 }
 0x571   :  { %1391 = vmatpush1.bf16.msra.mxu0 %v2632_v35  ;;  %1432 = vmatpush1.bf16.msra.mxu1 %v2635_v10 }
 0x572   :  { %1392 = vmatprep.subr.bf16.mxu0 %v2638_v13  ;;  %1433 = vmatprep.subr.bf16.mxu1 %v2641_v8 }
 0x575   :  { %1393 = vmatpush1.bf16.msra.mxu0 %v2644_v12  ;;  %1434 = vmatpush1.bf16.msra.mxu1 %v2647_v7 }
 0x576   :  { %1394 = vmatprep.subr.bf16.mxu0 %v2650_v23  ;;  %1435 = vmatprep.subr.bf16.mxu1 %v2653_v30 }
 0x579   :  { %1395 = vmatpush1.bf16.msra.mxu0 %v2656_v31  ;;  %1436 = vmatpush1.bf16.msra.mxu1 %v2659_v15 }
 0x57a   :  { %1396 = vmatprep.subr.bf16.mxu0 %v2662_v38  ;;  %1437 = vmatprep.subr.bf16.mxu1 %v2665_v39 }
 0x57d   :  { %1397 = vmatpush1.bf16.msra.mxu0 %v2668_v40  ;;  %1438 = vmatpush1.bf16.msra.mxu1 %v2671_v41 }
 0x57e   :  { %1398 = vmatprep.subr.bf16.mxu0 %v2262_v60  ;;  %1439 = vmatprep.subr.bf16.mxu1 %v2264_v61 }
 0x581   :  { %1399 = vmatpush1.bf16.msra.mxu0 %v2273_v63  ;;  %1440 = vmatpush1.bf16.msra.mxu1 %v2275_v1 }
 0x582   :  { %1400 = vmatprep.subr.bf16.mxu0 %v2279_v2  ;;  %1441 = vmatprep.subr.bf16.mxu1 %v2281_v3 }
 0x585   :  { %1401 = vmatpush1.bf16.msra.mxu0 %v2285_v4  ;;  %1442 = vmatpush1.bf16.msra.mxu1 %v2287_v5 }
 0x586   :  { %1506 = vmatprep.subr.bf16.mxu0 %v2589_v36  ;;  %1547 = vmatprep.subr.bf16.mxu1 %v2592_v37 }
 0x63b   :  { %v1300_v42 = vpop.f32.mrb[36].mxu0  ;;  %v1341_v60 = vpop.f32.mrb[36].mxu1 }
 0x63c   :  { %v1348_v61 = vadd.f32 %v1300_v42, %v2780_v43  ;;  %v1350_v63 = vadd.f32 %v1341_v60, %v2781_v45  ;;  %v1302_v46 = vpop.f32.mrb[37].mxu0  ;;  %v1343_v1 = vpop.f32.mrb[37].mxu1 }
 0x63d   :  { %v1349_v2 = vadd.f32 %v1302_v46, %v2782_v47  ;;  %v1351_v3 = vadd.f32 %v1343_v1, %v2783_v48  ;;  %v1304_v49 = vpop.f32.mrb[38].mxu0  ;;  %v1345_v4 = vpop.f32.mrb[38].mxu1 }
 0x63e   :  { %v1728_v50 = vmul.f32 -1.442695, %v1348_v61  ;;  %v1305_v5 = vpop.f32.mrb[39].mxu0  ;;  %v1346_v51 = vpop.f32.mrb[39].mxu1 }
 0x63f   :  { %v1729_v36 = vmul.f32 -1.442695, %v1349_v2  ;;  %v1730_v37 = vmul.f32 -1.442695, %v1351_v3  ;;  %v2788_v51 = vld [vmem:[#allocation23_spill] sm:$0xff] }
 0x640   :  { %1925 = vpow2.f32 %v1728_v50 }
 0x641   :  { %1927 = vpow2.f32 %v1729_v36 }
 0x642   :  { %1929 = vpow2.f32 %v1730_v37  ;;  %v2789_v37 = vld [vmem:[#allocation24_spill] sm:$0xff] }
 0x643   :  { %1931 = vtanh.f32 %v1350_v63 }
 0x64a   :  { %v1926_v52 = vpop.eup %1925 }
 0x64b   :  { %v1928_v54 = vpop.eup %1927  ;;  %v1355_v55 = vadd.f32 1.0, %v1926_v52 }
 0x64c   :  { %v1361_v56 = vadd.f32 1.0, %v1928_v54  ;;  %v1930_v57 = vpop.eup %1929 }
 0x64d   :  { %1933 = vrcp.f32 %v1355_v55  ;;  %v1932_v58 = vpop.eup %1931  ;;  %v1368_v16 = vadd.f32 1.0, %v1930_v57 }
 0x64e   :  { %1935 = vrcp.f32 %v1361_v56  ;;  %v2790_v56 = vld [vmem:[#allocation25_spill] sm:$0xff] }
 0x64f   :  { %1937 = vrcp.f32 %v1368_v16 }
 0x657   :  { %v1934_v59 = vpop.eup %1933 }
 0x658   :  { %v1936_v6 = vpop.eup %1935  ;;  %v1372_v14 = vmul.f32 %v1934_v59, %v1932_v58  ;;  %v2791_v58 = vld [vmem:[#allocation26_spill] sm:$0xff] }
 0x659   :  { %v1371_v18 = vmul.f32 %v1936_v6, %v2600_v9  ;;  %v1938_v19 = vpop.eup %1937  ;;  %v1999_v9 = vld [vmem:[#allocation3 + $0xc0] ss:$16 sps:$4 sm:$0xff]  }
 0x65b   :  { %v2689_v17 = vadd.f32 %v1372_v14, %v1371_v18 }
 0x65d   :  { %1939 = vtanh.f32 %v2689_v17 }
 0x667   :  { %v1940_v0 = vpop.eup %1939 }
 0x668   :  { %v1375_v20 = vmul.f32 %v1940_v0, %v1938_v19 }
 0x66a   :  { %v1376_v21 = vpack.c.bf16 %v1375_v20, %v1375_v20 }
 0x66c   :  { %1731 = vst [vmem:[%s2744_s4 + $0x14] sm:$0xf] %v1376_v21  ;;  %1419 = vmatmul.mubr.bf16.vlgmr.msra.gmra.mrb[40].mxu0 %v1376_v21  ;;  %1460 = vmatmul.mubr.bf16.vlgmr.msra.gmra.mrb[40].mxu1 %v1376_v21 }
 0x66d   :  { %1507 = vmatpush1.bf16.msra.mxu0 %v2606_v33  ;;  %1548 = vmatpush1.bf16.msra.mxu1 %v2609_v34  ;;  %v2004_v33 = vld [vmem:[#allocation3 + $0xe8] ss:$16 sps:$4 sm:$0xff]  }
 0x66e   :  { %1508 = vmatprep.subr.bf16.mxu0 %v2612_v32  ;;  %1549 = vmatprep.subr.bf16.mxu1 %v2615_v44  ;;  %v2784_v44 = vld [vmem:[#allocation19_spill] sm:$0xff] }
 0x66f   :  { %1538 = vmatprep.mubr.bf16.mxu0 %v2770_v22  ;;  %1579 = vmatprep.mubr.bf16.mxu1 %v2770_v22  ;;  %v1997_v22 = vld [vmem:[#allocation3 + $0xc4] ss:$16 sps:$4 sm:$0xff]  }
 0x671   :  { %1509 = vmatpush1.bf16.msra.mxu0 %v2620_v62  ;;  %1550 = vmatpush1.bf16.msra.mxu1 %v2623_v29  ;;  %v2785_v29 = vld [vmem:[#allocation20_spill] sm:$0xff] }
 0x672   :  { %1510 = vmatprep.subr.bf16.mxu0 %v2626_v25  ;;  %1551 = vmatprep.subr.bf16.mxu1 %v2629_v11 }
 0x675   :  { %1511 = vmatpush1.bf16.msra.mxu0 %v2632_v35  ;;  %1552 = vmatpush1.bf16.msra.mxu1 %v2635_v10  ;;  %v2786_v10 = vld [vmem:[#allocation21_spill] sm:$0xff] }
 0x676   :  { %1512 = vmatprep.subr.bf16.mxu0 %v2638_v13  ;;  %1553 = vmatprep.subr.bf16.mxu1 %v2641_v8  ;;  %v2787_v8 = vld [vmem:[#allocation22_spill] sm:$0xff] }
 0x679   :  { %1513 = vmatpush1.bf16.msra.mxu0 %v2644_v12  ;;  %1554 = vmatpush1.bf16.msra.mxu1 %v2647_v7 }
 0x67a   :  { %1514 = vmatprep.subr.bf16.mxu0 %v2650_v23  ;;  %1555 = vmatprep.subr.bf16.mxu1 %v2653_v30 }
 0x67d   :  { %1515 = vmatpush1.bf16.msra.mxu0 %v2656_v31  ;;  %1556 = vmatpush1.bf16.msra.mxu1 %v2659_v15 }
 0x67e   :  { %1516 = vmatprep.subr.bf16.mxu0 %v2662_v38  ;;  %1557 = vmatprep.subr.bf16.mxu1 %v2665_v39 }
 0x681   :  { %1517 = vmatpush1.bf16.msra.mxu0 %v2668_v40  ;;  %1558 = vmatpush1.bf16.msra.mxu1 %v2671_v41 }
 0x682   :  { %1518 = vmatprep.subr.bf16.mxu0 %v1997_v22  ;;  %1559 = vmatprep.subr.bf16.mxu1 %v1998_v27 }
 0x685   :  { %1519 = vmatpush1.bf16.msra.mxu0 %v1999_v9  ;;  %1560 = vmatpush1.bf16.msra.mxu1 %v2000_v24 }
 0x686   :  { %1520 = vmatprep.subr.bf16.mxu0 %v2001_v26  ;;  %1561 = vmatprep.subr.bf16.mxu1 %v2002_v28 }
 0x689   :  { %1521 = vmatpush1.bf16.msra.mxu0 %v2003_v53  ;;  %1562 = vmatpush1.bf16.msra.mxu1 %v2004_v33 }
 0x73f   :  { %v1420_v34 = vpop.f32.mrb[40].mxu0  ;;  %v1461_v32 = vpop.f32.mrb[40].mxu1 }
 0x740   :  { %v1468_v62 = vadd.f32 %v1420_v34, %v2784_v44  ;;  %v1470_v25 = vadd.f32 %v1461_v32, %v2785_v29  ;;  %v1422_v11 = vpop.f32.mrb[41].mxu0  ;;  %v1463_v35 = vpop.f32.mrb[41].mxu1 }
 0x741   :  { %v1469_v13 = vadd.f32 %v1422_v11, %v2786_v10  ;;  %v1471_v12 = vadd.f32 %v1463_v35, %v2787_v8  ;;  %v1424_v7 = vpop.f32.mrb[42].mxu0  ;;  %v1465_v23 = vpop.f32.mrb[42].mxu1 }
 0x742   :  { %v1732_v30 = vmul.f32 -1.442695, %v1468_v62  ;;  %v1425_v31 = vpop.f32.mrb[43].mxu0  ;;  %v1466_v15 = vpop.f32.mrb[43].mxu1 }
 0x743   :  { %v1733_v38 = vmul.f32 -1.442695, %v1469_v13  ;;  %v1734_v39 = vmul.f32 -1.442695, %v1471_v12 }
 0x744   :  { %1941 = vpow2.f32 %v1732_v30 }
 0x745   :  { %1943 = vpow2.f32 %v1733_v38 }
 0x746   :  { %1945 = vpow2.f32 %v1734_v39 }
 0x747   :  { %1947 = vtanh.f32 %v1470_v25 }
 0x74e   :  { %v1942_v40 = vpop.eup %1941 }
 0x74f   :  { %v1944_v41 = vpop.eup %1943  ;;  %v1475_v42 = vadd.f32 1.0, %v1942_v40 }
 0x750   :  { %v1481_v60 = vadd.f32 1.0, %v1944_v41  ;;  %v1946_v43 = vpop.eup %1945 }
 0x751   :  { %1949 = vrcp.f32 %v1475_v42  ;;  %v1948_v61 = vpop.eup %1947  ;;  %v1488_v1 = vadd.f32 1.0, %v1946_v43 }
 0x752   :  { %1951 = vrcp.f32 %v1481_v60 }
 0x753   :  { %1953 = vrcp.f32 %v1488_v1 }
 0x75b   :  { %v1950_v45 = vpop.eup %1949 }
 0x75c   :  { %v1952_v63 = vpop.eup %1951  ;;  %v1492_v46 = vmul.f32 %v1950_v45, %v1948_v61 }
 0x75d   :  { %v1491_v47 = vmul.f32 %v1952_v63, %v2689_v17  ;;  %v1954_v48 = vpop.eup %1953 }
 0x75f   :  { %v1493_v2 = vadd.f32 %v1492_v46, %v1491_v47 }
 0x761   :  { %1955 = vtanh.f32 %v1493_v2 }
 0x76b   :  { %v1956_v3 = vpop.eup %1955 }
 0x76c   :  { %v1495_v49 = vmul.f32 %v1956_v3, %v1954_v48 }
 0x76e   :  { %v1496_v4 = vpack.c.bf16 %v1495_v49, %v1495_v49 }
 0x770   :  { %1735 = vst [vmem:[%s2744_s4 + $0x18] sm:$0xf] %v1496_v4  ;;  %1539 = vmatmul.mubr.bf16.vlgmr.msra.gmra.mrb[44].mxu0 %v1496_v4  ;;  %1580 = vmatmul.mubr.bf16.vlgmr.msra.gmra.mrb[44].mxu1 %v1496_v4 }
 0x843   :  { %v1540_v50 = vpop.f32.mrb[44].mxu0  ;;  %v1581_v5 = vpop.f32.mrb[44].mxu1 }
 0x844   :  { %v1588_v36 = vadd.f32 %v1540_v50, %v2788_v51  ;;  %v1590_v52 = vadd.f32 %v1581_v5, %v2789_v37  ;;  %v1542_v54 = vpop.f32.mrb[45].mxu0  ;;  %v1583_v55 = vpop.f32.mrb[45].mxu1 }
 0x845   :  { %v1589_v57 = vadd.f32 %v1542_v54, %v2790_v56  ;;  %v1591_v59 = vadd.f32 %v1583_v55, %v2791_v58  ;;  %v1544_v6 = vpop.f32.mrb[46].mxu0  ;;  %v1585_v14 = vpop.f32.mrb[46].mxu1 }
 0x846   :  { %v1736_v16 = vmul.f32 -1.442695, %v1588_v36  ;;  %v1545_v18 = vpop.f32.mrb[47].mxu0  ;;  %v1586_v17 = vpop.f32.mrb[47].mxu1 }
 0x847   :  { %v1737_v19 = vmul.f32 -1.442695, %v1589_v57  ;;  %v1738_v0 = vmul.f32 -1.442695, %v1591_v59 }
 0x848   :  { %1957 = vpow2.f32 %v1736_v16 }
 0x849   :  { %1959 = vpow2.f32 %v1737_v19 }
 0x84a   :  { %1961 = vpow2.f32 %v1738_v0 }
 0x84b   :  { %1963 = vtanh.f32 %v1590_v52 }
 0x852   :  { %v1958_v20 = vpop.eup %1957 }
 0x853   :  { %v1960_v21 = vpop.eup %1959  ;;  %v1595_v22 = vadd.f32 1.0, %v1958_v20 }
 0x854   :  { %v1601_v27 = vadd.f32 1.0, %v1960_v21  ;;  %v1962_v9 = vpop.eup %1961 }
 0x855   :  { %1965 = vrcp.f32 %v1595_v22  ;;  %v1964_v24 = vpop.eup %1963  ;;  %v1608_v33 = vadd.f32 1.0, %v1962_v9 }
 0x856   :  { %1967 = vrcp.f32 %v1601_v27 }
 0x857   :  { %1969 = vrcp.f32 %v1608_v33 }
 0x85f   :  { %v1966_v26 = vpop.eup %1965 }
 0x860   :  { %v1968_v28 = vpop.eup %1967  ;;  %v1612_v53 = vmul.f32 %v1966_v26, %v1964_v24 }
 0x861   :  { %v1611_v34 = vmul.f32 %v1968_v28, %v1493_v2  ;;  %v1970_v44 = vpop.eup %1969 }
 0x863   :  { %v1613_v32 = vadd.f32 %v1612_v53, %v1611_v34 }
 0x865   :  { %1971 = vtanh.f32 %v1613_v32  ;;  %1620 = vst [vmem:[%s2746_s6] sm:$0xff] %v1613_v32 }
 0x86f   :  { %v1972_v62 = vpop.eup %1971 }
 0x870   :  { %v1615_v29 = vmul.f32 %v1972_v62, %v1970_v44 }
 0x872   :  { %v1616_v25 = vpack.c.bf16 %v1615_v29, %v1615_v29  ;;  %1619 = vst [vmem:[%s2745_s5] sm:$0xff] %v1615_v29 }
 0x874   :  { %1739 = vst [vmem:[%s2744_s4 + $0x1c] sm:$0xf] %v1616_v25 }
 0x875   :  { %1633 = vsyncpa [#allocation4], 1 }

</bundles_post_ra>
